<compile_context>
chip_gen: v6e
topology: v6e:2x2x1
jax: 0.10.0
libtpu: 0.0.40
codegen_flags: <defaults>
</compile_context>

<pallas_src>
import functools
import math

import jax
import jax.numpy as jnp
from jax import lax
from jax.experimental import pallas as pl
from jax.experimental.pallas import tpu as pltpu


# ----------------------------- kernel ----------------------------------------

def decoder_layer_kernel(dec_ref, enc_ref, sbias_ref, cbias_ref,
                         wqkv_s_ref, bqkv_s_ref, wo_s_ref, bo_s_ref,
                         g1_ref, be1_ref,
                         wq_c_ref, bq_c_ref, wkv_c_ref, bkv_c_ref,
                         wo_c_ref, bo_c_ref, g2_ref, be2_ref,
                         w1_ref, b1_ref, w2_ref, b2_ref, g3_ref, be3_ref,
                         out_ref, *, n_heads):
    f32, bf16 = jnp.float32, jnp.bfloat16

    B, T, _ = sbias_ref.shape          # (B, T, T)
    S = cbias_ref.shape[2]             # (B, T, S)
    D = dec_ref.shape[1]
    H = n_heads
    dk = D // H
    scale = 1.0 / math.sqrt(dk)

    x = dec_ref[...]                   # (B*T, D) bf16  (batch folded into rows)
    enc = enc_ref[...]                 # (B*S, D) bf16

    def mm_bf16(a_bf, w_ref, b_ref):
        # bf16 operands on MXU, f32 accumulate + f32 bias, result kept bf16
        # because it feeds another MXU op.
        return (jnp.dot(a_bf, w_ref[...], preferred_element_type=f32)
                + b_ref[0]).astype(bf16)

    def mm_f32(a_bf, w_ref, b_ref):
        # Result feeds residual / LayerNorm -> keep f32.
        return jnp.dot(a_bf, w_ref[...], preferred_element_type=f32) + b_ref[0]

    def layernorm(h, g_ref, b_ref, eps=1e-12):
        mean = jnp.mean(h, axis=-1, keepdims=True)
        var = jnp.mean(jnp.square(h - mean), axis=-1, keepdims=True)
        return g_ref[0] * ((h - mean) * lax.rsqrt(var + eps)) + b_ref[0]

    def mha(q_bf, k_bf, v_bf, bias_ref, lk):
        # q_bf: (B*T, D) bf16, k_bf/v_bf: (B*lk, D) bf16, bias_ref: (B, T, lk) f32
        # Per-batch (small unrolled loop), heads batched inside a single 3-D
        # leading-batch einsum per matmul; operands stay bf16 throughout.
        ctx_parts = []
        for b in range(B):
            qh = q_bf[b * T:(b + 1) * T].reshape(T, H, dk).transpose(1, 0, 2)
            kh = k_bf[b * lk:(b + 1) * lk].reshape(lk, H, dk).transpose(1, 0, 2)
            vh = v_bf[b * lk:(b + 1) * lk].reshape(lk, H, dk).transpose(1, 0, 2)
            s = jnp.einsum("hqd,hkd->hqk", qh, kh,
                           preferred_element_type=f32) * scale     # (H,T,lk) f32
            s = s + bias_ref[b][None, :, :]                         # additive mask
            s = s - jnp.max(s, axis=-1, keepdims=True)
            p = jnp.exp(s)
            p = p * pl.reciprocal(jnp.sum(p, axis=-1, keepdims=True), approx=True)
            ctx = jnp.einsum("hqk,hkd->hqd", p.astype(bf16), vh,
                             preferred_element_type=f32)            # (H,T,dk) f32
            ctx_parts.append(ctx.transpose(1, 0, 2).reshape(T, D))
        return jnp.concatenate(ctx_parts, axis=0)                   # (B*T, D) f32

    # ---- 1) masked multi-head self attention (fused QKV projection) --------
    qkv = mm_bf16(x, wqkv_s_ref, bqkv_s_ref)                        # (B*T, 3D) bf16
    q, k, v = qkv[:, :D], qkv[:, D:2 * D], qkv[:, 2 * D:]
    self_out = mm_f32(mha(q, k, v, sbias_ref, T).astype(bf16), wo_s_ref, bo_s_ref)
    h1 = layernorm(x.astype(f32) + self_out, g1_ref, be1_ref)

    # ---- 2) multi-head cross attention (fused KV projection of encoder) ----
    qc = mm_bf16(h1.astype(bf16), wq_c_ref, bq_c_ref)               # (B*T, D) bf16
    kv = mm_bf16(enc, wkv_c_ref, bkv_c_ref)                         # (B*S, 2D) bf16
    kc, vc = kv[:, :D], kv[:, D:]
    cross_out = mm_f32(mha(qc, kc, vc, cbias_ref, S).astype(bf16), wo_c_ref, bo_c_ref)
    h2 = layernorm(h1 + cross_out, g2_ref, be2_ref)

    # ---- 3) position-wise feed forward --------------------------------------
    ff = jnp.maximum(mm_bf16(h2.astype(bf16), w1_ref, b1_ref), 0.0)  # bf16 hidden
    ff_out = mm_f32(ff, w2_ref, b2_ref)
    h3 = layernorm(h2 + ff_out, g3_ref, be3_ref)

    out_ref[...] = h3.astype(out_ref.dtype)


# ----------------------------- wrappers ---------------------------------------

_PARAM_ORDER = ("wqkv_s", "bqkv_s", "wo_s", "bo_s", "g1", "be1",
                "wq_c", "bq_c", "wkv_c", "bkv_c", "wo_c", "bo_c", "g2", "be2",
                "w1", "b1", "w2", "b2", "g3", "be3")
_MATMUL_WEIGHTS = frozenset(
    {"wqkv_s", "wo_s", "wq_c", "wkv_c", "wo_c", "w1", "w2"})


def _full_spec(shape):
    nd = len(shape)
    return pl.BlockSpec(shape, lambda i, _nd=nd: (0,) * _nd)


def _build_call(dec2, enc2, sbias, cbias, weights, n_heads):
    BT, D = dec2.shape
    in_specs = ([_full_spec(a.shape) for a in (dec2, enc2, sbias, cbias)]
                + [_full_spec(w.shape) for w in weights])
    return pl.pallas_call(
        functools.partial(decoder_layer_kernel, n_heads=n_heads),
        out_shape=jax.ShapeDtypeStruct((BT, D), jnp.float32),
        grid=(1,),                               # whole layer in one step
        in_specs=in_specs,
        out_specs=_full_spec((BT, D)),
        compiler_params=pltpu.CompilerParams(
            dimension_semantics=("arbitrary",),
            vmem_limit_bytes=32 * 1024 * 1024),
    )(dec2, enc2, sbias, cbias, *weights)


def decoder_layer_pallas(dec, enc, smask, cmask, params, n_heads):
    B, T, D = dec.shape
    S = enc.shape[1]
    bf16, f32 = jnp.bfloat16, jnp.float32

    # Additive mask biases computed once outside the kernel (no int32 DMA,
    # no per-step compare/select inside the kernel).
    sbias = jnp.where(smask != 0, -1e9, 0.0).astype(f32)     # (B, T, T)
    cbias = jnp.where(cmask != 0, -1e9, 0.0).astype(f32)     # (B, T, S)

    # bf16 activation DMA; batch folded into the row dimension.
    dec2 = dec.astype(bf16).reshape(B * T, D)
    enc2 = enc.astype(bf16).reshape(B * S, D)

    # Matmul weights stored/DMAed as bf16; biases + LayerNorm params in f32.
    weights = [params[n].astype(bf16) if n in _MATMUL_WEIGHTS
               else params[n].astype(f32)
               for n in _PARAM_ORDER]

    out = _build_call(dec2, enc2, sbias, cbias, weights, n_heads)
    return out.reshape(B, T, D)


# ----------------------------- pure-JAX reference -----------------------------

def _mm_ref(a, w, b):
    return jnp.dot(a.astype(jnp.bfloat16), w.astype(jnp.bfloat16),
                   preferred_element_type=jnp.float32) + b[0]


def _ln_ref(x, g, b, eps=1e-12):
    mean = jnp.mean(x, axis=-1, keepdims=True)
    var = jnp.mean((x - mean) ** 2, axis=-1, keepdims=True)
    return g * ((x - mean) / jnp.sqrt(var + eps)) + b


def _mha_ref(q, k, v, mask, n_heads):
    B, lq, D = q.shape
    lk = k.shape[1]
    dk = D // n_heads
    bf16 = jnp.bfloat16
    qh = q.reshape(B, lq, n_heads, dk).transpose(0, 2, 1, 3)
    kh = k.reshape(B, lk, n_heads, dk).transpose(0, 2, 1, 3)
    vh = v.reshape(B, lk, n_heads, dk).transpose(0, 2, 1, 3)
    s = jnp.einsum("bhqd,bhkd->bhqk", qh.astype(bf16), kh.astype(bf16),
                   preferred_element_type=jnp.float32) / math.sqrt(dk)
    s = s + jnp.where(mask[:, None] != 0, -1e9, 0.0)
    a = jax.nn.softmax(s, axis=-1)
    ctx = jnp.einsum("bhqk,bhkd->bhqd", a.astype(bf16), vh.astype(bf16),
                     preferred_element_type=jnp.float32)
    return ctx.transpose(0, 2, 1, 3).reshape(B, lq, D)


def decoder_layer_ref(dec, enc, smask, cmask, p, n_heads):
    D = dec.shape[-1]
    qkv = _mm_ref(dec, p["wqkv_s"], p["bqkv_s"])
    q, k, v = qkv[..., :D], qkv[..., D:2 * D], qkv[..., 2 * D:]
    h1 = _ln_ref(dec + _mm_ref(_mha_ref(q, k, v, smask, n_heads),
                               p["wo_s"], p["bo_s"]), p["g1"][0], p["be1"][0])
    qc = _mm_ref(h1, p["wq_c"], p["bq_c"])
    kv = _mm_ref(enc, p["wkv_c"], p["bkv_c"])
    kc, vc = kv[..., :D], kv[..., D:]
    h2 = _ln_ref(h1 + _mm_ref(_mha_ref(qc, kc, vc, cmask, n_heads),
                              p["wo_c"], p["bo_c"]), p["g2"][0], p["be2"][0])
    ff = jnp.maximum(_mm_ref(h2, p["w1"], p["b1"]), 0.0)
    ff = _mm_ref(ff, p["w2"], p["b2"])
    return _ln_ref(h2 + ff, p["g3"][0], p["be3"][0])


# ----------------------------- param init -------------------------------------

def init_layer_params(key, d_model, d_ff):
    ks = jax.random.split(key, 20)
    s_dm = 1.0 / math.sqrt(d_model)
    s_ff = 1.0 / math.sqrt(d_ff)
    f32 = jnp.float32

    def nrm(k, shape, s):
        return jax.random.normal(k, shape, f32) * s

    return {
        "wqkv_s": nrm(ks[0], (d_model, 3 * d_model), s_dm),
        "bqkv_s": nrm(ks[1], (1, 3 * d_model), 0.02),
        "wo_s":   nrm(ks[2], (d_model, d_model), s_dm),
        "bo_s":   nrm(ks[3], (1, d_model), 0.02),
        "g1":     1.0 + nrm(ks[4], (1, d_model), 0.02),
        "be1":    nrm(ks[5], (1, d_model), 0.02),
        "wq_c":   nrm(ks[6], (d_model, d_model), s_dm),
        "bq_c":   nrm(ks[7], (1, d_model), 0.02),
        "wkv_c":  nrm(ks[8], (d_model, 2 * d_model), s_dm),
        "bkv_c":  nrm(ks[9], (1, 2 * d_model), 0.02),
        "wo_c":   nrm(ks[10], (d_model, d_model), s_dm),
        "bo_c":   nrm(ks[11], (1, d_model), 0.02),
        "g2":     1.0 + nrm(ks[12], (1, d_model), 0.02),
        "be2":    nrm(ks[13], (1, d_model), 0.02),
        "w1":     nrm(ks[14], (d_model, d_ff), s_dm),
        "b1":     nrm(ks[15], (1, d_ff), 0.02),
        "w2":     nrm(ks[16], (d_ff, d_model), s_ff),
        "b2":     nrm(ks[17], (1, d_model), 0.02),
        "g3":     1.0 + nrm(ks[18], (1, d_model), 0.02),
        "be3":    nrm(ks[19], (1, d_model), 0.02),
    }


# ----------------------------- main --------------------------------------------

if __name__ == "__main__":
    B, T, S = 2, 8, 16              # batch, tgt_len, src_len
    D, n_heads, d_ff = 128, 4, 256  # lane-dense d_model / d_ff

    key = jax.random.PRNGKey(0)
    k_dec, k_enc, k_par = jax.random.split(key, 3)

    dec = jax.random.normal(k_dec, (B, T, D), jnp.float32)
    enc = jax.random.normal(k_enc, (B, S, D), jnp.float32)

    # decoder self-attn mask: causal (nonzero == masked, torch masked_fill)
    smask = jnp.tile(jnp.triu(jnp.ones((T, T), jnp.int32), k=1)[None], (B, 1, 1))
    # cross-attn mask: last 3 encoder positions are padding
    cmask = jnp.zeros((B, T, S), jnp.int32).at[:, :, S - 3:].set(1)

    params = init_layer_params(k_par, D, d_ff)

    out = decoder_layer_pallas(dec, enc, smask, cmask, params, n_heads)
    out = jax.block_until_ready(out)

    # Reference computed on the same bf16-rounded activations the kernel sees.
    dec_q = dec.astype(jnp.bfloat16).astype(jnp.float32)
    enc_q = enc.astype(jnp.bfloat16).astype(jnp.float32)
    ref = decoder_layer_ref(dec_q, enc_q, smask, cmask, params, n_heads)

    assert out.shape == (B, T, D)
    out_f32 = out.astype(jnp.float32)
    max_err = jnp.max(jnp.abs(out_f32 - ref))
    assert jnp.allclose(out_f32, ref, atol=1e-2, rtol=1e-2), (
        f"max abs diff {max_err}")

    print("KERNEL_OK")
</pallas_src>

<mosaic_0001>
module attributes {stable_mosaic.version = 11 : i64} {
  func.func @decoder_layer_kernel(%arg0: i32, %arg1: memref<16x128xbf16, #tpu.memory_space<vmem>>, %arg2: memref<32x128xbf16, #tpu.memory_space<vmem>>, %arg3: memref<2x8x8xf32, #tpu.memory_space<vmem>>, %arg4: memref<2x8x16xf32, #tpu.memory_space<vmem>>, %arg5: memref<128x384xbf16, #tpu.memory_space<vmem>>, %arg6: memref<1x384xf32, #tpu.memory_space<vmem>>, %arg7: memref<128x128xbf16, #tpu.memory_space<vmem>>, %arg8: memref<1x128xf32, #tpu.memory_space<vmem>>, %arg9: memref<1x128xf32, #tpu.memory_space<vmem>>, %arg10: memref<1x128xf32, #tpu.memory_space<vmem>>, %arg11: memref<128x128xbf16, #tpu.memory_space<vmem>>, %arg12: memref<1x128xf32, #tpu.memory_space<vmem>>, %arg13: memref<128x256xbf16, #tpu.memory_space<vmem>>, %arg14: memref<1x256xf32, #tpu.memory_space<vmem>>, %arg15: memref<128x128xbf16, #tpu.memory_space<vmem>>, %arg16: memref<1x128xf32, #tpu.memory_space<vmem>>, %arg17: memref<1x128xf32, #tpu.memory_space<vmem>>, %arg18: memref<1x128xf32, #tpu.memory_space<vmem>>, %arg19: memref<128x256xbf16, #tpu.memory_space<vmem>>, %arg20: memref<1x256xf32, #tpu.memory_space<vmem>>, %arg21: memref<256x128xbf16, #tpu.memory_space<vmem>>, %arg22: memref<1x128xf32, #tpu.memory_space<vmem>>, %arg23: memref<1x128xf32, #tpu.memory_space<vmem>>, %arg24: memref<1x128xf32, #tpu.memory_space<vmem>>, %arg25: memref<16x128xf32, #tpu.memory_space<vmem>>) attributes {dimension_semantics = [#tpu.dimension_semantics<arbitrary>], iteration_bounds = array<i64: 1>, scalar_prefetch = 0 : i64, scratch_operands = 0 : i64, tpu.core_type = #tpu.core_type<tc>, window_params = [{pipeline_mode = #tpu.pipeline_mode<synchronous>, transform_indices = @transform_0, window_bounds = array<i64: 16, 128>}, {pipeline_mode = #tpu.pipeline_mode<synchronous>, transform_indices = @transform_1, window_bounds = array<i64: 32, 128>}, {pipeline_mode = #tpu.pipeline_mode<synchronous>, transform_indices = @transform_2, window_bounds = array<i64: 2, 8, 8>}, {pipeline_mode = #tpu.pipeline_mode<synchronous>, transform_indices = @transform_3, window_bounds = array<i64: 2, 8, 16>}, {pipeline_mode = #tpu.pipeline_mode<synchronous>, transform_indices = @transform_4, window_bounds = array<i64: 128, 384>}, {pipeline_mode = #tpu.pipeline_mode<synchronous>, transform_indices = @transform_5, window_bounds = array<i64: 1, 384>}, {pipeline_mode = #tpu.pipeline_mode<synchronous>, transform_indices = @transform_6, window_bounds = array<i64: 128, 128>}, {pipeline_mode = #tpu.pipeline_mode<synchronous>, transform_indices = @transform_7, window_bounds = array<i64: 1, 128>}, {pipeline_mode = #tpu.pipeline_mode<synchronous>, transform_indices = @transform_8, window_bounds = array<i64: 1, 128>}, {pipeline_mode = #tpu.pipeline_mode<synchronous>, transform_indices = @transform_9, window_bounds = array<i64: 1, 128>}, {pipeline_mode = #tpu.pipeline_mode<synchronous>, transform_indices = @transform_10, window_bounds = array<i64: 128, 128>}, {pipeline_mode = #tpu.pipeline_mode<synchronous>, transform_indices = @transform_11, window_bounds = array<i64: 1, 128>}, {pipeline_mode = #tpu.pipeline_mode<synchronous>, transform_indices = @transform_12, window_bounds = array<i64: 128, 256>}, {pipeline_mode = #tpu.pipeline_mode<synchronous>, transform_indices = @transform_13, window_bounds = array<i64: 1, 256>}, {pipeline_mode = #tpu.pipeline_mode<synchronous>, transform_indices = @transform_14, window_bounds = array<i64: 128, 128>}, {pipeline_mode = #tpu.pipeline_mode<synchronous>, transform_indices = @transform_15, window_bounds = array<i64: 1, 128>}, {pipeline_mode = #tpu.pipeline_mode<synchronous>, transform_indices = @transform_16, window_bounds = array<i64: 1, 128>}, {pipeline_mode = #tpu.pipeline_mode<synchronous>, transform_indices = @transform_17, window_bounds = array<i64: 1, 128>}, {pipeline_mode = #tpu.pipeline_mode<synchronous>, transform_indices = @transform_18, window_bounds = array<i64: 128, 256>}, {pipeline_mode = #tpu.pipeline_mode<synchronous>, transform_indices = @transform_19, window_bounds = array<i64: 1, 256>}, {pipeline_mode = #tpu.pipeline_mode<synchronous>, transform_indices = @transform_20, window_bounds = array<i64: 256, 128>}, {pipeline_mode = #tpu.pipeline_mode<synchronous>, transform_indices = @transform_21, window_bounds = array<i64: 1, 128>}, {pipeline_mode = #tpu.pipeline_mode<synchronous>, transform_indices = @transform_22, window_bounds = array<i64: 1, 128>}, {pipeline_mode = #tpu.pipeline_mode<synchronous>, transform_indices = @transform_23, window_bounds = array<i64: 1, 128>}, {pipeline_mode = #tpu.pipeline_mode<synchronous>, transform_indices = @transform_24, window_bounds = array<i64: 16, 128>}]} {
    %c0 = arith.constant 0 : index
    %c0_0 = arith.constant 0 : index
    %0 = vector.load %arg1[%c0, %c0_0] : memref<16x128xbf16, #tpu.memory_space<vmem>>, vector<16x128xbf16>
    %c0_1 = arith.constant 0 : index
    %c0_2 = arith.constant 0 : index
    %1 = vector.load %arg2[%c0_1, %c0_2] : memref<32x128xbf16, #tpu.memory_space<vmem>>, vector<32x128xbf16>
    %c0_3 = arith.constant 0 : index
    %c0_4 = arith.constant 0 : index
    %2 = vector.load %arg5[%c0_3, %c0_4] : memref<128x384xbf16, #tpu.memory_space<vmem>>, vector<128x384xbf16>
    %cst = arith.constant dense<0.000000e+00> : vector<16x384xf32>
    %3 = tpu.matmul %0, %2, %cst {dimension_numbers = #tpu.dot_dimension_numbers<[1], [0], [0], [1], [0, 0, 1, 1], [], []>} : vector<16x128xbf16>, vector<128x384xbf16>, vector<16x384xf32> -> vector<16x384xf32>
    %c0_5 = arith.constant 0 : index
    %c0_6 = arith.constant 0 : index
    %4 = vector.load %arg6[%c0_5, %c0_6] : memref<1x384xf32, #tpu.memory_space<vmem>>, vector<1x384xf32>
    %5 = vector.shape_cast %4 : vector<1x384xf32> to vector<384xf32>
    %6 = vector.shape_cast %5 : vector<384xf32> to vector<1x384xf32>
    %7 = vector.broadcast %6 : vector<1x384xf32> to vector<16x384xf32>
    %8 = arith.addf %3, %7 : vector<16x384xf32>
    %9 = arith.truncf %8 : vector<16x384xf32> to vector<16x384xbf16>
    %10 = vector.extract_strided_slice %9 {offsets = [0, 0], sizes = [16, 128], strides = [1, 1]} : vector<16x384xbf16> to vector<16x128xbf16>
    %11 = vector.extract_strided_slice %9 {offsets = [0, 128], sizes = [16, 128], strides = [1, 1]} : vector<16x384xbf16> to vector<16x128xbf16>
    %12 = vector.extract_strided_slice %9 {offsets = [0, 256], sizes = [16, 128], strides = [1, 1]} : vector<16x384xbf16> to vector<16x128xbf16>
    %13 = vector.extract_strided_slice %10 {offsets = [0, 0], sizes = [8, 128], strides = [1, 1]} : vector<16x128xbf16> to vector<8x128xbf16>
    %14 = vector.shape_cast %13 : vector<8x128xbf16> to vector<8x4x32xbf16>
    %15 = tpu.transpose %14, [1, 0, 2] : vector<8x4x32xbf16> -> vector<4x8x32xbf16>
    %16 = vector.extract_strided_slice %11 {offsets = [0, 0], sizes = [8, 128], strides = [1, 1]} : vector<16x128xbf16> to vector<8x128xbf16>
    %17 = vector.shape_cast %16 : vector<8x128xbf16> to vector<8x4x32xbf16>
    %18 = tpu.transpose %17, [1, 0, 2] : vector<8x4x32xbf16> -> vector<4x8x32xbf16>
    %19 = vector.extract_strided_slice %12 {offsets = [0, 0], sizes = [8, 128], strides = [1, 1]} : vector<16x128xbf16> to vector<8x128xbf16>
    %20 = vector.shape_cast %19 : vector<8x128xbf16> to vector<8x4x32xbf16>
    %21 = tpu.transpose %20, [1, 0, 2] : vector<8x4x32xbf16> -> vector<4x8x32xbf16>
    "tpu.trace_start"() <{level = 10 : i32, message = "hqd,hkd->hqk"}> : () -> ()
    %cst_7 = arith.constant dense<0.000000e+00> : vector<4x8x8xf32>
    %22 = tpu.matmul %15, %18, %cst_7 {dimension_numbers = #tpu.dot_dimension_numbers<[2], [2], [1], [1], [0, 0, 0, 1, 1, 1], [0], [0]>} : vector<4x8x32xbf16>, vector<4x8x32xbf16>, vector<4x8x8xf32> -> vector<4x8x8xf32>
    "tpu.trace_stop"() : () -> ()
    %cst_8 = arith.constant 0.176776692 : f32
    %23 = vector.broadcast %cst_8 : f32 to vector<4x8x8xf32>
    %24 = arith.mulf %22, %23 : vector<4x8x8xf32>
    %c0_9 = arith.constant 0 : index
    %c0_10 = arith.constant 0 : index
    %c0_11 = arith.constant 0 : index
    %25 = vector.load %arg3[%c0_9, %c0_10, %c0_11] : memref<2x8x8xf32, #tpu.memory_space<vmem>>, vector<1x8x8xf32>
    %26 = vector.shape_cast %25 : vector<1x8x8xf32> to vector<8x8xf32>
    %27 = vector.shape_cast %26 : vector<8x8xf32> to vector<1x8x8xf32>
    %28 = vector.broadcast %27 : vector<1x8x8xf32> to vector<4x8x8xf32>
    %29 = arith.addf %24, %28 : vector<4x8x8xf32>
    %cst_12 = arith.constant dense<0xFF800000> : vector<4x8xf32>
    %30 = vector.multi_reduction <maximumf>, %29, %cst_12 [2] : vector<4x8x8xf32> to vector<4x8xf32>
    %31 = vector.shape_cast %30 : vector<4x8xf32> to vector<4x8x1xf32>
    %32 = vector.broadcast %31 : vector<4x8x1xf32> to vector<4x8x8xf32>
    %33 = arith.subf %29, %32 : vector<4x8x8xf32>
    %34 = math.exp %33 : vector<4x8x8xf32>
    %cst_13 = arith.constant dense<0.000000e+00> : vector<4x8xf32>
    %35 = vector.multi_reduction <add>, %34, %cst_13 [2] : vector<4x8x8xf32> to vector<4x8xf32>
    %36 = vector.shape_cast %35 : vector<4x8xf32> to vector<4x8x1xf32>
    %37 = tpu.reciprocal %36 {approx = true} : vector<4x8x1xf32> -> vector<4x8x1xf32>
    %38 = vector.broadcast %37 : vector<4x8x1xf32> to vector<4x8x8xf32>
    %39 = arith.mulf %34, %38 : vector<4x8x8xf32>
    %40 = arith.truncf %39 : vector<4x8x8xf32> to vector<4x8x8xbf16>
    "tpu.trace_start"() <{level = 10 : i32, message = "hqk,hkd->hqd"}> : () -> ()
    %cst_14 = arith.constant dense<0.000000e+00> : vector<4x8x32xf32>
    %41 = tpu.matmul %40, %21, %cst_14 {dimension_numbers = #tpu.dot_dimension_numbers<[2], [1], [1], [2], [0, 0, 0, 1, 1, 2], [0], [0]>} : vector<4x8x8xbf16>, vector<4x8x32xbf16>, vector<4x8x32xf32> -> vector<4x8x32xf32>
    "tpu.trace_stop"() : () -> ()
    %42 = tpu.transpose %41, [1, 0, 2] : vector<4x8x32xf32> -> vector<8x4x32xf32>
    %43 = vector.shape_cast %42 : vector<8x4x32xf32> to vector<8x128xf32>
    %44 = vector.extract_strided_slice %10 {offsets = [8, 0], sizes = [8, 128], strides = [1, 1]} : vector<16x128xbf16> to vector<8x128xbf16>
    %45 = vector.shape_cast %44 : vector<8x128xbf16> to vector<8x4x32xbf16>
    %46 = tpu.transpose %45, [1, 0, 2] : vector<8x4x32xbf16> -> vector<4x8x32xbf16>
    %47 = vector.extract_strided_slice %11 {offsets = [8, 0], sizes = [8, 128], strides = [1, 1]} : vector<16x128xbf16> to vector<8x128xbf16>
    %48 = vector.shape_cast %47 : vector<8x128xbf16> to vector<8x4x32xbf16>
    %49 = tpu.transpose %48, [1, 0, 2] : vector<8x4x32xbf16> -> vector<4x8x32xbf16>
    %50 = vector.extract_strided_slice %12 {offsets = [8, 0], sizes = [8, 128], strides = [1, 1]} : vector<16x128xbf16> to vector<8x128xbf16>
    %51 = vector.shape_cast %50 : vector<8x128xbf16> to vector<8x4x32xbf16>
    %52 = tpu.transpose %51, [1, 0, 2] : vector<8x4x32xbf16> -> vector<4x8x32xbf16>
    "tpu.trace_start"() <{level = 10 : i32, message = "hqd,hkd->hqk"}> : () -> ()
    %cst_15 = arith.constant dense<0.000000e+00> : vector<4x8x8xf32>
    %53 = tpu.matmul %46, %49, %cst_15 {dimension_numbers = #tpu.dot_dimension_numbers<[2], [2], [1], [1], [0, 0, 0, 1, 1, 1], [0], [0]>} : vector<4x8x32xbf16>, vector<4x8x32xbf16>, vector<4x8x8xf32> -> vector<4x8x8xf32>
    "tpu.trace_stop"() : () -> ()
    %cst_16 = arith.constant 0.176776692 : f32
    %54 = vector.broadcast %cst_16 : f32 to vector<4x8x8xf32>
    %55 = arith.mulf %53, %54 : vector<4x8x8xf32>
    %c1 = arith.constant 1 : index
    %c0_17 = arith.constant 0 : index
    %c0_18 = arith.constant 0 : index
    %56 = vector.load %arg3[%c1, %c0_17, %c0_18] : memref<2x8x8xf32, #tpu.memory_space<vmem>>, vector<1x8x8xf32>
    %57 = vector.shape_cast %56 : vector<1x8x8xf32> to vector<8x8xf32>
    %58 = vector.shape_cast %57 : vector<8x8xf32> to vector<1x8x8xf32>
    %59 = vector.broadcast %58 : vector<1x8x8xf32> to vector<4x8x8xf32>
    %60 = arith.addf %55, %59 : vector<4x8x8xf32>
    %cst_19 = arith.constant dense<0xFF800000> : vector<4x8xf32>
    %61 = vector.multi_reduction <maximumf>, %60, %cst_19 [2] : vector<4x8x8xf32> to vector<4x8xf32>
    %62 = vector.shape_cast %61 : vector<4x8xf32> to vector<4x8x1xf32>
    %63 = vector.broadcast %62 : vector<4x8x1xf32> to vector<4x8x8xf32>
    %64 = arith.subf %60, %63 : vector<4x8x8xf32>
    %65 = math.exp %64 : vector<4x8x8xf32>
    %cst_20 = arith.constant dense<0.000000e+00> : vector<4x8xf32>
    %66 = vector.multi_reduction <add>, %65, %cst_20 [2] : vector<4x8x8xf32> to vector<4x8xf32>
    %67 = vector.shape_cast %66 : vector<4x8xf32> to vector<4x8x1xf32>
    %68 = tpu.reciprocal %67 {approx = true} : vector<4x8x1xf32> -> vector<4x8x1xf32>
    %69 = vector.broadcast %68 : vector<4x8x1xf32> to vector<4x8x8xf32>
    %70 = arith.mulf %65, %69 : vector<4x8x8xf32>
    %71 = arith.truncf %70 : vector<4x8x8xf32> to vector<4x8x8xbf16>
    "tpu.trace_start"() <{level = 10 : i32, message = "hqk,hkd->hqd"}> : () -> ()
    %cst_21 = arith.constant dense<0.000000e+00> : vector<4x8x32xf32>
    %72 = tpu.matmul %71, %52, %cst_21 {dimension_numbers = #tpu.dot_dimension_numbers<[2], [1], [1], [2], [0, 0, 0, 1, 1, 2], [0], [0]>} : vector<4x8x8xbf16>, vector<4x8x32xbf16>, vector<4x8x32xf32> -> vector<4x8x32xf32>
    "tpu.trace_stop"() : () -> ()
    %73 = tpu.transpose %72, [1, 0, 2] : vector<4x8x32xf32> -> vector<8x4x32xf32>
    %74 = vector.shape_cast %73 : vector<8x4x32xf32> to vector<8x128xf32>
    %75 = tpu.concatenate %43, %74 in 0 : vector<8x128xf32>, vector<8x128xf32> -> vector<16x128xf32>
    %76 = arith.truncf %75 : vector<16x128xf32> to vector<16x128xbf16>
    %c0_22 = arith.constant 0 : index
    %c0_23 = arith.constant 0 : index
    %77 = vector.load %arg7[%c0_22, %c0_23] : memref<128x128xbf16, #tpu.memory_space<vmem>>, vector<128x128xbf16>
    %cst_24 = arith.constant dense<0.000000e+00> : vector<16x128xf32>
    %78 = tpu.matmul %76, %77, %cst_24 {dimension_numbers = #tpu.dot_dimension_numbers<[1], [0], [0], [1], [0, 0, 1, 1], [], []>} : vector<16x128xbf16>, vector<128x128xbf16>, vector<16x128xf32> -> vector<16x128xf32>
    %c0_25 = arith.constant 0 : index
    %c0_26 = arith.constant 0 : index
    %79 = vector.load %arg8[%c0_25, %c0_26] : memref<1x128xf32, #tpu.memory_space<vmem>>, vector<1x128xf32>
    %80 = vector.shape_cast %79 : vector<1x128xf32> to vector<128xf32>
    %81 = vector.shape_cast %80 : vector<128xf32> to vector<1x128xf32>
    %82 = vector.broadcast %81 : vector<1x128xf32> to vector<16x128xf32>
    %83 = arith.addf %78, %82 : vector<16x128xf32>
    %84 = arith.extf %0 : vector<16x128xbf16> to vector<16x128xf32>
    %85 = arith.addf %84, %83 : vector<16x128xf32>
    %cst_27 = arith.constant dense<0.000000e+00> : vector<16xf32>
    %86 = vector.multi_reduction <add>, %85, %cst_27 [1] : vector<16x128xf32> to vector<16xf32>
    %87 = vector.shape_cast %86 : vector<16xf32> to vector<16x1xf32>
    %cst_28 = arith.constant 1.280000e+02 : f32
    %88 = vector.broadcast %cst_28 : f32 to vector<16x1xf32>
    %89 = arith.divf %87, %88 : vector<16x1xf32>
    %90 = vector.broadcast %89 : vector<16x1xf32> to vector<16x128xf32>
    %91 = arith.subf %85, %90 : vector<16x128xf32>
    %92 = arith.mulf %91, %91 : vector<16x128xf32>
    %cst_29 = arith.constant dense<0.000000e+00> : vector<16xf32>
    %93 = vector.multi_reduction <add>, %92, %cst_29 [1] : vector<16x128xf32> to vector<16xf32>
    %94 = vector.shape_cast %93 : vector<16xf32> to vector<16x1xf32>
    %cst_30 = arith.constant 1.280000e+02 : f32
    %95 = vector.broadcast %cst_30 : f32 to vector<16x1xf32>
    %96 = arith.divf %94, %95 : vector<16x1xf32>
    %c0_31 = arith.constant 0 : index
    %c0_32 = arith.constant 0 : index
    %97 = vector.load %arg9[%c0_31, %c0_32] : memref<1x128xf32, #tpu.memory_space<vmem>>, vector<1x128xf32>
    %98 = vector.shape_cast %97 : vector<1x128xf32> to vector<128xf32>
    %99 = vector.broadcast %89 : vector<16x1xf32> to vector<16x128xf32>
    %100 = arith.subf %85, %99 : vector<16x128xf32>
    %cst_33 = arith.constant 9.99999996E-13 : f32
    %101 = vector.broadcast %cst_33 : f32 to vector<16x1xf32>
    %102 = arith.addf %96, %101 : vector<16x1xf32>
    %103 = math.rsqrt %102 : vector<16x1xf32>
    %104 = vector.broadcast %103 : vector<16x1xf32> to vector<16x128xf32>
    %105 = arith.mulf %100, %104 : vector<16x128xf32>
    %106 = vector.shape_cast %98 : vector<128xf32> to vector<1x128xf32>
    %107 = vector.broadcast %106 : vector<1x128xf32> to vector<16x128xf32>
    %108 = arith.mulf %107, %105 : vector<16x128xf32>
    %c0_34 = arith.constant 0 : index
    %c0_35 = arith.constant 0 : index
    %109 = vector.load %arg10[%c0_34, %c0_35] : memref<1x128xf32, #tpu.memory_space<vmem>>, vector<1x128xf32>
    %110 = vector.shape_cast %109 : vector<1x128xf32> to vector<128xf32>
    %111 = vector.shape_cast %110 : vector<128xf32> to vector<1x128xf32>
    %112 = vector.broadcast %111 : vector<1x128xf32> to vector<16x128xf32>
    %113 = arith.addf %108, %112 : vector<16x128xf32>
    %114 = arith.truncf %113 : vector<16x128xf32> to vector<16x128xbf16>
    %c0_36 = arith.constant 0 : index
    %c0_37 = arith.constant 0 : index
    %115 = vector.load %arg11[%c0_36, %c0_37] : memref<128x128xbf16, #tpu.memory_space<vmem>>, vector<128x128xbf16>
    %cst_38 = arith.constant dense<0.000000e+00> : vector<16x128xf32>
    %116 = tpu.matmul %114, %115, %cst_38 {dimension_numbers = #tpu.dot_dimension_numbers<[1], [0], [0], [1], [0, 0, 1, 1], [], []>} : vector<16x128xbf16>, vector<128x128xbf16>, vector<16x128xf32> -> vector<16x128xf32>
    %c0_39 = arith.constant 0 : index
    %c0_40 = arith.constant 0 : index
    %117 = vector.load %arg12[%c0_39, %c0_40] : memref<1x128xf32, #tpu.memory_space<vmem>>, vector<1x128xf32>
    %118 = vector.shape_cast %117 : vector<1x128xf32> to vector<128xf32>
    %119 = vector.shape_cast %118 : vector<128xf32> to vector<1x128xf32>
    %120 = vector.broadcast %119 : vector<1x128xf32> to vector<16x128xf32>
    %121 = arith.addf %116, %120 : vector<16x128xf32>
    %122 = arith.truncf %121 : vector<16x128xf32> to vector<16x128xbf16>
    %c0_41 = arith.constant 0 : index
    %c0_42 = arith.constant 0 : index
    %123 = vector.load %arg13[%c0_41, %c0_42] : memref<128x256xbf16, #tpu.memory_space<vmem>>, vector<128x256xbf16>
    %cst_43 = arith.constant dense<0.000000e+00> : vector<32x256xf32>
    %124 = tpu.matmul %1, %123, %cst_43 {dimension_numbers = #tpu.dot_dimension_numbers<[1], [0], [0], [1], [0, 0, 1, 1], [], []>} : vector<32x128xbf16>, vector<128x256xbf16>, vector<32x256xf32> -> vector<32x256xf32>
    %c0_44 = arith.constant 0 : index
    %c0_45 = arith.constant 0 : index
    %125 = vector.load %arg14[%c0_44, %c0_45] : memref<1x256xf32, #tpu.memory_space<vmem>>, vector<1x256xf32>
    %126 = vector.shape_cast %125 : vector<1x256xf32> to vector<256xf32>
    %127 = vector.shape_cast %126 : vector<256xf32> to vector<1x256xf32>
    %128 = vector.broadcast %127 : vector<1x256xf32> to vector<32x256xf32>
    %129 = arith.addf %124, %128 : vector<32x256xf32>
    %130 = arith.truncf %129 : vector<32x256xf32> to vector<32x256xbf16>
    %131 = vector.extract_strided_slice %130 {offsets = [0, 0], sizes = [32, 128], strides = [1, 1]} : vector<32x256xbf16> to vector<32x128xbf16>
    %132 = vector.extract_strided_slice %130 {offsets = [0, 128], sizes = [32, 128], strides = [1, 1]} : vector<32x256xbf16> to vector<32x128xbf16>
    %133 = vector.extract_strided_slice %122 {offsets = [0, 0], sizes = [8, 128], strides = [1, 1]} : vector<16x128xbf16> to vector<8x128xbf16>
    %134 = vector.shape_cast %133 : vector<8x128xbf16> to vector<8x4x32xbf16>
    %135 = tpu.transpose %134, [1, 0, 2] : vector<8x4x32xbf16> -> vector<4x8x32xbf16>
    %136 = vector.extract_strided_slice %131 {offsets = [0, 0], sizes = [16, 128], strides = [1, 1]} : vector<32x128xbf16> to vector<16x128xbf16>
    %137 = vector.shape_cast %136 : vector<16x128xbf16> to vector<16x4x32xbf16>
    %138 = tpu.transpose %137, [1, 0, 2] : vector<16x4x32xbf16> -> vector<4x16x32xbf16>
    %139 = vector.extract_strided_slice %132 {offsets = [0, 0], sizes = [16, 128], strides = [1, 1]} : vector<32x128xbf16> to vector<16x128xbf16>
    %140 = vector.shape_cast %139 : vector<16x128xbf16> to vector<16x4x32xbf16>
    %141 = tpu.transpose %140, [1, 0, 2] : vector<16x4x32xbf16> -> vector<4x16x32xbf16>
    "tpu.trace_start"() <{level = 10 : i32, message = "hqd,hkd->hqk"}> : () -> ()
    %cst_46 = arith.constant dense<0.000000e+00> : vector<4x8x16xf32>
    %142 = tpu.matmul %135, %138, %cst_46 {dimension_numbers = #tpu.dot_dimension_numbers<[2], [2], [1], [1], [0, 0, 0, 1, 1, 1], [0], [0]>} : vector<4x8x32xbf16>, vector<4x16x32xbf16>, vector<4x8x16xf32> -> vector<4x8x16xf32>
    "tpu.trace_stop"() : () -> ()
    %cst_47 = arith.constant 0.176776692 : f32
    %143 = vector.broadcast %cst_47 : f32 to vector<4x8x16xf32>
    %144 = arith.mulf %142, %143 : vector<4x8x16xf32>
    %c0_48 = arith.constant 0 : index
    %c0_49 = arith.constant 0 : index
    %c0_50 = arith.constant 0 : index
    %145 = vector.load %arg4[%c0_48, %c0_49, %c0_50] : memref<2x8x16xf32, #tpu.memory_space<vmem>>, vector<1x8x16xf32>
    %146 = vector.shape_cast %145 : vector<1x8x16xf32> to vector<8x16xf32>
    %147 = vector.shape_cast %146 : vector<8x16xf32> to vector<1x8x16xf32>
    %148 = vector.broadcast %147 : vector<1x8x16xf32> to vector<4x8x16xf32>
    %149 = arith.addf %144, %148 : vector<4x8x16xf32>
    %cst_51 = arith.constant dense<0xFF800000> : vector<4x8xf32>
    %150 = vector.multi_reduction <maximumf>, %149, %cst_51 [2] : vector<4x8x16xf32> to vector<4x8xf32>
    %151 = vector.shape_cast %150 : vector<4x8xf32> to vector<4x8x1xf32>
    %152 = vector.broadcast %151 : vector<4x8x1xf32> to vector<4x8x16xf32>
    %153 = arith.subf %149, %152 : vector<4x8x16xf32>
    %154 = math.exp %153 : vector<4x8x16xf32>
    %cst_52 = arith.constant dense<0.000000e+00> : vector<4x8xf32>
    %155 = vector.multi_reduction <add>, %154, %cst_52 [2] : vector<4x8x16xf32> to vector<4x8xf32>
    %156 = vector.shape_cast %155 : vector<4x8xf32> to vector<4x8x1xf32>
    %157 = tpu.reciprocal %156 {approx = true} : vector<4x8x1xf32> -> vector<4x8x1xf32>
    %158 = vector.broadcast %157 : vector<4x8x1xf32> to vector<4x8x16xf32>
    %159 = arith.mulf %154, %158 : vector<4x8x16xf32>
    %160 = arith.truncf %159 : vector<4x8x16xf32> to vector<4x8x16xbf16>
    "tpu.trace_start"() <{level = 10 : i32, message = "hqk,hkd->hqd"}> : () -> ()
    %cst_53 = arith.constant dense<0.000000e+00> : vector<4x8x32xf32>
    %161 = tpu.matmul %160, %141, %cst_53 {dimension_numbers = #tpu.dot_dimension_numbers<[2], [1], [1], [2], [0, 0, 0, 1, 1, 2], [0], [0]>} : vector<4x8x16xbf16>, vector<4x16x32xbf16>, vector<4x8x32xf32> -> vector<4x8x32xf32>
    "tpu.trace_stop"() : () -> ()
    %162 = tpu.transpose %161, [1, 0, 2] : vector<4x8x32xf32> -> vector<8x4x32xf32>
    %163 = vector.shape_cast %162 : vector<8x4x32xf32> to vector<8x128xf32>
    %164 = vector.extract_strided_slice %122 {offsets = [8, 0], sizes = [8, 128], strides = [1, 1]} : vector<16x128xbf16> to vector<8x128xbf16>
    %165 = vector.shape_cast %164 : vector<8x128xbf16> to vector<8x4x32xbf16>
    %166 = tpu.transpose %165, [1, 0, 2] : vector<8x4x32xbf16> -> vector<4x8x32xbf16>
    %167 = vector.extract_strided_slice %131 {offsets = [16, 0], sizes = [16, 128], strides = [1, 1]} : vector<32x128xbf16> to vector<16x128xbf16>
    %168 = vector.shape_cast %167 : vector<16x128xbf16> to vector<16x4x32xbf16>
    %169 = tpu.transpose %168, [1, 0, 2] : vector<16x4x32xbf16> -> vector<4x16x32xbf16>
    %170 = vector.extract_strided_slice %132 {offsets = [16, 0], sizes = [16, 128], strides = [1, 1]} : vector<32x128xbf16> to vector<16x128xbf16>
    %171 = vector.shape_cast %170 : vector<16x128xbf16> to vector<16x4x32xbf16>
    %172 = tpu.transpose %171, [1, 0, 2] : vector<16x4x32xbf16> -> vector<4x16x32xbf16>
    "tpu.trace_start"() <{level = 10 : i32, message = "hqd,hkd->hqk"}> : () -> ()
    %cst_54 = arith.constant dense<0.000000e+00> : vector<4x8x16xf32>
    %173 = tpu.matmul %166, %169, %cst_54 {dimension_numbers = #tpu.dot_dimension_numbers<[2], [2], [1], [1], [0, 0, 0, 1, 1, 1], [0], [0]>} : vector<4x8x32xbf16>, vector<4x16x32xbf16>, vector<4x8x16xf32> -> vector<4x8x16xf32>
    "tpu.trace_stop"() : () -> ()
    %cst_55 = arith.constant 0.176776692 : f32
    %174 = vector.broadcast %cst_55 : f32 to vector<4x8x16xf32>
    %175 = arith.mulf %173, %174 : vector<4x8x16xf32>
    %c1_56 = arith.constant 1 : index
    %c0_57 = arith.constant 0 : index
    %c0_58 = arith.constant 0 : index
    %176 = vector.load %arg4[%c1_56, %c0_57, %c0_58] : memref<2x8x16xf32, #tpu.memory_space<vmem>>, vector<1x8x16xf32>
    %177 = vector.shape_cast %176 : vector<1x8x16xf32> to vector<8x16xf32>
    %178 = vector.shape_cast %177 : vector<8x16xf32> to vector<1x8x16xf32>
    %179 = vector.broadcast %178 : vector<1x8x16xf32> to vector<4x8x16xf32>
    %180 = arith.addf %175, %179 : vector<4x8x16xf32>
    %cst_59 = arith.constant dense<0xFF800000> : vector<4x8xf32>
    %181 = vector.multi_reduction <maximumf>, %180, %cst_59 [2] : vector<4x8x16xf32> to vector<4x8xf32>
    %182 = vector.shape_cast %181 : vector<4x8xf32> to vector<4x8x1xf32>
    %183 = vector.broadcast %182 : vector<4x8x1xf32> to vector<4x8x16xf32>
    %184 = arith.subf %180, %183 : vector<4x8x16xf32>
    %185 = math.exp %184 : vector<4x8x16xf32>
    %cst_60 = arith.constant dense<0.000000e+00> : vector<4x8xf32>
    %186 = vector.multi_reduction <add>, %185, %cst_60 [2] : vector<4x8x16xf32> to vector<4x8xf32>
    %187 = vector.shape_cast %186 : vector<4x8xf32> to vector<4x8x1xf32>
    %188 = tpu.reciprocal %187 {approx = true} : vector<4x8x1xf32> -> vector<4x8x1xf32>
    %189 = vector.broadcast %188 : vector<4x8x1xf32> to vector<4x8x16xf32>
    %190 = arith.mulf %185, %189 : vector<4x8x16xf32>
    %191 = arith.truncf %190 : vector<4x8x16xf32> to vector<4x8x16xbf16>
    "tpu.trace_start"() <{level = 10 : i32, message = "hqk,hkd->hqd"}> : () -> ()
    %cst_61 = arith.constant dense<0.000000e+00> : vector<4x8x32xf32>
    %192 = tpu.matmul %191, %172, %cst_61 {dimension_numbers = #tpu.dot_dimension_numbers<[2], [1], [1], [2], [0, 0, 0, 1, 1, 2], [0], [0]>} : vector<4x8x16xbf16>, vector<4x16x32xbf16>, vector<4x8x32xf32> -> vector<4x8x32xf32>
    "tpu.trace_stop"() : () -> ()
    %193 = tpu.transpose %192, [1, 0, 2] : vector<4x8x32xf32> -> vector<8x4x32xf32>
    %194 = vector.shape_cast %193 : vector<8x4x32xf32> to vector<8x128xf32>
    %195 = tpu.concatenate %163, %194 in 0 : vector<8x128xf32>, vector<8x128xf32> -> vector<16x128xf32>
    %196 = arith.truncf %195 : vector<16x128xf32> to vector<16x128xbf16>
    %c0_62 = arith.constant 0 : index
    %c0_63 = arith.constant 0 : index
    %197 = vector.load %arg15[%c0_62, %c0_63] : memref<128x128xbf16, #tpu.memory_space<vmem>>, vector<128x128xbf16>
    %cst_64 = arith.constant dense<0.000000e+00> : vector<16x128xf32>
    %198 = tpu.matmul %196, %197, %cst_64 {dimension_numbers = #tpu.dot_dimension_numbers<[1], [0], [0], [1], [0, 0, 1, 1], [], []>} : vector<16x128xbf16>, vector<128x128xbf16>, vector<16x128xf32> -> vector<16x128xf32>
    %c0_65 = arith.constant 0 : index
    %c0_66 = arith.constant 0 : index
    %199 = vector.load %arg16[%c0_65, %c0_66] : memref<1x128xf32, #tpu.memory_space<vmem>>, vector<1x128xf32>
    %200 = vector.shape_cast %199 : vector<1x128xf32> to vector<128xf32>
    %201 = vector.shape_cast %200 : vector<128xf32> to vector<1x128xf32>
    %202 = vector.broadcast %201 : vector<1x128xf32> to vector<16x128xf32>
    %203 = arith.addf %198, %202 : vector<16x128xf32>
    %204 = arith.addf %113, %203 : vector<16x128xf32>
    %cst_67 = arith.constant dense<0.000000e+00> : vector<16xf32>
    %205 = vector.multi_reduction <add>, %204, %cst_67 [1] : vector<16x128xf32> to vector<16xf32>
    %206 = vector.shape_cast %205 : vector<16xf32> to vector<16x1xf32>
    %cst_68 = arith.constant 1.280000e+02 : f32
    %207 = vector.broadcast %cst_68 : f32 to vector<16x1xf32>
    %208 = arith.divf %206, %207 : vector<16x1xf32>
    %209 = vector.broadcast %208 : vector<16x1xf32> to vector<16x128xf32>
    %210 = arith.subf %204, %209 : vector<16x128xf32>
    %211 = arith.mulf %210, %210 : vector<16x128xf32>
    %cst_69 = arith.constant dense<0.000000e+00> : vector<16xf32>
    %212 = vector.multi_reduction <add>, %211, %cst_69 [1] : vector<16x128xf32> to vector<16xf32>
    %213 = vector.shape_cast %212 : vector<16xf32> to vector<16x1xf32>
    %cst_70 = arith.constant 1.280000e+02 : f32
    %214 = vector.broadcast %cst_70 : f32 to vector<16x1xf32>
    %215 = arith.divf %213, %214 : vector<16x1xf32>
    %c0_71 = arith.constant 0 : index
    %c0_72 = arith.constant 0 : index
    %216 = vector.load %arg17[%c0_71, %c0_72] : memref<1x128xf32, #tpu.memory_space<vmem>>, vector<1x128xf32>
    %217 = vector.shape_cast %216 : vector<1x128xf32> to vector<128xf32>
    %218 = vector.broadcast %208 : vector<16x1xf32> to vector<16x128xf32>
    %219 = arith.subf %204, %218 : vector<16x128xf32>
    %cst_73 = arith.constant 9.99999996E-13 : f32
    %220 = vector.broadcast %cst_73 : f32 to vector<16x1xf32>
    %221 = arith.addf %215, %220 : vector<16x1xf32>
    %222 = math.rsqrt %221 : vector<16x1xf32>
    %223 = vector.broadcast %222 : vector<16x1xf32> to vector<16x128xf32>
    %224 = arith.mulf %219, %223 : vector<16x128xf32>
    %225 = vector.shape_cast %217 : vector<128xf32> to vector<1x128xf32>
    %226 = vector.broadcast %225 : vector<1x128xf32> to vector<16x128xf32>
    %227 = arith.mulf %226, %224 : vector<16x128xf32>
    %c0_74 = arith.constant 0 : index
    %c0_75 = arith.constant 0 : index
    %228 = vector.load %arg18[%c0_74, %c0_75] : memref<1x128xf32, #tpu.memory_space<vmem>>, vector<1x128xf32>
    %229 = vector.shape_cast %228 : vector<1x128xf32> to vector<128xf32>
    %230 = vector.shape_cast %229 : vector<128xf32> to vector<1x128xf32>
    %231 = vector.broadcast %230 : vector<1x128xf32> to vector<16x128xf32>
    %232 = arith.addf %227, %231 : vector<16x128xf32>
    %233 = arith.truncf %232 : vector<16x128xf32> to vector<16x128xbf16>
    %c0_76 = arith.constant 0 : index
    %c0_77 = arith.constant 0 : index
    %234 = vector.load %arg19[%c0_76, %c0_77] : memref<128x256xbf16, #tpu.memory_space<vmem>>, vector<128x256xbf16>
    %cst_78 = arith.constant dense<0.000000e+00> : vector<16x256xf32>
    %235 = tpu.matmul %233, %234, %cst_78 {dimension_numbers = #tpu.dot_dimension_numbers<[1], [0], [0], [1], [0, 0, 1, 1], [], []>} : vector<16x128xbf16>, vector<128x256xbf16>, vector<16x256xf32> -> vector<16x256xf32>
    %c0_79 = arith.constant 0 : index
    %c0_80 = arith.constant 0 : index
    %236 = vector.load %arg20[%c0_79, %c0_80] : memref<1x256xf32, #tpu.memory_space<vmem>>, vector<1x256xf32>
    %237 = vector.shape_cast %236 : vector<1x256xf32> to vector<256xf32>
    %238 = vector.shape_cast %237 : vector<256xf32> to vector<1x256xf32>
    %239 = vector.broadcast %238 : vector<1x256xf32> to vector<16x256xf32>
    %240 = arith.addf %235, %239 : vector<16x256xf32>
    %241 = arith.truncf %240 : vector<16x256xf32> to vector<16x256xbf16>
    %cst_81 = arith.constant 0.000000e+00 : bf16
    %242 = vector.broadcast %cst_81 : bf16 to vector<16x256xbf16>
    %243 = arith.maximumf %241, %242 : vector<16x256xbf16>
    %c0_82 = arith.constant 0 : index
    %c0_83 = arith.constant 0 : index
    %244 = vector.load %arg21[%c0_82, %c0_83] : memref<256x128xbf16, #tpu.memory_space<vmem>>, vector<256x128xbf16>
    %cst_84 = arith.constant dense<0.000000e+00> : vector<16x128xf32>
    %245 = tpu.matmul %243, %244, %cst_84 {dimension_numbers = #tpu.dot_dimension_numbers<[1], [0], [0], [1], [0, 0, 1, 1], [], []>} : vector<16x256xbf16>, vector<256x128xbf16>, vector<16x128xf32> -> vector<16x128xf32>
    %c0_85 = arith.constant 0 : index
    %c0_86 = arith.constant 0 : index
    %246 = vector.load %arg22[%c0_85, %c0_86] : memref<1x128xf32, #tpu.memory_space<vmem>>, vector<1x128xf32>
    %247 = vector.shape_cast %246 : vector<1x128xf32> to vector<128xf32>
    %248 = vector.shape_cast %247 : vector<128xf32> to vector<1x128xf32>
    %249 = vector.broadcast %248 : vector<1x128xf32> to vector<16x128xf32>
    %250 = arith.addf %245, %249 : vector<16x128xf32>
    %251 = arith.addf %232, %250 : vector<16x128xf32>
    %cst_87 = arith.constant dense<0.000000e+00> : vector<16xf32>
    %252 = vector.multi_reduction <add>, %251, %cst_87 [1] : vector<16x128xf32> to vector<16xf32>
    %253 = vector.shape_cast %252 : vector<16xf32> to vector<16x1xf32>
    %cst_88 = arith.constant 1.280000e+02 : f32
    %254 = vector.broadcast %cst_88 : f32 to vector<16x1xf32>
    %255 = arith.divf %253, %254 : vector<16x1xf32>
    %256 = vector.broadcast %255 : vector<16x1xf32> to vector<16x128xf32>
    %257 = arith.subf %251, %256 : vector<16x128xf32>
    %258 = arith.mulf %257, %257 : vector<16x128xf32>
    %cst_89 = arith.constant dense<0.000000e+00> : vector<16xf32>
    %259 = vector.multi_reduction <add>, %258, %cst_89 [1] : vector<16x128xf32> to vector<16xf32>
    %260 = vector.shape_cast %259 : vector<16xf32> to vector<16x1xf32>
    %cst_90 = arith.constant 1.280000e+02 : f32
    %261 = vector.broadcast %cst_90 : f32 to vector<16x1xf32>
    %262 = arith.divf %260, %261 : vector<16x1xf32>
    %c0_91 = arith.constant 0 : index
    %c0_92 = arith.constant 0 : index
    %263 = vector.load %arg23[%c0_91, %c0_92] : memref<1x128xf32, #tpu.memory_space<vmem>>, vector<1x128xf32>
    %264 = vector.shape_cast %263 : vector<1x128xf32> to vector<128xf32>
    %265 = vector.broadcast %255 : vector<16x1xf32> to vector<16x128xf32>
    %266 = arith.subf %251, %265 : vector<16x128xf32>
    %cst_93 = arith.constant 9.99999996E-13 : f32
    %267 = vector.broadcast %cst_93 : f32 to vector<16x1xf32>
    %268 = arith.addf %262, %267 : vector<16x1xf32>
    %269 = math.rsqrt %268 : vector<16x1xf32>
    %270 = vector.broadcast %269 : vector<16x1xf32> to vector<16x128xf32>
    %271 = arith.mulf %266, %270 : vector<16x128xf32>
    %272 = vector.shape_cast %264 : vector<128xf32> to vector<1x128xf32>
    %273 = vector.broadcast %272 : vector<1x128xf32> to vector<16x128xf32>
    %274 = arith.mulf %273, %271 : vector<16x128xf32>
    %c0_94 = arith.constant 0 : index
    %c0_95 = arith.constant 0 : index
    %275 = vector.load %arg24[%c0_94, %c0_95] : memref<1x128xf32, #tpu.memory_space<vmem>>, vector<1x128xf32>
    %276 = vector.shape_cast %275 : vector<1x128xf32> to vector<128xf32>
    %277 = vector.shape_cast %276 : vector<128xf32> to vector<1x128xf32>
    %278 = vector.broadcast %277 : vector<1x128xf32> to vector<16x128xf32>
    %279 = arith.addf %274, %278 : vector<16x128xf32>
    %c0_96 = arith.constant 0 : index
    %c0_97 = arith.constant 0 : index
    %280 = vector.load %arg25[%c0_96, %c0_97] : memref<16x128xf32, #tpu.memory_space<vmem>>, vector<16x128xf32>
    tpu.vector_store %arg25[%c0_96, %c0_97], %279 {strides = array<i32>} : memref<16x128xf32, #tpu.memory_space<vmem>>, vector<16x128xf32>,
    return
  }
  func.func @transform_0(%arg0: i32) -> (i32, i32) {
    %c0_i32 = arith.constant 0 : i32
    %c0_i32_0 = arith.constant 0 : i32
    %c0_i32_1 = arith.constant 0 : i32
    return %c0_i32, %c0_i32_0 : i32, i32
  }
  func.func @transform_1(%arg0: i32) -> (i32, i32) {
    %c0_i32 = arith.constant 0 : i32
    %c0_i32_0 = arith.constant 0 : i32
    %c0_i32_1 = arith.constant 0 : i32
    return %c0_i32, %c0_i32_0 : i32, i32
  }
  func.func @transform_2(%arg0: i32) -> (i32, i32, i32) {
    %c0_i32 = arith.constant 0 : i32
    %c0_i32_0 = arith.constant 0 : i32
    %c0_i32_1 = arith.constant 0 : i32
    %c0_i32_2 = arith.constant 0 : i32
    return %c0_i32, %c0_i32_0, %c0_i32_1 : i32, i32, i32
  }
  func.func @transform_3(%arg0: i32) -> (i32, i32, i32) {
    %c0_i32 = arith.constant 0 : i32
    %c0_i32_0 = arith.constant 0 : i32
    %c0_i32_1 = arith.constant 0 : i32
    %c0_i32_2 = arith.constant 0 : i32
    return %c0_i32, %c0_i32_0, %c0_i32_1 : i32, i32, i32
  }
  func.func @transform_4(%arg0: i32) -> (i32, i32) {
    %c0_i32 = arith.constant 0 : i32
    %c0_i32_0 = arith.constant 0 : i32
    %c0_i32_1 = arith.constant 0 : i32
    return %c0_i32, %c0_i32_0 : i32, i32
  }
  func.func @transform_5(%arg0: i32) -> (i32, i32) {
    %c0_i32 = arith.constant 0 : i32
    %c0_i32_0 = arith.constant 0 : i32
    %c0_i32_1 = arith.constant 0 : i32
    return %c0_i32, %c0_i32_0 : i32, i32
  }
  func.func @transform_6(%arg0: i32) -> (i32, i32) {
    %c0_i32 = arith.constant 0 : i32
    %c0_i32_0 = arith.constant 0 : i32
    %c0_i32_1 = arith.constant 0 : i32
    return %c0_i32, %c0_i32_0 : i32, i32
  }
  func.func @transform_7(%arg0: i32) -> (i32, i32) {
    %c0_i32 = arith.constant 0 : i32
    %c0_i32_0 = arith.constant 0 : i32
    %c0_i32_1 = arith.constant 0 : i32
    return %c0_i32, %c0_i32_0 : i32, i32
  }
  func.func @transform_8(%arg0: i32) -> (i32, i32) {
    %c0_i32 = arith.constant 0 : i32
    %c0_i32_0 = arith.constant 0 : i32
    %c0_i32_1 = arith.constant 0 : i32
    return %c0_i32, %c0_i32_0 : i32, i32
  }
  func.func @transform_9(%arg0: i32) -> (i32, i32) {
    %c0_i32 = arith.constant 0 : i32
    %c0_i32_0 = arith.constant 0 : i32
    %c0_i32_1 = arith.constant 0 : i32
    return %c0_i32, %c0_i32_0 : i32, i32
  }
  func.func @transform_10(%arg0: i32) -> (i32, i32) {
    %c0_i32 = arith.constant 0 : i32
    %c0_i32_0 = arith.constant 0 : i32
    %c0_i32_1 = arith.constant 0 : i32
    return %c0_i32, %c0_i32_0 : i32, i32
  }
  func.func @transform_11(%arg0: i32) -> (i32, i32) {
    %c0_i32 = arith.constant 0 : i32
    %c0_i32_0 = arith.constant 0 : i32
    %c0_i32_1 = arith.constant 0 : i32
    return %c0_i32, %c0_i32_0 : i32, i32
  }
  func.func @transform_12(%arg0: i32) -> (i32, i32) {
    %c0_i32 = arith.constant 0 : i32
    %c0_i32_0 = arith.constant 0 : i32
    %c0_i32_1 = arith.constant 0 : i32
    return %c0_i32, %c0_i32_0 : i32, i32
  }
  func.func @transform_13(%arg0: i32) -> (i32, i32) {
    %c0_i32 = arith.constant 0 : i32
    %c0_i32_0 = arith.constant 0 : i32
    %c0_i32_1 = arith.constant 0 : i32
    return %c0_i32, %c0_i32_0 : i32, i32
  }
  func.func @transform_14(%arg0: i32) -> (i32, i32) {
    %c0_i32 = arith.constant 0 : i32
    %c0_i32_0 = arith.constant 0 : i32
    %c0_i32_1 = arith.constant 0 : i32
    return %c0_i32, %c0_i32_0 : i32, i32
  }
  func.func @transform_15(%arg0: i32) -> (i32, i32) {
    %c0_i32 = arith.constant 0 : i32
    %c0_i32_0 = arith.constant 0 : i32
    %c0_i32_1 = arith.constant 0 : i32
    return %c0_i32, %c0_i32_0 : i32, i32
  }
  func.func @transform_16(%arg0: i32) -> (i32, i32) {
    %c0_i32 = arith.constant 0 : i32
    %c0_i32_0 = arith.constant 0 : i32
    %c0_i32_1 = arith.constant 0 : i32
    return %c0_i32, %c0_i32_0 : i32, i32
  }
  func.func @transform_17(%arg0: i32) -> (i32, i32) {
    %c0_i32 = arith.constant 0 : i32
    %c0_i32_0 = arith.constant 0 : i32
    %c0_i32_1 = arith.constant 0 : i32
    return %c0_i32, %c0_i32_0 : i32, i32
  }
  func.func @transform_18(%arg0: i32) -> (i32, i32) {
    %c0_i32 = arith.constant 0 : i32
    %c0_i32_0 = arith.constant 0 : i32
    %c0_i32_1 = arith.constant 0 : i32
    return %c0_i32, %c0_i32_0 : i32, i32
  }
  func.func @transform_19(%arg0: i32) -> (i32, i32) {
    %c0_i32 = arith.constant 0 : i32
    %c0_i32_0 = arith.constant 0 : i32
    %c0_i32_1 = arith.constant 0 : i32
    return %c0_i32, %c0_i32_0 : i32, i32
  }
  func.func @transform_20(%arg0: i32) -> (i32, i32) {
    %c0_i32 = arith.constant 0 : i32
    %c0_i32_0 = arith.constant 0 : i32
    %c0_i32_1 = arith.constant 0 : i32
    return %c0_i32, %c0_i32_0 : i32, i32
  }
  func.func @transform_21(%arg0: i32) -> (i32, i32) {
    %c0_i32 = arith.constant 0 : i32
    %c0_i32_0 = arith.constant 0 : i32
    %c0_i32_1 = arith.constant 0 : i32
    return %c0_i32, %c0_i32_0 : i32, i32
  }
  func.func @transform_22(%arg0: i32) -> (i32, i32) {
    %c0_i32 = arith.constant 0 : i32
    %c0_i32_0 = arith.constant 0 : i32
    %c0_i32_1 = arith.constant 0 : i32
    return %c0_i32, %c0_i32_0 : i32, i32
  }
  func.func @transform_23(%arg0: i32) -> (i32, i32) {
    %c0_i32 = arith.constant 0 : i32
    %c0_i32_0 = arith.constant 0 : i32
    %c0_i32_1 = arith.constant 0 : i32
    return %c0_i32, %c0_i32_0 : i32, i32
  }
  func.func @transform_24(%arg0: i32) -> (i32, i32) {
    %c0_i32 = arith.constant 0 : i32
    %c0_i32_0 = arith.constant 0 : i32
    %c0_i32_1 = arith.constant 0 : i32
    return %c0_i32, %c0_i32_0 : i32, i32
  }
}

</mosaic_0001>

<bundles_post_ra>
// kernel: tpu_custom_call.1
= control target key start
LH: loop header
LB: loop body
LE: loop exit
PB: predicated region body
PF: predicated region fallthrough
CT: control target
= control target key end

     0   :  { %s8584_s0 = inlined_call_operand.hbm [shape: bf16[16,128], index: 0, kind: input, shape index: {}]   ;;  %s8585_s1 = inlined_call_operand.hbm [shape: bf16[32,128], index: 1, kind: input, shape index: {}]   ;;  %s8586_s2 = inlined_call_operand.hbm [shape: f32[2,8,8], index: 2, kind: input, shape index: {}]   ;;  %s8587_s3 = inlined_call_operand.hbm [shape: f32[2,8,16], index: 3, kind: input, shape index: {}]   ;;  %s8588_s4 = inlined_call_operand.hbm [shape: bf16[128,384], index: 4, kind: input, shape index: {}]   ;;  %s8589_s5 = inlined_call_operand.vmem [shape: f32[1,384], index: 5, kind: input, shape index: {}]   ;;  %s8590_s6 = inlined_call_operand.hbm [shape: bf16[128,128], index: 6, kind: input, shape index: {}]   ;;  %s8591_s7 = inlined_call_operand.vmem [shape: f32[1,128], index: 7, kind: input, shape index: {}]   ;;  %s8592_s8 = inlined_call_operand.vmem [shape: f32[1,128], index: 8, kind: input, shape index: {}]   ;;  %s8593_s9 = inlined_call_operand.vmem [shape: f32[1,128], index: 9, kind: input, shape index: {}]   ;;  %s8594_s10 = inlined_call_operand.hbm [shape: bf16[128,128], index: 10, kind: input, shape index: {}]   ;;  %s8595_s11 = inlined_call_operand.vmem [shape: f32[1,128], index: 11, kind: input, shape index: {}]   ;;  %s8596_s12 = inlined_call_operand.hbm [shape: bf16[128,256], index: 12, kind: input, shape index: {}]   ;;  %s8597_s13 = inlined_call_operand.vmem [shape: f32[1,256], index: 13, kind: input, shape index: {}]   ;;  %s8598_s14 = inlined_call_operand.hbm [shape: bf16[128,128], index: 14, kind: input, shape index: {}]   ;;  %s8599_s15 = inlined_call_operand.vmem [shape: f32[1,128], index: 15, kind: input, shape index: {}]   ;;  %s8600_s16 = inlined_call_operand.vmem [shape: f32[1,128], index: 16, kind: input, shape index: {}]   ;;  %s8601_s17 = inlined_call_operand.vmem [shape: f32[1,128], index: 17, kind: input, shape index: {}]   ;;  %s8602_s18 = inlined_call_operand.hbm [shape: bf16[128,256], index: 18, kind: input, shape index: {}]   ;;  %s8603_s19 = inlined_call_operand.vmem [shape: f32[1,256], index: 19, kind: input, shape index: {}]   ;;  %s8604_s20 = inlined_call_operand.hbm [shape: bf16[256,128], index: 20, kind: input, shape index: {}]   ;;  %s8605_s21 = inlined_call_operand.vmem [shape: f32[1,128], index: 21, kind: input, shape index: {}]   ;;  %s8606_s22 = inlined_call_operand.vmem [shape: f32[1,128], index: 22, kind: input, shape index: {}]   ;;  %s8607_s23 = inlined_call_operand.vmem [shape: f32[1,128], index: 23, kind: input, shape index: {}]   ;;  %s8608_s24 = inlined_call_operand.hbm [shape: f32[16,128], index: 24, kind: output, shape index: {}]  }
   0x1   :  { %8613 = sst [smem:[#allocation28_spill]] %s8584_s0 }
   0x2   :  { %8614 = sst [smem:[#allocation29_spill]] %s8585_s1 }
   0x3   :  { %8615 = sst [smem:[#allocation30_spill]] %s8586_s2 }
   0x4   :  { %8616 = sst [smem:[#allocation31_spill]] %s8587_s3 }
   0x5   :  { %8617 = sst [smem:[#allocation32_spill]] %s8588_s4 }
   0x6   :  { %8618 = sst [smem:[#allocation33_spill]] %s8589_s5 }
   0x7   :  { %8619 = sst [smem:[#allocation34_spill]] %s8590_s6 }
   0x8   :  { %8620 = sst [smem:[#allocation35_spill]] %s8591_s7 }
   0x9   :  { %8621 = sst [smem:[#allocation36_spill]] %s8592_s8 }
   0xa   :  { %29 = vsyncpa [#allocation3], 0 }
   0xb   :  { %30 = vsyncpa [#allocation6], 0 }
   0xc   :  { %31 = vsyncpa [#allocation9], 0 }
   0xd   :  { %32 = vsyncpa [#allocation12], 0 }
   0xe   :  { %33 = vsyncpa [#allocation15], 0 }
   0xf   :  { %34 = vsyncpa [#allocation18], 0 }
  0x10   :  { %35 = vsyncpa [#allocation4], 0  ;;  %s7281_s5 = smov [#allocation5]  }
  0x11   :  { %s53_s26 = sshll.u32 %s7281_s5, 4  ;;  %s54_s26 = int_to_ptr.vmem [resolvable:$true] %s53_s26 }
  0x12   :  { %s7035_s27 = scalar_lea.vmem %s54_s26, 256  ;;  %p7040_p1 = scmp.lt.s32.totalorder %s54_s26, %s54_s26 }
  0x13   :  { %p7036_p0 = scmp.ne.s32.totalorder %s54_s26, %s7035_s27  ;;  %p7041_p2 = scmp.lt.s32.totalorder %s7035_s27, %s7035_s27 }
  0x15   :  { %p7042_p3 = por %p7041_p2, %p7040_p1 }
  0x17   :  { %p7043_p4 = pnand %p7042_p3, %p7036_p0 }
  0x19   :  { %7046 = shalt.err (!%p7043_p4)
}
  0x1a   :  { %s8609_s28 = smov 64   ;;  %s7283_s6 = smov 4  }
  0x1b   :  { %s8622_s0 = sld [smem:[#allocation29_spill]]  ;;  %s7284_s7 = smov [#allocation8]  }
  0x1c   :  { %s77_s30 = sshll.u32 %s7284_s7, 4  ;;  %s7285_s3 = smov [#allocation11]   ;;  %s78_s30 = int_to_ptr.vmem [resolvable:$true] %s77_s30 }
  0x1d   :  { %s103_s25 = sshll.u32 %s7285_s3, 4  ;;  %s7055_s8 = scalar_lea.vmem %s78_s30, 256  ;;  %s104_s25 = int_to_ptr.vmem [resolvable:$true] %s103_s25 }
  0x1e   :  { %p7056_p5 = scmp.ne.s32.totalorder %s78_s30, %s7055_s8  ;;  %p7060_p6 = scmp.lt.s32.totalorder %s78_s30, %s78_s30 }
  0x1f   :  { %p7061_p7 = scmp.lt.s32.totalorder %s7055_s8, %s7055_s8 }
  0x21   :  { %59 = dma.hbm_to_vmem [thread:$0]  %s8622_s0, 256, %s54_s26, [#allocation6], %s8609_s28, %s8609_s28, %s7283_s6  }
  0x22   :  { %p7062_p8 = por %p7061_p7, %p7060_p6 }
  0x24   :  { %p7063_p9 = pnand %p7062_p8, %p7056_p5 }
  0x26   :  { %7066 = shalt.err (!%p7063_p9)
}
  0x27   :  { %s7286_s4 = smov 128   ;;  %s7287_s1 = smov 8  }
  0x28   :  { %s8623_s26 = sld [smem:[#allocation31_spill]]  ;;  %s7075_s2 = scalar_lea.vmem %s104_s25, 1024 }
  0x29   :  { %p7076_p10 = scmp.ne.s32.totalorder %s104_s25, %s7075_s2  ;;  %p7080_p11 = scmp.lt.s32.totalorder %s104_s25, %s104_s25 }
  0x2a   :  { %p7081_p12 = scmp.lt.s32.totalorder %s7075_s2, %s7075_s2 }
  0x2c   :  { %p7082_p13 = por %p7081_p12, %p7080_p11 }
  0x2e   :  { %83 = dma.hbm_to_vmem [thread:$0]  %s8623_s26, 256, %s78_s30, [#allocation9], %s7286_s4, %s7286_s4, %s7287_s1  }
  0x2f   :  { %p7083_p0 = pnand %p7082_p13, %p7076_p10 }
  0x31   :  { %7086 = shalt.err (!%p7083_p0)
}
  0x32   :  { %s8624_s7 = sld [smem:[#allocation34_spill]]  ;;  %s7288_s3 = smov [#allocation14]  }
  0x33   :  { %s135_s8 = sshll.u32 %s7288_s3, 4  ;;  %s7289_s5 = smov [#allocation17]   ;;  %s136_s8 = int_to_ptr.vmem [resolvable:$true] %s135_s8 }
  0x34   :  { %s167_s30 = sshll.u32 %s7289_s5, 4  ;;  %s7095_s27 = scalar_lea.vmem %s136_s8, 2048  ;;  %s168_s30 = int_to_ptr.vmem [resolvable:$true] %s167_s30 }
  0x35   :  { %p7096_p1 = scmp.ne.s32.totalorder %s136_s8, %s7095_s27  ;;  %p7100_p2 = scmp.lt.s32.totalorder %s136_s8, %s136_s8 }
  0x36   :  { %p7101_p3 = scmp.lt.s32.totalorder %s7095_s27, %s7095_s27 }
  0x38   :  { %109 = dma.hbm_to_vmem [thread:$0]  %s8624_s7, 1024, %s104_s25, [#allocation12], %s8609_s28, %s8609_s28, %s7283_s6  }
  0x39   :  { %p7102_p4 = por %p7101_p3, %p7100_p2 }
  0x3b   :  { %p7103_p5 = pnand %p7102_p4, %p7096_p1 }
  0x3d   :  { %7106 = shalt.err (!%p7103_p5)
}
  0x3e   :  { %141 = dma.hbm_to_vmem [thread:$0]  %s8596_s12, 2048, %s136_s8, [#allocation15], %s7286_s4, %s7286_s4, %s7287_s1  }
  0x3f   :  { %s7115_s25 = scalar_lea.vmem %s168_s30, 2048  ;;  %p7120_p7 = scmp.lt.s32.totalorder %s168_s30, %s168_s30 }
  0x40   :  { %p7116_p6 = scmp.ne.s32.totalorder %s168_s30, %s7115_s25  ;;  %p7121_p8 = scmp.lt.s32.totalorder %s7115_s25, %s7115_s25 }
  0x42   :  { %p7122_p9 = por %p7121_p8, %p7120_p7 }
  0x44   :  { %p7123_p10 = pnand %p7122_p9, %p7116_p6 }
  0x46   :  { %7126 = shalt.err (!%p7123_p10)
}
  0x47   :  { %173 = dma.hbm_to_vmem [thread:$0]  %s8602_s18, 2048, %s168_s30, [#allocation18], %s7286_s4, %s7286_s4, %s7287_s1  }
  0x48   :  { %s7290_s7 = smov [#allocation2]   ;;  %s7291_s5 = smov [#allocation7]  }
  0x49   :  { %s41_s3 = sshll.u32 %s7290_s7, 4  ;;  %s65_s12 = sshll.u32 %s7291_s5, 4  ;;  %s42_s3 = int_to_ptr.vmem [resolvable:$true] %s41_s3  ;;  %s66_s12 = int_to_ptr.vmem [resolvable:$true] %s65_s12 }
  0x4a   :  { %s7135_s8 = scalar_lea.vmem %s42_s3, 128  ;;  %p7140_p12 = scmp.lt.s32.totalorder %s42_s3, %s42_s3 }
  0x4b   :  { %p7136_p11 = scmp.ne.s32.totalorder %s42_s3, %s7135_s8  ;;  %p7141_p13 = scmp.lt.s32.totalorder %s7135_s8, %s7135_s8 }
  0x4d   :  { %p7142_p0 = por %p7141_p13, %p7140_p12 }
  0x4f   :  { %p7143_p1 = pnand %p7142_p0, %p7136_p11 }
  0x51   :  { %7146 = shalt.err (!%p7143_p1)
}
  0x52   :  { %s8625_s2 = sld [smem:[#allocation28_spill]]  ;;  %s7155_s18 = scalar_lea.vmem %s66_s12, 256 }
  0x53   :  { %p7156_p2 = scmp.ne.s32.totalorder %s66_s12, %s7155_s18  ;;  %p7160_p3 = scmp.lt.s32.totalorder %s66_s12, %s66_s12 }
  0x54   :  { %p7161_p4 = scmp.lt.s32.totalorder %s7155_s18, %s7155_s18 }
  0x56   :  { %p7162_p5 = por %p7161_p4, %p7160_p3 }
  0x58   :  { %47 = dma.hbm_to_vmem [thread:$0]  %s8625_s2, 128, %s42_s3, [#allocation3], %s8609_s28, %s8609_s28, %s7283_s6  }
  0x59   :  { %p7163_p6 = pnand %p7162_p5, %p7156_p2 }
  0x5b   :  { %7166 = shalt.err (!%p7163_p6)
}
  0x5c   :  { %s8626_s29 = sld [smem:[#allocation30_spill]]  ;;  %s7292_s0 = smov [#allocation10]  }
  0x5d   :  { %s89_s7 = sshll.u32 %s7292_s0, 4  ;;  %s90_s7 = int_to_ptr.vmem [resolvable:$true] %s89_s7 }
  0x5e   :  { %s7175_s5 = scalar_lea.vmem %s90_s7, 3072  ;;  %p7180_p8 = scmp.lt.s32.totalorder %s90_s7, %s90_s7 }
  0x5f   :  { %p7176_p7 = scmp.ne.s32.totalorder %s90_s7, %s7175_s5  ;;  %p7181_p9 = scmp.lt.s32.totalorder %s7175_s5, %s7175_s5 }
  0x61   :  { %p7182_p10 = por %p7181_p9, %p7180_p8 }
  0x62   :  { %71 = dma.hbm_to_vmem [thread:$0]  %s8626_s29, 256, %s66_s12, [#allocation6], %s7286_s4, %s7286_s4, %s7287_s1  }
  0x63   :  { %p7183_p11 = pnand %p7182_p10, %p7176_p7 }
  0x65   :  { %7186 = shalt.err (!%p7183_p11)
}
  0x66   :  { %s7293_s3 = smov 192   ;;  %s7294_s8 = smov 12  }
  0x67   :  { %s8627_s2 = sld [smem:[#allocation32_spill]]  ;;  %s7295_s18 = smov [#allocation13]  }
  0x68   :  { %s121_s28 = sshll.u32 %s7295_s18, 4  ;;  %s7296_s30 = smov [#allocation16]   ;;  %s122_s28 = int_to_ptr.vmem [resolvable:$true] %s121_s28 }
  0x69   :  { %s149_s12 = sshll.u32 %s7296_s30, 4  ;;  %s7195_s25 = scalar_lea.vmem %s122_s28, 1024  ;;  %s150_s12 = int_to_ptr.vmem [resolvable:$true] %s149_s12 }
  0x6a   :  { %p7196_p12 = scmp.ne.s32.totalorder %s122_s28, %s7195_s25  ;;  %p7200_p13 = scmp.lt.s32.totalorder %s122_s28, %s122_s28 }
  0x6b   :  { %p7201_p0 = scmp.lt.s32.totalorder %s7195_s25, %s7195_s25 }
  0x6d   :  { %95 = dma.hbm_to_vmem [thread:$0]  %s8627_s2, 3072, %s90_s7, [#allocation9], %s7293_s3, %s7293_s3, %s7294_s8  }
  0x6e   :  { %p7202_p1 = por %p7201_p0, %p7200_p13 }
  0x70   :  { %p7203_p2 = pnand %p7202_p1, %p7196_p12 }
  0x72   :  { %7206 = shalt.err (!%p7203_p2)
}
  0x73   :  { %s8628_s29 = smov 64   ;;  %s7215_s7 = scalar_lea.vmem %s150_s12, 1024 }
  0x74   :  { %127 = dma.hbm_to_vmem [thread:$0]  %s8594_s10, 1024, %s122_s28, [#allocation12], %s8628_s29, %s8628_s29, %s7283_s6  }
  0x75   :  { %p7216_p3 = scmp.ne.s32.totalorder %s150_s12, %s7215_s7  ;;  %p7220_p4 = scmp.lt.s32.totalorder %s150_s12, %s150_s12 }
  0x76   :  { %p7221_p5 = scmp.lt.s32.totalorder %s7215_s7, %s7215_s7 }
  0x78   :  { %p7222_p6 = por %p7221_p5, %p7220_p4 }
  0x7a   :  { %p7223_p7 = pnand %p7222_p6, %p7216_p3 }
  0x7c   :  { %7226 = shalt.err (!%p7223_p7)
}
  0x7d   :  { %155 = dma.hbm_to_vmem [thread:$0]  %s8598_s14, 1024, %s150_s12, [#allocation15], %s8628_s29, %s8628_s29, %s7283_s6  }
  0x7e   :  { %s7297_s27 = smov [#allocation19]  }
  0x7f   :  { %s181_s26 = sshll.u32 %s7297_s27, 4  ;;  %s182_s26 = int_to_ptr.vmem [resolvable:$true] %s181_s26 }
  0x80   :  { %s7235_s2 = scalar_lea.vmem %s182_s26, 2048  ;;  %p7240_p9 = scmp.lt.s32.totalorder %s182_s26, %s182_s26 }
  0x81   :  { %p7236_p8 = scmp.ne.s32.totalorder %s182_s26, %s7235_s2  ;;  %p7241_p10 = scmp.lt.s32.totalorder %s7235_s2, %s7235_s2 }
  0x83   :  { %p7242_p11 = por %p7241_p10, %p7240_p9 }
  0x85   :  { %p7243_p12 = pnand %p7242_p11, %p7236_p8 }
  0x87   :  { %7246 = shalt.err (!%p7243_p12)
}
  0x88   :  { %187 = dma.hbm_to_vmem [thread:$0]  %s8604_s20, 2048, %s182_s26, [#allocation18], %s8628_s29, %s8628_s29, %s7283_s6  }
  0x89   :  { %7267 = dma.done.wait [#allocation3], 128  }
  0x8a   :  { %7268 = vsyncadd [#allocation3], 4294967168 }
  0x8b   :  { %7269 = dma.done.wait [#allocation6], 512  }
  0x8c   :  { %7270 = vsyncadd [#allocation6], 4294966784 }
  0x8d   :  { %7271 = dma.done.wait [#allocation9], 3328  }
  0x8e   :  { %7272 = vsyncadd [#allocation9], 4294963968 }
  0x8f   :  { %7273 = dma.done.wait [#allocation12], 2048  }
  0x90   :  { %7274 = vsyncadd [#allocation12], 4294965248 }
  0x91   :  { %7275 = dma.done.wait [#allocation15], 3072  }
  0x92   :  { %7276 = vsyncadd [#allocation15], 4294964224 }
  0x93   :  { %7277 = dma.done.wait [#allocation18], 4096  }
  0x94   :  { %7278 = vsyncadd [#allocation18], 4294963200  ;;  %v7298_v0 = vmov 0   ;;  %v6826_v1 = vld [vmem:[#allocation10 + $0xac] ss:$12 sps:$4 sm:$0xff]   ;;  %v8611_v19 = vmov 0.0   ;;  %v268_v20 = vlaneseq }
  0x95   :  { %449 = vmatprep.mubr.bf16.mxu0 %v7298_v0  ;;  %v6828_v2 = vld [vmem:[#allocation10 + $0xa8] ss:$12 sps:$4 sm:$0xff]   ;;  %417 = vmatprep.subr.bf16.mxu0 %v6826_v1  ;;  %v6831_v4 = vld [vmem:[#allocation10 + $0x90] ss:$12 sps:$4 sm:$0xff]   ;;  %v6834_v6 = vld [vmem:[#allocation10 + $0x78] ss:$12 sps:$4 sm:$0xff]  }
  0x96   :  { %v6829_v3 = vld [vmem:[#allocation10 + $0x94] ss:$12 sps:$4 sm:$0xff]   ;;  %418 = vmatpush1.bf16.msra.mxu0 %v6828_v2  ;;  %v6832_v5 = vld [vmem:[#allocation10 + $0x7c] ss:$12 sps:$4 sm:$0xff]   ;;  %v6835_v7 = vld [vmem:[#allocation10 + $0x64] ss:$12 sps:$4 sm:$0xff]   ;;  %6499 = vmatprep.subr.bf16.mxu1 %v8611_v19 }
  0x97   :  { %419 = vmatprep.subr.bf16.mxu0 %v6829_v3  ;;  %v6837_v8 = vld [vmem:[#allocation10 + $0x60] ss:$12 sps:$4 sm:$0xff]   ;;  %v6840_v10 = vld [vmem:[#allocation10 + $0x48] ss:$12 sps:$4 sm:$0xff]   ;;  %v6843_v12 = vld [vmem:[#allocation10 + $0x30] ss:$12 sps:$4 sm:$0xff]  }
  0x98   :  { %v6838_v9 = vld [vmem:[#allocation10 + $0x4c] ss:$12 sps:$4 sm:$0xff]   ;;  %v6841_v11 = vld [vmem:[#allocation10 + $0x34] ss:$12 sps:$4 sm:$0xff]   ;;  %v6844_v13 = vld [vmem:[#allocation10 + $0x1c] ss:$12 sps:$4 sm:$0xff]  }
  0x99   :  { %v6846_v14 = vld [vmem:[#allocation10 + $0x18] ss:$12 sps:$4 sm:$0xff]   ;;  %v6849_v16 = vld [vmem:[#allocation10] ss:$12 sps:$4 sm:$0xff]   ;;  %v6851_v18 = vld [vmem:[#allocation10 + $0xb0] ss:$12 sps:$4 sm:$0xff]  }
  0x9a   :  { %420 = vmatpush1.bf16.msra.mxu0 %v6831_v4  ;;  %v6847_v15 = vld [vmem:[#allocation10 + $0x4] ss:$12 sps:$4 sm:$0xff]   ;;  %v228_v17 = vld [vmem:[#allocation2] sm:$0xff]   ;;  %6500 = vmatpush3.bf16.msra.mxu1 %v6851_v18  ;;  %v7498_v21 = vshrl.u32 %v268_v20, 7  ;;  %s8629_s6 = sld [smem:[#allocation33_spill]]  ;;  %s7300_s18 = smov 32  }
  0x9b   :  { %421 = vmatprep.subr.bf16.mxu0 %v6832_v5  ;;  %6501 = vmatprep.subr.bf16.mxu1 %v8611_v19  ;;  %v6852_v24 = vld [vmem:[#allocation10 + $0x98] ss:$12 sps:$4 sm:$0xff]   ;;  %v6853_v36 = vld [vmem:[#allocation10 + $0x80] ss:$12 sps:$4 sm:$0xff]   ;;  %s7301_s30 = smov 96   ;;  %vm7302_vm0 = vmmov 0  }
  0x9c   :  { %v7501_v22 = vsub.s32 1, %v7498_v21  ;;  %v7509_v27 = vsub.s32 0, %v7498_v21  ;;  %v6854_v39 = vld [vmem:[#allocation10 + $0x68] ss:$12 sps:$4 sm:$0xff]   ;;  %v6855_v40 = vld [vmem:[#allocation10 + $0x50] ss:$12 sps:$4 sm:$0xff]   ;;  %6515 = vmatprep.mubr.msk.bf16.mxu1 %vm7302_vm0, %v8611_v19 }
  0x9d   :  { %v6856_v41 = vld [vmem:[#allocation10 + $0x38] ss:$12 sps:$4 sm:$0xff]   ;;  %v6857_v42 = vld [vmem:[#allocation10 + $0x20] ss:$12 sps:$4 sm:$0xff]   ;;  %v6858_v43 = vld [vmem:[#allocation10 + $0x8] ss:$12 sps:$4 sm:$0xff]  }
  0x9e   :  { %422 = vmatpush1.bf16.msra.mxu0 %v6834_v6  ;;  %6502 = vmatpush3.bf16.msra.mxu1 %v6852_v24  ;;  %v7303_v44 = vmov 1983009808   ;;  %v7304_v46 = vmov 1934713408   ;;  %vm1008_vm1 = vcmask 261120   ;;  %vm1202_vm2 = vcmask 64512  }
  0x9f   :  { %423 = vmatprep.subr.bf16.mxu0 %v6835_v7  ;;  %6503 = vmatprep.subr.bf16.mxu1 %v8611_v19  ;;  %v512_v45 = vunpack.c.l.s4 %v7303_v44  ;;  %v529_v47 = vunpack.c.l.s4 %v7304_v46  ;;  %vm1254_vm3 = vcmask 1043456   ;;  %vm1585_vm4 = vcmask 523264   ;;  %s8634_s0 = sld [smem:[#allocation35_spill]]  ;;  %s7305_s12 = smov [#allocation20]  }
  0xa0   :  { %v7506_v25 = vld [vmem:[%s8629_s6] sm:$0x7]  ;;  %vm1587_vm5 = vcmask 785408   ;;  %s8635_s8 = sld [smem:[#allocation36_spill]]  ;;  %vm4018_vm6 = vcmask 130048   ;;  %s6195_s25 = sshll.u32 %s7305_s12, 4  ;;  %s6196_s25 = int_to_ptr.vmem [resolvable:$true] %s6195_s25 }
  0xa1   :  { %v275_v28 = vrot.slane %v7506_v25, %v7501_v22  ;;  %v271_v31 = vrot.slane %v7506_v25, %v7509_v27  ;;  %v513_v48 = vunpack.c.0.s8 %v512_v45  ;;  %v530_v49 = vunpack.c.0.s8 %v529_v47  ;;  %p7252_p0 = scmp.lt.s32.totalorder %s6196_s25, %s6196_s25 }
  0xa2   :  { %424 = vmatpush1.bf16.msra.mxu0 %v6837_v8  ;;  %6504 = vmatpush3.bf16.msra.mxu1 %v6853_v36 }
  0xa3   :  { %425 = vmatprep.subr.bf16.mxu0 %v6838_v9  ;;  %6505 = vmatprep.subr.bf16.mxu1 %v8611_v19  ;;  %v7540_v50 = vsub.s32 %v513_v48, %v7498_v21  ;;  %v7543_v51 = vsub.s32 %v530_v49, %v7498_v21 }
  0xa6   :  { %426 = vmatpush1.bf16.msra.mxu0 %v6840_v10  ;;  %6506 = vmatpush3.bf16.msra.mxu1 %v6854_v39 }
  0xa7   :  { %427 = vmatprep.subr.bf16.mxu0 %v6841_v11  ;;  %6507 = vmatprep.subr.bf16.mxu1 %v8611_v19 }
  0xaa   :  { %428 = vmatpush1.bf16.msra.mxu0 %v6843_v12  ;;  %6508 = vmatpush3.bf16.msra.mxu1 %v6855_v40 }
  0xab   :  { %429 = vmatprep.subr.bf16.mxu0 %v6844_v13  ;;  %6509 = vmatprep.subr.bf16.mxu1 %v8611_v19 }
  0xae   :  { %430 = vmatpush1.bf16.msra.mxu0 %v6846_v14  ;;  %6510 = vmatpush3.bf16.msra.mxu1 %v6856_v41 }
  0xaf   :  { %431 = vmatprep.subr.bf16.mxu0 %v6847_v15  ;;  %6511 = vmatprep.subr.bf16.mxu1 %v8611_v19 }
  0xb2   :  { %432 = vmatpush1.bf16.msra.mxu0 %v6849_v16  ;;  %6512 = vmatpush3.bf16.msra.mxu1 %v6857_v42 }
  0xb3   :  { %6519 = vmatprep.subr.bf16.mxu0 %v8611_v19  ;;  %6513 = vmatprep.subr.bf16.mxu1 %v8611_v19 }
  0xb5   :  { %450 = vmatmul.mubr.bf16.vlgmr.msra.gmra.mxu0 %v228_v17 }
  0xb6   :  { %6514 = vmatpush3.bf16.msra.mxu1 %v6858_v43  ;;  %6521 = vmatprep.mubr.msk.bf16.mxu0 %vm7302_vm0, %v8611_v19 }
  0xb7   :  { %6537 = vmatprep.subr.bf16.mxu1 %v8611_v19 }
  0xb9   :  { %6516 = vmatmul.mubr.bf16.vlgmr.msra.gmra.mxu1 %v228_v17 }
  0xba   :  { %6539 = vmatprep.mubr.msk.bf16.mxu1 %vm7302_vm0, %v8611_v19 }
 0x175   :  { %v451_v23 = vpop.f32.mrf.mxu0 }
 0x176   :  { %v452_v37 = vadd.f32 %v451_v23, %v271_v31 }
 0x177   :  { %v453_v26 = vpop.f32.mrf.mxu0 }
 0x178   :  { %v454_v32 = vadd.f32 %v453_v26, %v275_v28 }
 0x179   :  { %v455_v29 = vpop.f32.mrf.mxu0 }
 0x17a   :  { %v456_v34 = vadd.f32 %v455_v29, %v271_v31 }
 0x17b   :  { %v457_v30 = vpop.f32.mrf.mxu0 }
 0x17c   :  { %v458_v33 = vadd.f32 %v457_v30, %v275_v28  ;;  %v501_v38 = vpack.c.bf16 %v456_v34, %v452_v37 }
 0x17e   :  { %v7516_v35 = vpack.c.bf16 %v458_v33, %v454_v32  ;;  %v1589_v58 = vrot.slane %v501_v38, 4  ;;  %v7556_v10 = vrot.slane %v501_v38, %v7540_v50 }
 0x180   :  { %677 = vrot.lane.b32.xlu1 %v7516_v35, %s7300_s18  ;;  %673 = vrot.lane.b32.xlu0 %v7516_v35, %s7301_s30  ;;  %v1755_v1 = vrot.slane %v7516_v35, 4  ;;  %v685_v7 = vrot.slane %v7516_v35, %v7540_v50  ;;  %v7565_v14 = vrot.slane %v1589_v58, %v7540_v50 }
 0x182   :  { %v1766_v23 = vrot.slane %v1755_v1, %v7540_v50 }
 0x184   :  { %675 = vrot.lane.b32.xlu0 %v7516_v35, %s8628_s29  ;;  %505 = vrot.lane.b32.xlu1 %v501_v38, %s7301_s30 }
 0x188   :  { %507 = vrot.lane.b32.xlu0 %v501_v38, %s8628_s29  ;;  %509 = vrot.lane.b32.xlu1 %v501_v38, %s7300_s18 }
 0x1f2   :  { %v678_v52 = vpop.permute.xlu1 %677  ;;  %v674_v53 = vpop.permute.xlu0 %673 }
 0x1f3   :  { %v727_v54 = vrot.slane %v678_v52, %v7540_v50  ;;  %v1758_v55 = vrot.slane %v678_v52, 4  ;;  %v719_v56 = vrot.slane %v674_v53, %v7540_v50  ;;  %v1756_v57 = vrot.slane %v674_v53, 4 }
 0x1f5   :  { %v1808_v59 = vrot.slane %v1758_v55, %v7540_v50  ;;  %v728_v60 = vcombine.low %v719_v56, %v727_v54  ;;  %v729_v61 = vcombine.high %v719_v56, %v727_v54  ;;  %v1800_v62 = vrot.slane %v1756_v57, %v7540_v50 }
 0x1f6   :  { %v676_v63 = vpop.permute.xlu0 %675  ;;  %v506_v2 = vpop.permute.xlu1 %505 }
 0x1f7   :  { %v736_v3 = vrot.slane %v728_v60, %v7543_v51  ;;  %v743_v4 = vrot.slane %v729_v61, %v7543_v51  ;;  %v1809_v5 = vcombine.low %v1800_v62, %v1808_v59  ;;  %v1810_v6 = vcombine.high %v1800_v62, %v1808_v59 }
 0x1f8   :  { %v693_v8 = vrot.slane %v676_v63, %v7540_v50  ;;  %v1757_v9 = vrot.slane %v676_v63, 4  ;;  %v1590_v13 = vrot.slane %v506_v2, 4  ;;  %v7572_v26 = vrot.slane %v506_v2, %v7540_v50 }
 0x1f9   :  { %v7559_v11 = vcombine.high %v736_v3, %v7298_v0  ;;  %v7562_v12 = vcombine.high %v743_v4, %v7298_v0  ;;  %v1817_v15 = vrot.slane %v1809_v5, %v7543_v51  ;;  %v1824_v16 = vrot.slane %v1810_v6, %v7543_v51 }
 0x1fa   :  { %v694_v17 = vcombine.low %v685_v7, %v693_v8  ;;  %v695_v18 = vcombine.high %v685_v7, %v693_v8  ;;  %v751_v20 = vshrl.u32 %v736_v3, 16  ;;  %v1774_v24 = vrot.slane %v1757_v9, %v7540_v50  ;;  %v508_v40 = vpop.permute.xlu0 %507  ;;  %v510_v8 = vpop.permute.xlu1 %509 }
 0x1fb   :  { %v759_v28 = vshrl.u32 %v7559_v11, 16  ;;  %v767_v29 = vshrl.u32 %v743_v4, 16  ;;  %v7576_v30 = vcombine.high %v1817_v15, %v7298_v0  ;;  %v7579_v31 = vcombine.high %v1824_v16, %v7298_v0 }
 0x1fc   :  { %v702_v32 = vrot.slane %v694_v17, %v7543_v51  ;;  %v709_v33 = vrot.slane %v695_v18, %v7543_v51  ;;  %v1775_v34 = vcombine.low %v1766_v23, %v1774_v24  ;;  %v1776_v35 = vcombine.high %v1766_v23, %v1774_v24 }
 0x1fd   :  { %v775_v36 = vshrl.u32 %v7562_v12, 16  ;;  %v1832_v37 = vshrl.u32 %v1817_v15, 16  ;;  %v1848_v38 = vshrl.u32 %v1824_v16, 16  ;;  %v7585_v39 = vrot.slane %v1590_v13, %v7540_v50 }
 0x1fe   :  { %v710_v41 = vcombine.high %v702_v32, %v7298_v0  ;;  %v711_v42 = vcombine.high %v709_v33, %v7298_v0  ;;  %v748_v43 = vpack.i.b16 %v736_v3, %v702_v32  ;;  %v750_v44 = vshrl.u32 %v702_v32, 16 }
 0x1ff   :  { %v764_v45 = vpack.i.b16 %v743_v4, %v709_v33  ;;  %v766_v46 = vshrl.u32 %v709_v33, 16  ;;  %v1783_v47 = vrot.slane %v1775_v34, %v7543_v51  ;;  %v1790_v48 = vrot.slane %v1776_v35, %v7543_v51 }
 0x200   :  { %v1840_v49 = vshrl.u32 %v7576_v30, 16  ;;  %v1856_v52 = vshrl.u32 %v7579_v31, 16  ;;  %v525_v53 = vrot.slane %v508_v40, %v7540_v50  ;;  %v1591_v54 = vrot.slane %v508_v40, 4 }
 0x201   :  { %v7594_v55 = vpack.i.b16 %v751_v20, %v750_v44  ;;  %v756_v56 = vpack.i.b16 %v7559_v11, %v710_v41  ;;  %v758_v57 = vshrl.u32 %v710_v41, 16  ;;  %v7598_v58 = vcombine.high %v1783_v47, %v7298_v0 }
 0x202   :  { %v7600_v59 = vpack.i.b16 %v767_v29, %v766_v46  ;;  %v772_v60 = vpack.i.b16 %v7562_v12, %v711_v42  ;;  %v7604_v61 = vcombine.high %v1790_v48, %v7298_v0  ;;  %v1829_v62 = vpack.i.b16 %v1817_v15, %v1783_v47 }
 0x203   :  { %v774_v63 = vshrl.u32 %v711_v42, 16  ;;  %v7606_v1 = vcombine.low %v748_v43, %v764_v45  ;;  %v1831_v2 = vshrl.u32 %v1783_v47, 16  ;;  %v1839_v4 = vshrl.u32 %v7598_v58, 16 }
 0x204   :  { %v1845_v5 = vpack.i.b16 %v1824_v16, %v1790_v48  ;;  %v1847_v6 = vshrl.u32 %v1790_v48, 16  ;;  %v1853_v7 = vpack.i.b16 %v7579_v31, %v7604_v61  ;;  %v1855_v11 = vshrl.u32 %v7604_v61, 16 }
 0x205   :  { %v7613_v9 = vpack.i.b16 %v1832_v37, %v1831_v2  ;;  %v526_v12 = vcombine.low %v7556_v10, %v525_v53  ;;  %v527_v13 = vcombine.high %v7556_v10, %v525_v53  ;;  %v7618_v15 = vpack.i.b16 %v1840_v49, %v1839_v4 }
 0x206   :  { %v7620_v17 = vpack.i.b16 %v1848_v38, %v1847_v6  ;;  %v7622_v18 = vcombine.low %v1829_v62, %v1845_v5  ;;  %v1608_v16 = vrot.slane %v1591_v54, %v7540_v50  ;;  %v7625_v20 = vpack.i.b16 %v1856_v52, %v1855_v11 }
 0x207   :  { %v534_v23 = vrot.slane %v526_v12, %v7543_v51  ;;  %v541_v24 = vrot.slane %v527_v13, %v7543_v51  ;;  %v559_v29 = vrot.slane %v510_v8, %v7540_v50  ;;  %v7630_v32 = vpack.i.b16 %v759_v28, %v758_v57 }
 0x208   :  { %v1609_v10 = vcombine.low %v7565_v14, %v1608_v16  ;;  %v1610_v33 = vcombine.high %v7565_v14, %v1608_v16  ;;  %v1592_v34 = vrot.slane %v510_v8, 4  ;;  %v7634_v35 = vpack.i.b16 %v775_v36, %v774_v63 }
 0x209   :  { %v786_v37 = vcombine.low %v756_v56, %v772_v60  ;;  %v542_v38 = vcombine.high %v534_v23, %v7298_v0  ;;  %v543_v40 = vcombine.high %v541_v24, %v7298_v0  ;;  %v560_v43 = vcombine.low %v7572_v26, %v559_v29 }
 0x20a   :  { %v1617_v41 = vrot.slane %v1609_v10, %v7543_v51  ;;  %v1624_v42 = vrot.slane %v1610_v33, %v7543_v51  ;;  %v561_v28 = vcombine.high %v7572_v26, %v559_v29  ;;  %v803_v44 = vcombine.low %v7594_v55, %v7600_v59 }
 0x20b   :  { %v582_v14 = vshrl.u32 %v534_v23, 16  ;;  %v1642_v36 = vrot.slane %v1592_v34, %v7540_v50  ;;  %v785_v45 = vrot.slane %v7606_v1, %v7540_v50  ;;  %v590_v46 = vshrl.u32 %v542_v38, 16 }
 0x20c   :  { %v598_v47 = vshrl.u32 %v541_v24, 16  ;;  %v606_v48 = vshrl.u32 %v543_v40, 16  ;;  %v1625_v49 = vcombine.high %v1617_v41, %v7298_v0  ;;  %v568_v52 = vrot.slane %v560_v43, %v7543_v51 }
 0x20d   :  { %v575_v53 = vrot.slane %v561_v28, %v7543_v51  ;;  %v1643_v26 = vcombine.low %v7585_v39, %v1642_v36  ;;  %v1644_v54 = vcombine.high %v7585_v39, %v1642_v36  ;;  %v1626_v56 = vcombine.high %v1624_v42, %v7298_v0 }
 0x20e   :  { %v1665_v57 = vshrl.u32 %v1617_v41, 16  ;;  %v1681_v60 = vshrl.u32 %v1624_v42, 16  ;;  %v793_v62 = vrot.slane %v786_v37, %v7540_v50  ;;  %v1673_v63 = vshrl.u32 %v1625_v49, 16 }
 0x20f   :  { %v576_v1 = vcombine.high %v568_v52, %v7298_v0  ;;  %v577_v2 = vcombine.high %v575_v53, %v7298_v0  ;;  %v583_v4 = vshrl.u32 %v568_v52, 16  ;;  %v580_v5 = vpack.i.b16 %v568_v52, %v534_v23 }
 0x210   :  { %v599_v6 = vshrl.u32 %v575_v53, 16  ;;  %v1651_v8 = vrot.slane %v1643_v26, %v7543_v51  ;;  %v1658_v11 = vrot.slane %v1644_v54, %v7543_v51  ;;  %v596_v29 = vpack.i.b16 %v575_v53, %v541_v24 }
 0x211   :  { %v584_v12 = vpack.i.b16 %v583_v4, %v582_v14  ;;  %v588_v39 = vpack.i.b16 %v576_v1, %v542_v38  ;;  %v591_v13 = vshrl.u32 %v576_v1, 16  ;;  %v604_v16 = vpack.i.b16 %v577_v2, %v543_v40 }
 0x212   :  { %v600_v10 = vpack.i.b16 %v599_v6, %v598_v47  ;;  %v607_v33 = vshrl.u32 %v577_v2, 16  ;;  %v1659_v34 = vcombine.high %v1651_v8, %v7298_v0  ;;  %v1660_v28 = vcombine.high %v1658_v11, %v7298_v0 }
 0x213   :  { %v592_v37 = vpack.i.b16 %v591_v13, %v590_v46  ;;  %v618_v43 = vcombine.low %v588_v39, %v604_v16  ;;  %v1663_v36 = vpack.i.b16 %v1651_v8, %v1617_v41  ;;  %v1689_v23 = vshrl.u32 %v1626_v56, 16 }
 0x214   :  { %v608_v52 = vpack.i.b16 %v607_v33, %v606_v48  ;;  %v635_v19 = vcombine.low %v584_v12, %v600_v10  ;;  %v1666_v26 = vshrl.u32 %v1651_v8, 16  ;;  %v1671_v3 = vpack.i.b16 %v1659_v34, %v1625_v49 }
 0x215   :  { %v1674_v54 = vshrl.u32 %v1659_v34, 16  ;;  %v1679_v14 = vpack.i.b16 %v1658_v11, %v1624_v42  ;;  %v794_v38 = vcombine.low %v785_v45, %v793_v62  ;;  %v610_v1 = vcombine.low %v580_v5, %v596_v29 }
 0x216   :  { %v643_v40 = vcombine.low %v592_v37, %v608_v52  ;;  %v1667_v24 = vpack.i.b16 %v1666_v26, %v1665_v57  ;;  %v1682_v47 = vshrl.u32 %v1658_v11, 16  ;;  %v625_v53 = vrot.slane %v618_v43, %v7540_v50 }
 0x217   :  { %v1675_v2 = vpack.i.b16 %v1674_v54, %v1673_v63  ;;  %v1687_v46 = vpack.i.b16 %v1660_v28, %v1626_v56  ;;  %v1690_v4 = vshrl.u32 %v1660_v28, 16  ;;  %v642_v6 = vrot.slane %v635_v19, %v7540_v50 }
 0x218   :  { %v650_v41 = vrot.slane %v643_v40, %v7540_v50  ;;  %v1683_v48 = vpack.i.b16 %v1682_v47, %v1681_v60  ;;  %v1693_v12 = vcombine.low %v1663_v36, %v1679_v14  ;;  %v801_v42 = vrot.slane %v794_v38, %v7543_v51 }
 0x219   :  { %v1691_v8 = vpack.i.b16 %v1690_v4, %v1689_v23  ;;  %v1701_v49 = vcombine.low %v1671_v3, %v1687_v46  ;;  %v811_v45 = vcombine.low %v7630_v32, %v7634_v35  ;;  %v617_v57 = vrot.slane %v610_v1, %v7540_v50 }
 0x21a   :  { %v651_v62 = vcombine.low %v642_v6, %v650_v41  ;;  %v1718_v5 = vcombine.low %v1667_v24, %v1683_v48  ;;  %v810_v19 = vrot.slane %v803_v44, %v7540_v50  ;;  %v1700_v56 = vrot.slane %v1693_v12, %v7540_v50 }
 0x21b   :  { %v1708_v60 = vrot.slane %v1701_v49, %v7540_v50  ;;  %v1726_v63 = vcombine.low %v1675_v2, %v1691_v8  ;;  %v818_v3 = vrot.slane %v811_v45, %v7540_v50  ;;  %v626_v11 = vcombine.low %v617_v57, %v625_v53 }
 0x21c   :  { %v7675_v32 = vcombine.high %v801_v42, %v7298_v0  ;;  %v7678_v35 = vrot.slane %v651_v62, %v7543_v51  ;;  %v8630_v55 = vpack.i.b16 %v7576_v30, %v7598_v58  ;;  %v1884_v44 = vcombine.low %v7613_v9, %v7620_v17 }
 0x21d   :  { %v1709_v39 = vcombine.low %v1700_v56, %v1708_v60  ;;  %v819_v13 = vcombine.low %v810_v19, %v818_v3  ;;  %v1725_v29 = vrot.slane %v1718_v5, %v7540_v50  ;;  %v1733_v10 = vrot.slane %v1726_v63, %v7540_v50 }
 0x21e   :  { %v1867_v59 = vcombine.low %v8630_v55, %v1853_v7  ;;  %v7692_v33 = vrot.slane %v626_v11, %v7543_v51  ;;  %v1892_v34 = vcombine.low %v7618_v15, %v7625_v20  ;;  %v837_v30 = vshrl.u32 %v7675_v32, 16 }
 0x21f   :  { %v826_v16 = vrot.slane %v819_v13, %v7543_v51  ;;  %v7703_v61 = vcombine.high %v7678_v35, %v7298_v0  ;;  %v1866_v7 = vrot.slane %v7622_v18, %v7540_v50  ;;  %v1891_v9 = vrot.slane %v1884_v44, %v7540_v50 }
 0x220   :  { %v1874_v58 = vrot.slane %v1867_v59, %v7540_v50  ;;  %v1899_v17 = vrot.slane %v1892_v34, %v7540_v50  ;;  %v7712_v28 = vrot.slane %v1709_v39, %v7543_v51  ;;  %v1734_v52 = vcombine.low %v1725_v29, %v1733_v10 }
 0x221   :  { %v830_v37 = vpack.i.b16 %v826_v16, %v801_v42  ;;  %v7697_v31 = vcombine.high %v826_v16, %v7298_v0  ;;  %v832_v43 = vshrl.u32 %v826_v16, 16  ;;  %v662_v18 = vpack.i.b16 %v7678_v35, %v7692_v33 }
 0x222   :  { %v1875_v36 = vcombine.low %v1866_v7, %v1874_v58  ;;  %v1900_v23 = vcombine.low %v1891_v9, %v1899_v17  ;;  %v8631_v54 = vmov 0.0   ;;  %v831_v14 = vshrl.u32 %v801_v42, 16 }
 0x223   :  { %v1013_v15 = vsel %vm1008_vm1, %v830_v37, 0  ;;  %v838_v20 = vshrl.u32 %v7697_v31, 16  ;;  %v634_v38 = vcombine.high %v7692_v33, %v7298_v0  ;;  %v670_v1 = vshrl.u32 %v7703_v61, 16  ;;  %v494_v37 = vpop.f32.mrf.mxu1 }
 0x224   :  { %6520 = vmatpush3.bf16.xpose.msra.mxu0 %v1013_v15  ;;  %v7721_v40 = vrot.slane %v1875_v36, %v7543_v51  ;;  %v7724_v24 = vrot.slane %v1900_v23, %v7543_v51  ;;  %v7727_v47 = vrot.slane %v1734_v52, %v7543_v51  ;;  %v833_v2 = vpack.i.b16 %v832_v43, %v831_v14 }
 0x225   :  { %v839_v26 = vpack.i.b16 %v838_v20, %v837_v30  ;;  %6525 = vmatprep.subr.bf16.mxu0 %v8631_v54  ;;  %v1746_v46 = vshrl.u32 %v7712_v28, 16  ;;  %v7733_v4 = vcombine.high %v7712_v28, %v7298_v0  ;;  %v669_v57 = vshrl.u32 %v634_v38, 16  ;;  %v1197_v20 = vld [vmem:[#allocation7] sm:$0xff] }
 0x226   :  { %v1911_v6 = vpack.i.b16 %v7724_v24, %v7721_v40  ;;  %v1745_v41 = vpack.i.b16 %v7727_v47, %v7712_v28  ;;  %v1912_v48 = vshrl.u32 %v7721_v40, 16  ;;  %v1913_v12 = vshrl.u32 %v7724_v24, 16 }
 0x227   :  { %v1151_v53 = vsel %vm1008_vm1, %v839_v26, 0  ;;  %v7744_v8 = vcombine.high %v7721_v40, %v7298_v0  ;;  %v7748_v49 = vcombine.high %v7724_v24, %v7298_v0  ;;  %v1747_v42 = vshrl.u32 %v7727_v47, 16 }
 0x228   :  { %6538 = vmatpush3.bf16.xpose.msra.mxu1 %v1151_v53  ;;  %v7753_v45 = vcombine.high %v7727_v47, %v7298_v0  ;;  %v7755_v62 = vpack.i.b16 %v1913_v12, %v1912_v48  ;;  %v1059_v5 = vsel %vm1008_vm1, %v833_v2, 0  ;;  %v1752_v11 = vshrl.u32 %v7733_v4, 16 }
 0x229   :  { %6549 = vmatprep.subr.bf16.mxu1 %v8631_v54  ;;  %v7761_v56 = vpack.i.b16 %v1747_v42, %v1746_v46  ;;  %v1918_v63 = vshrl.u32 %v7744_v8, 16  ;;  %v1919_v3 = vshrl.u32 %v7748_v49, 16  ;;  %v671_v13 = vpack.i.b16 %v670_v1, %v669_v57 }
 0x22a   :  { %v1753_v39 = vshrl.u32 %v7753_v45, 16  ;;  %v664_v16 = vshrl.u32 %v7678_v35, 16  ;;  %v663_v44 = vshrl.u32 %v7692_v33, 16  ;;  %v836_v29 = vpack.i.b16 %v7697_v31, %v7675_v32  ;;  %v6517_v31 = vpop.f32.mrf.mxu1 }
 0x22b   :  { %6522 = vmatmul.mubr.msk.bf16.vlgmr.msra.gmra.mxu0 %vm1008_vm1, %v662_v18  ;;  %v7773_v55 = vpack.i.b16 %v1919_v3, %v1918_v63  ;;  %v668_v34 = vpack.i.b16 %v7703_v61, %v634_v38  ;;  %v278_v32 = vsub.s32 2, %v7498_v21  ;;  %v2137_v40 = vsel %vm1008_vm1, %v7755_v62, 0 }
 0x22c   :  { %6526 = vmatpush3.bf16.xpose.msra.mxu0 %v1059_v5  ;;  %6527 = vmatprep.mubr.msk.bf16.mxu0 %vm7302_vm0, %v8631_v54  ;;  %v7775_v59 = vpack.i.b16 %v1753_v39, %v1752_v11  ;;  %v665_v10 = vpack.i.b16 %v664_v16, %v663_v44  ;;  %v1105_v35 = vsel %vm1008_vm1, %v836_v29, 0  ;;  %v497_v58 = vpop.f32.mrf.mxu1  ;;  %v8632_v24 = vpack.i.b16 %v7748_v49, %v7744_v8 }
 0x22d   :  { %6531 = vmatprep.subr.bf16.mxu0 %v8631_v54  ;;  %v279_v33 = vrot.slane %v7506_v25, %v278_v32  ;;  %v8633_v47 = vpack.i.b16 %v7753_v45, %v7733_v4 }
 0x22e   :  { %v6518_v9 = vpop.f32.mrf.mxu1 }
 0x22f   :  { %6540 = vmatmul.mubr.msk.bf16.vlgmr.msra.gmra.mxu1 %vm1008_vm1, %v671_v13  ;;  %v495_v30 = vadd.f32 %v494_v37, %v279_v33  ;;  %v498_v7 = vadd.f32 %v497_v58, %v279_v33 }
 0x230   :  { %6551 = vmatprep.mubr.msk.bf16.mxu1 %vm7302_vm0, %v8631_v54 }
 0x231   :  { %v7794_v17 = vpack.c.bf16 %v498_v7, %v495_v30 }
 0x233   :  { %6528 = vmatmul.mubr.msk.bf16.vlgmr.msra.gmra.mxu0 %vm1008_vm1, %v665_v10 }
 0x234   :  { %6532 = vmatpush3.bf16.xpose.msra.mxu0 %v1105_v35  ;;  %6533 = vmatprep.mubr.msk.bf16.mxu0 %vm7302_vm0, %v8631_v54 }
 0x235   :  { %6543 = vmatprep.subr.bf16.mxu0 %v8631_v54 }
 0x23b   :  { %6534 = vmatmul.mubr.msk.bf16.vlgmr.msra.gmra.mxu0 %vm1008_vm1, %v668_v34 }
 0x23c   :  { %6545 = vmatprep.mubr.msk.bf16.mxu0 %vm7302_vm0, %v8631_v54 }
 0x2eb   :  { %v1049_v15 = vpop.f32.mrf.mxu0 }
 0x2ec   :  { %v1193_v61 = vmul.f32 0.17677669, %v1049_v15 }
 0x2ed   :  { %v6523_v43 = vpop.f32.mrf.mxu0 }
 0x2ee   :  { %v1198_v36 = vadd.f32 %v1197_v20, %v1193_v61 }
 0x2ef   :  { %v1052_v23 = vpop.f32.mrf.mxu0  ;;  %v1187_v52 = vpop.f32.mrf.mxu1 }
 0x2f0   :  { %v1203_v21 = vsel %vm1202_vm2, %v1198_v36, -inf  ;;  %v1196_v57 = vmul.f32 0.17677669, %v1187_v52 }
 0x2f1   :  { %1204 = vmax.xlane.f32.xlu0 %v1203_v21  ;;  %v6524_v25 = vpop.f32.mrf.mxu0  ;;  %v6541_v26 = vpop.f32.mrf.mxu1 }
 0x2f2   :  { %v1201_v13 = vadd.f32 %v1197_v20, %v1196_v57 }
 0x2f3   :  { %v1095_v18 = vpop.f32.mrf.mxu0  ;;  %v1190_v14 = vpop.f32.mrf.mxu1 }
 0x2f4   :  { %v1194_v38 = vmul.f32 0.17677669, %v1095_v18  ;;  %v1212_v44 = vsel %vm1202_vm2, %v1201_v13, -inf }
 0x2f5   :  { %v6529_v1 = vpop.f32.mrf.mxu0  ;;  %v6542_v53 = vpop.f32.mrf.mxu1 }
 0x2f6   :  { %v1199_v2 = vadd.f32 %v1197_v20, %v1194_v38 }
 0x2f7   :  { %v1098_v46 = vpop.f32.mrf.mxu0 }
 0x2f8   :  { %v1206_v48 = vsel %vm1202_vm2, %v1199_v2, -inf }
 0x2f9   :  { %1207 = vmax.xlane.f32.xlu1 %v1206_v48  ;;  %v6530_v12 = vpop.f32.mrf.mxu0 }
 0x2fb   :  { %v1141_v42 = vpop.f32.mrf.mxu0 }
 0x2fc   :  { %v1195_v5 = vmul.f32 0.17677669, %v1141_v42 }
 0x2fd   :  { %v6535_v63 = vpop.f32.mrf.mxu0 }
 0x2fe   :  { %v1200_v3 = vadd.f32 %v1197_v20, %v1195_v5 }
 0x2ff   :  { %v1144_v11 = vpop.f32.mrf.mxu0 }
 0x300   :  { %v1209_v39 = vsel %vm1202_vm2, %v1200_v3, -inf  ;;  %v1921_v11 = vrot.slane %v7794_v17, 4 }
 0x301   :  { %1210 = vmax.xlane.f32.xlu0 %v1209_v39  ;;  %v6536_v16 = vpop.f32.mrf.mxu0 }
 0x305   :  { %1213 = vmax.xlane.f32.xlu0 %v1212_v44 }
 0x30a   :  { %841 = vrot.lane.b32.xlu1 %v7794_v17, %s7301_s30 }
 0x37a   :  { %v1205_v29 = vpop.xlane.xlu0 %1204 }
 0x37b   :  { %v1215_v10 = vsub.f32 %v1198_v36, %v1205_v29 }
 0x37d   :  { %v1219_v35 = vmul.f32 1.442695, %v1215_v10  ;;  %v853_v10 = vrot.slane %v7794_v17, %v7540_v50 }
 0x37f   :  { %6950 = vpow2.f32 %v1219_v35 }
 0x382   :  { %v1208_v34 = vpop.xlane.xlu1 %1207 }
 0x383   :  { %v1216_v32 = vsub.f32 %v1199_v2, %v1208_v34 }
 0x385   :  { %v1221_v33 = vmul.f32 1.442695, %v1216_v32 }
 0x386   :  { %v842_v25 = vpop.permute.xlu1 %841 }
 0x387   :  { %6952 = vpow2.f32 %v1221_v33  ;;  %v1922_v18 = vrot.slane %v842_v25, 4  ;;  %v887_v38 = vrot.slane %v842_v25, %v7540_v50 }
 0x389   :  { %v1966_v2 = vrot.slane %v1922_v18, %v7540_v50 }
 0x38a   :  { %v1211_v7 = vpop.xlane.xlu0 %1210 }
 0x38b   :  { %v1217_v9 = vsub.f32 %v1200_v3, %v1211_v7 }
 0x38c   :  { %v7802_v37 = vpop.eup %6950 }
 0x38d   :  { %v1227_v31 = vsel %vm1202_vm2, %v7802_v37, 0.0  ;;  %v1223_v15 = vmul.f32 1.442695, %v1217_v9 }
 0x38e   :  { %1228 = vadd.xlane.f32.xlu1 %v1227_v31  ;;  %v1214_v20 = vpop.xlane.xlu0 %1213  ;;  %v1932_v31 = vrot.slane %v1921_v11, %v7540_v50 }
 0x38f   :  { %6954 = vpow2.f32 %v1223_v15  ;;  %v1218_v61 = vsub.f32 %v1201_v13, %v1214_v20 }
 0x391   :  { %v1225_v43 = vmul.f32 1.442695, %v1218_v61 }
 0x393   :  { %6956 = vpow2.f32 %v1225_v43 }
 0x394   :  { %v7806_v30 = vpop.eup %6952 }
 0x395   :  { %v1230_v58 = vsel %vm1202_vm2, %v7806_v30, 0.0 }
 0x396   :  { %1231 = vadd.xlane.f32.xlu0 %v1230_v58 }
 0x39c   :  { %v7814_v36 = vpop.eup %6954 }
 0x39d   :  { %v1233_v23 = vsel %vm1202_vm2, %v7814_v36, 0.0 }
 0x39f   :  { %845 = vrot.lane.b32.xlu1 %v7794_v17, %s7300_s18 }
 0x3a0   :  { %v7818_v52 = vpop.eup %6956 }
 0x3a1   :  { %v1236_v21 = vsel %vm1202_vm2, %v7818_v52, 0.0 }
 0x3ac   :  { %843 = vrot.lane.b32.xlu0 %v7794_v17, %s8628_s29 }
 0x3c3   :  { %1234 = vadd.xlane.f32.xlu1 %v1233_v23 }
 0x3cb   :  { %1237 = vadd.xlane.f32.xlu0 %v1236_v21 }
 0x417   :  { %v1229_v26 = vpop.xlane.xlu1 %1228 }
 0x418   :  { %6958 = vrcp.f32 %v1229_v26 }
 0x41b   :  { %v846_v14 = vpop.permute.xlu1 %845 }
 0x41c   :  { %v895_v1 = vrot.slane %v846_v14, %v7540_v50  ;;  %v1924_v53 = vrot.slane %v846_v14, 4 }
 0x41e   :  { %v896_v46 = vcombine.low %v887_v38, %v895_v1  ;;  %v897_v48 = vcombine.high %v887_v38, %v895_v1  ;;  %v1974_v12 = vrot.slane %v1924_v53, %v7540_v50 }
 0x41f   :  { %v1232_v42 = vpop.xlane.xlu0 %1231 }
 0x420   :  { %v904_v57 = vrot.slane %v896_v46, %v7543_v51  ;;  %v911_v5 = vrot.slane %v897_v48, %v7543_v51  ;;  %v1975_v63 = vcombine.low %v1966_v2, %v1974_v12  ;;  %v1976_v3 = vcombine.high %v1966_v2, %v1974_v12 }
 0x421   :  { %6960 = vrcp.f32 %v1232_v42 }
 0x422   :  { %v912_v39 = vcombine.high %v904_v57, %v7298_v0  ;;  %v913_v13 = vcombine.high %v911_v5, %v7298_v0  ;;  %v1983_v16 = vrot.slane %v1975_v63, %v7543_v51  ;;  %v1990_v44 = vrot.slane %v1976_v3, %v7543_v51 }
 0x423   :  { %v844_v29 = vpop.permute.xlu0 %843  ;;  %v919_v15 = vshrl.u32 %v904_v57, 16  ;;  %v935_v61 = vshrl.u32 %v911_v5, 16 }
 0x424   :  { %v861_v35 = vrot.slane %v844_v29, %v7540_v50  ;;  %v1923_v34 = vrot.slane %v844_v29, 4  ;;  %v1991_v32 = vcombine.high %v1983_v16, %v7298_v0  ;;  %v1992_v33 = vcombine.high %v1990_v44, %v7298_v0 }
 0x425   :  { %v927_v20 = vshrl.u32 %v912_v39, 16  ;;  %v943_v43 = vshrl.u32 %v913_v13, 16  ;;  %v1998_v26 = vshrl.u32 %v1983_v16, 16  ;;  %v2014_v14 = vshrl.u32 %v1990_v44, 16 }
 0x426   :  { %v862_v58 = vcombine.low %v853_v10, %v861_v35  ;;  %v863_v7 = vcombine.high %v853_v10, %v861_v35  ;;  %v1940_v9 = vrot.slane %v1923_v34, %v7540_v50  ;;  %v2006_v18 = vshrl.u32 %v1991_v32, 16 }
 0x427   :  { %v2022_v38 = vshrl.u32 %v1992_v33, 16 }
 0x428   :  { %v870_v17 = vrot.slane %v862_v58, %v7543_v51  ;;  %v877_v23 = vrot.slane %v863_v7, %v7543_v51  ;;  %v1941_v21 = vcombine.low %v1932_v31, %v1940_v9  ;;  %v1942_v25 = vcombine.high %v1932_v31, %v1940_v9 }
 0x42a   :  { %v878_v1 = vcombine.high %v870_v17, %v7298_v0  ;;  %v879_v53 = vcombine.high %v877_v23, %v7298_v0  ;;  %v916_v2 = vpack.i.b16 %v904_v57, %v870_v17  ;;  %v918_v46 = vshrl.u32 %v870_v17, 16 }
 0x42b   :  { %v932_v48 = vpack.i.b16 %v911_v5, %v877_v23  ;;  %v934_v12 = vshrl.u32 %v877_v23, 16  ;;  %v1949_v42 = vrot.slane %v1941_v21, %v7543_v51  ;;  %v1956_v63 = vrot.slane %v1942_v25, %v7543_v51 }
 0x42c   :  { %v920_v3 = vpack.i.b16 %v919_v15, %v918_v46  ;;  %v924_v11 = vpack.i.b16 %v912_v39, %v878_v1  ;;  %v926_v29 = vshrl.u32 %v878_v1, 16  ;;  %v940_v10 = vpack.i.b16 %v913_v13, %v879_v53 }
 0x42d   :  { %v936_v35 = vpack.i.b16 %v935_v61, %v934_v12  ;;  %v942_v34 = vshrl.u32 %v879_v53, 16  ;;  %v946_v31 = vcombine.low %v916_v2, %v932_v48  ;;  %v1957_v58 = vcombine.high %v1949_v42, %v7298_v0  ;;  %v6959_v2 = vpop.eup %6958 }
 0x42e   :  { %v928_v7 = vpack.i.b16 %v927_v20, %v926_v29  ;;  %v954_v9 = vcombine.low %v924_v11, %v940_v10  ;;  %v1958_v57 = vcombine.high %v1956_v63, %v7298_v0  ;;  %v1995_v17 = vpack.i.b16 %v1983_v16, %v1949_v42  ;;  %v6961_v12 = vpop.eup %6960 }
 0x42f   :  { %v944_v5 = vpack.i.b16 %v943_v43, %v942_v34  ;;  %v971_v23 = vcombine.low %v920_v3, %v936_v35  ;;  %v1997_v60 = vshrl.u32 %v1949_v42, 16  ;;  %v2003_v21 = vpack.i.b16 %v1991_v32, %v1957_v58 }
 0x430   :  { %v2005_v19 = vshrl.u32 %v1957_v58, 16  ;;  %v2011_v25 = vpack.i.b16 %v1990_v44, %v1956_v63  ;;  %v2013_v15 = vshrl.u32 %v1956_v63, 16  ;;  %v2019_v39 = vpack.i.b16 %v1992_v33, %v1958_v57 }
 0x431   :  { %v1999_v1 = vpack.i.b16 %v1998_v26, %v1997_v60  ;;  %v2021_v13 = vshrl.u32 %v1958_v57, 16  ;;  %v953_v61 = vrot.slane %v946_v31, %v7540_v50  ;;  %v961_v53 = vrot.slane %v954_v9, %v7540_v50 }
 0x432   :  { %v2007_v20 = vpack.i.b16 %v2006_v18, %v2005_v19  ;;  %v2015_v46 = vpack.i.b16 %v2014_v14, %v2013_v15  ;;  %v2025_v48 = vcombine.low %v1995_v17, %v2011_v25  ;;  %v979_v3 = vcombine.low %v928_v7, %v944_v5 }
 0x433   :  { %v2023_v16 = vpack.i.b16 %v2022_v38, %v2021_v13  ;;  %v962_v43 = vcombine.low %v953_v61, %v961_v53  ;;  %v2033_v42 = vcombine.low %v2003_v21, %v2019_v39  ;;  %v978_v33 = vrot.slane %v971_v23, %v7540_v50 }
 0x434   :  { %v2050_v32 = vcombine.low %v1999_v1, %v2015_v46  ;;  %v986_v60 = vrot.slane %v979_v3, %v7540_v50  ;;  %v2032_v63 = vrot.slane %v2025_v48, %v7540_v50  ;;  %v1243_v31 = vmul.f32 %v6959_v2, %v7802_v37 }
 0x435   :  { %v969_v44 = vrot.slane %v962_v43, %v7543_v51  ;;  %v2058_v26 = vcombine.low %v2007_v20, %v2023_v16  ;;  %v2040_v11 = vrot.slane %v2033_v42, %v7540_v50  ;;  %v1244_v5 = vmul.f32 %v6961_v12, %v7806_v30 }
 0x436   :  { %v987_v19 = vcombine.low %v978_v33, %v986_v60  ;;  %v2057_v18 = vrot.slane %v2050_v32, %v7540_v50  ;;  %v1247_v61 = vpack.c.bf16 %v1243_v31, %v1243_v31 }
 0x437   :  { %v2065_v14 = vrot.slane %v2058_v26, %v7540_v50  ;;  %v970_v38 = vcombine.high %v969_v44, %v7298_v0  ;;  %v2041_v29 = vcombine.low %v2032_v63, %v2040_v11  ;;  %v999_v34 = vshrl.u32 %v969_v44, 16 }
 0x438   :  { %v994_v10 = vrot.slane %v987_v19, %v7543_v51  ;;  %v1248_v48 = vpack.c.bf16 %v1244_v5, %v1244_v5  ;;  %v2091_v26 = vsel %vm1008_vm1, %v1911_v6, 0  ;;  %v2183_v6 = vsel %vm1008_vm1, %v8632_v24, 0 }
 0x439   :  { %v2066_v35 = vcombine.low %v2057_v18, %v2065_v14  ;;  %v7861_v58 = vrot.slane %v2041_v29, %v7543_v51  ;;  %v1005_v23 = vshrl.u32 %v970_v38, 16 }
 0x43a   :  { %v998_v7 = vpack.i.b16 %v994_v10, %v969_v44  ;;  %v1000_v9 = vshrl.u32 %v994_v10, 16  ;;  %v995_v57 = vcombine.high %v994_v10, %v7298_v0 }
 0x43b   :  { %v7865_v17 = vrot.slane %v2066_v35, %v7543_v51  ;;  %v2049_v21 = vcombine.high %v7861_v58, %v7298_v0  ;;  %v2078_v62 = vshrl.u32 %v7861_v58, 16 }
 0x43c   :  { %v1256_v25 = vsel %vm1254_vm3, %v998_v7, 0  ;;  %v1001_v15 = vpack.i.b16 %v1000_v9, %v999_v34  ;;  %v1004_v37 = vpack.i.b16 %v995_v57, %v970_v38  ;;  %v1006_v39 = vshrl.u32 %v995_v57, 16  ;;  %v7944_v57 = vld [vmem:[#allocation7 + $0x8] sm:$0xff] }
 0x43d   :  { %6544 = vmatpush3.bf16.msra.mxu0 %v1256_v25  ;;  %v2074_v1 = vcombine.high %v7865_v17, %v7298_v0  ;;  %v2084_v2 = vshrl.u32 %v2049_v21, 16  ;;  %v2077_v28 = vpack.i.b16 %v7865_v17, %v7861_v58  ;;  %v2079_v49 = vshrl.u32 %v7865_v17, 16 }
 0x43e   :  { %v1302_v13 = vsel %vm1254_vm3, %v1001_v15, 0  ;;  %6555 = vmatprep.subr.bf16.mxu0 %v8631_v54  ;;  %v1007_v53 = vpack.i.b16 %v1006_v39, %v1005_v23  ;;  %v1348_v46 = vsel %vm1254_vm3, %v1004_v37, 0 }
 0x43f   :  { %6550 = vmatpush3.bf16.msra.mxu1 %v1302_v13  ;;  %v2083_v30 = vpack.i.b16 %v2074_v1, %v2049_v21  ;;  %v2085_v20 = vshrl.u32 %v2074_v1, 16  ;;  %v2333_v8 = vsel %vm1254_vm3, %v2077_v28, 0  ;;  %v2080_v4 = vpack.i.b16 %v2079_v49, %v2078_v62 }
 0x440   :  { %6546 = vmatmul.mubr.msk.bf16.vlgmr.msra.gmra.mxu0 %vm1202_vm2, %v1247_v61  ;;  %6561 = vmatprep.subr.bf16.mxu1 %v8631_v54  ;;  %v1394_v43 = vsel %vm1254_vm3, %v1007_v53, 0 }
 0x441   :  { %6556 = vmatpush3.bf16.msra.mxu0 %v1348_v46  ;;  %6557 = vmatprep.mubr.msk.bf16.mxu0 %vm7302_vm0, %v8631_v54  ;;  %v7881_v12 = vsel %vm1254_vm3, %v2083_v30, 0  ;;  %v2086_v16 = vpack.i.b16 %v2085_v20, %v2084_v2  ;;  %v2379_v45 = vsel %vm1254_vm3, %v2080_v4, 0 }
 0x442   :  { %6552 = vmatmul.mubr.msk.bf16.vlgmr.msra.gmra.mxu1 %vm1202_vm2, %v1248_v48  ;;  %6567 = vmatprep.subr.bf16.mxu0 %v8631_v54 }
 0x443   :  { %6562 = vmatpush3.bf16.msra.mxu1 %v1394_v43  ;;  %6563 = vmatprep.mubr.msk.bf16.mxu1 %vm7302_vm0, %v8631_v54  ;;  %v7889_v3 = vsel %vm1254_vm3, %v2086_v16, 0 }
 0x444   :  { %6573 = vmatprep.subr.bf16.mxu1 %v8631_v54 }
 0x44c   :  { %v1235_v42 = vpop.xlane.xlu1 %1234 }
 0x44d   :  { %6962 = vrcp.f32 %v1235_v42 }
 0x454   :  { %v1238_v32 = vpop.xlane.xlu0 %1237 }
 0x455   :  { %6964 = vrcp.f32 %v1238_v32 }
 0x45a   :  { %v6963_v44 = vpop.eup %6962 }
 0x45b   :  { %v1245_v33 = vmul.f32 %v6963_v44, %v7814_v36 }
 0x45d   :  { %v1249_v60 = vpack.c.bf16 %v1245_v33, %v1245_v33 }
 0x45f   :  { %6558 = vmatmul.mubr.msk.bf16.vlgmr.msra.gmra.mxu0 %vm1202_vm2, %v1249_v60 }
 0x460   :  { %6568 = vmatpush3.bf16.xpose.msra.mxu0 %v2091_v26  ;;  %6569 = vmatprep.mubr.msk.bf16.mxu0 %vm7302_vm0, %v8631_v54 }
 0x461   :  { %6579 = vmatprep.subr.bf16.mxu0 %v8631_v54 }
 0x462   :  { %v6965_v63 = vpop.eup %6964 }
 0x463   :  { %v1246_v11 = vmul.f32 %v6965_v63, %v7818_v52 }
 0x465   :  { %v1250_v19 = vpack.c.bf16 %v1246_v11, %v1246_v11 }
 0x467   :  { %6564 = vmatmul.mubr.msk.bf16.vlgmr.msra.gmra.mxu1 %vm1202_vm2, %v1250_v19  ;;  %6570 = vmatmul.mubr.msk.bf16.vlgmr.msra.gmra.mxu0 %vm1008_vm1, %v1745_v41  ;;  %v2229_v41 = vsel %vm1008_vm1, %v7773_v55, 0 }
 0x468   :  { %6574 = vmatpush3.bf16.xpose.msra.mxu1 %v2137_v40  ;;  %6580 = vmatpush3.bf16.xpose.msra.mxu0 %v2183_v6 }
 0x469   :  { %6575 = vmatprep.mubr.msk.bf16.mxu1 %vm7302_vm0, %v8631_v54  ;;  %6581 = vmatprep.mubr.msk.bf16.mxu0 %vm7302_vm0, %v8631_v54 }
 0x46a   :  { %6585 = vmatprep.subr.bf16.mxu1 %v8631_v54  ;;  %6591 = vmatprep.subr.bf16.mxu0 %v8631_v54 }
 0x46f   :  { %6576 = vmatmul.mubr.msk.bf16.vlgmr.msra.gmra.mxu1 %vm1008_vm1, %v7761_v56  ;;  %6582 = vmatmul.mubr.msk.bf16.vlgmr.msra.gmra.mxu0 %vm1008_vm1, %v8633_v47 }
 0x470   :  { %6586 = vmatpush3.bf16.xpose.msra.mxu1 %v2229_v41  ;;  %6592 = vmatpush3.bf16.msra.mxu0 %v2333_v8 }
 0x471   :  { %6587 = vmatprep.mubr.msk.bf16.mxu1 %vm7302_vm0, %v8631_v54  ;;  %6597 = vmatprep.subr.bf16.mxu1 %v8631_v54 }
 0x472   :  { %6593 = vmatprep.mubr.msk.bf16.mxu0 %vm7302_vm0, %v8631_v54  ;;  %6603 = vmatprep.subr.bf16.mxu0 %v8631_v54 }
 0x477   :  { %6588 = vmatmul.mubr.msk.bf16.vlgmr.msra.gmra.mxu1 %vm1008_vm1, %v7775_v59 }
 0x478   :  { %6598 = vmatpush3.bf16.msra.mxu1 %v2379_v45  ;;  %6599 = vmatprep.mubr.msk.bf16.mxu1 %vm7302_vm0, %v8631_v54 }
 0x479   :  { %6609 = vmatprep.subr.bf16.mxu1 %v8631_v54 }
 0x500   :  { %v1292_v56 = vpop.f32.mrf.mxu0 }
 0x502   :  { %v6547_v55 = vpop.f32.mrf.mxu0  ;;  %v1338_v36 = vpop.f32.mrf.mxu1 }
 0x504   :  { %v1295_v52 = vpop.f32.mrf.mxu0  ;;  %v6553_v18 = vpop.f32.mrf.mxu1 }
 0x506   :  { %v6548_v14 = vpop.f32.mrf.mxu0  ;;  %v1341_v38 = vpop.f32.mrf.mxu1 }
 0x508   :  { %v6554_v29 = vpop.f32.mrf.mxu1 }
 0x51f   :  { %v1384_v10 = vpop.f32.mrf.mxu0 }
 0x520   :  { %v1436_v35 = vcombine.low %v1292_v56, %v1384_v10  ;;  %v1437_v34 = vcombine.high %v1292_v56, %v1384_v10 }
 0x521   :  { %v6559_v59 = vpop.f32.mrf.mxu0 }
 0x522   :  { %v1444_v21 = vrot.slane %v1436_v35, %v7540_v50  ;;  %v1451_v37 = vrot.slane %v1437_v34, %v7540_v50 }
 0x523   :  { %v1387_v31 = vpop.f32.mrf.mxu0 }
 0x525   :  { %v6560_v58 = vpop.f32.mrf.mxu0 }
 0x527   :  { %v1430_v7 = vpop.f32.mrf.mxu1  ;;  %v2127_v9 = vpop.f32.mrf.mxu0 }
 0x528   :  { %v1452_v17 = vcombine.low %v1338_v36, %v1430_v7  ;;  %v1453_v5 = vcombine.high %v1338_v36, %v1430_v7  ;;  %v2271_v23 = vmul.f32 0.17677669, %v2127_v9 }
 0x529   :  { %v6565_v25 = vpop.f32.mrf.mxu1  ;;  %v6571_v15 = vpop.f32.mrf.mxu0 }
 0x52a   :  { %v1460_v39 = vrot.slane %v1452_v17, %v7540_v50  ;;  %v1467_v1 = vrot.slane %v1453_v5, %v7540_v50  ;;  %v2277_v13 = vadd.f32 %v7944_v57, %v2271_v23 }
 0x52b   :  { %v1433_v61 = vpop.f32.mrf.mxu1  ;;  %v2130_v53 = vpop.f32.mrf.mxu0 }
 0x52c   :  { %v1468_v30 = vcombine.low %v1444_v21, %v1460_v39  ;;  %v1469_v2 = vcombine.high %v1444_v21, %v1460_v39  ;;  %v1484_v20 = vcombine.low %v1451_v37, %v1467_v1  ;;  %v1485_v46 = vcombine.high %v1451_v37, %v1467_v1 }
 0x52d   :  { %v6566_v48 = vpop.f32.mrf.mxu1  ;;  %v2281_v16 = vsel %vm1202_vm2, %v2277_v13, -inf  ;;  %v6572_v43 = vpop.f32.mrf.mxu0 }
 0x52e   :  { %v1476_v42 = vrot.slane %v1468_v30, %v7543_v51  ;;  %v1483_v32 = vrot.slane %v1469_v2, %v7543_v51  ;;  %v1492_v44 = vrot.slane %v1484_v20, %v7543_v51  ;;  %v1499_v33 = vrot.slane %v1485_v46, %v7543_v51  ;;  %2282 = vmax.xlane.f32.xlu0 %v2281_v16 }
 0x52f   :  { %v2173_v60 = vpop.f32.mrf.mxu1  ;;  %v2219_v26 = vpop.f32.mrf.mxu0 }
 0x530   :  { %v1504_v63 = vcombine.low %v1476_v42, %v1483_v32  ;;  %v6245_v11 = vcombine.high %v1476_v42, %v1483_v32  ;;  %v1520_v19 = vcombine.low %v1492_v44, %v1499_v33  ;;  %v6246_v40 = vcombine.high %v1492_v44, %v1499_v33 }
 0x531   :  { %v2272_v24 = vmul.f32 0.17677669, %v2173_v60  ;;  %v2273_v6 = vmul.f32 0.17677669, %v2219_v26  ;;  %v6577_v28 = vpop.f32.mrf.mxu1  ;;  %v6583_v47 = vpop.f32.mrf.mxu0 }
 0x532   :  { %v1511_v41 = vrot.slane %v1504_v63, %v7540_v50  ;;  %v1519_v8 = vrot.slane %v6245_v11, %v7540_v50  ;;  %v1527_v49 = vrot.slane %v1520_v19, %v7540_v50  ;;  %v1535_v62 = vrot.slane %v6246_v40, %v7540_v50 }
 0x533   :  { %v2176_v4 = vpop.f32.mrf.mxu1  ;;  %v2222_v45 = vpop.f32.mrf.mxu0  ;;  %v2278_v56 = vadd.f32 %v7944_v57, %v2272_v24  ;;  %v2279_v55 = vadd.f32 %v7944_v57, %v2273_v6 }
 0x534   :  { %v1537_v36 = vcombine.high %v1511_v41, %v1519_v8  ;;  %v1553_v52 = vcombine.high %v1527_v49, %v1535_v62  ;;  %v1536_v18 = vcombine.low %v1511_v41, %v1519_v8  ;;  %v1552_v14 = vcombine.low %v1527_v49, %v1535_v62 }
 0x535   :  { %v2284_v38 = vsel %vm1202_vm2, %v2278_v56, -inf  ;;  %v6578_v29 = vpop.f32.mrf.mxu1  ;;  %v2287_v10 = vsel %vm1202_vm2, %v2279_v55, -inf  ;;  %v6584_v35 = vpop.f32.mrf.mxu0 }
 0x536   :  { %2285 = vmax.xlane.f32.xlu1 %v2284_v38  ;;  %2288 = vmax.xlane.f32.xlu0 %v2287_v10  ;;  %v7965_v34 = vrot.slane %v1537_v36, %v7543_v51  ;;  %v7968_v59 = vrot.slane %v1553_v52, %v7543_v51  ;;  %v7971_v31 = vrot.slane %v1536_v18, %v7543_v51  ;;  %v6859_v18 = vld [vmem:[#allocation11 + $0x38] sm:$0xff]   ;;  %v6862_v38 = vld [vmem:[#allocation11 + $0x20] sm:$0xff]   ;;  %v6864_v10 = vld [vmem:[#allocation11 + $0x10] sm:$0xff]  }
 0x537   :  { %v2265_v58 = vpop.f32.mrf.mxu1  ;;  %v7974_v7 = vrot.slane %v1552_v14, %v7543_v51  ;;  %v6860_v14 = vld [vmem:[#allocation11 + $0x30] sm:$0xff]   ;;  %v6863_v29 = vld [vmem:[#allocation11 + $0x18] sm:$0xff]  }
 0x538   :  { %v2274_v9 = vmul.f32 0.17677669, %v2265_v58  ;;  %v1570_v17 = vcombine.low %v7965_v34, %v7968_v59  ;;  %v1571_v5 = vcombine.high %v7965_v34, %v7968_v59 }
 0x539   :  { %v6589_v23 = vpop.f32.mrf.mxu1  ;;  %v1568_v21 = vcombine.low %v7971_v31, %v7974_v7  ;;  %v1569_v25 = vcombine.high %v7971_v31, %v7974_v7  ;;  %v6257_v31 = vld [vmem:[%s8634_s0] ss:$0 sm:$0xff]  ;;  %s7247_s0 = scalar_lea.vmem %s6196_s25, 256 }
 0x53a   :  { %v2280_v15 = vadd.f32 %v7944_v57, %v2274_v9  ;;  %v7026_v7 = vld [vmem:[#allocation2] sm:$0xff]   ;;  %p7248_p13 = scmp.ne.s32.totalorder %s6196_s25, %s7247_s0  ;;  %p7253_p1 = scmp.lt.s32.totalorder %s7247_s0, %s7247_s0 }
 0x53b   :  { %v2268_v37 = vpop.f32.mrf.mxu1 }
 0x53c   :  { %v2290_v39 = vsel %vm1202_vm2, %v2280_v15, -inf  ;;  %p7254_p2 = por %p7253_p1, %p7252_p0 }
 0x53d   :  { %2291 = vmax.xlane.f32.xlu1 %v2290_v39  ;;  %v6590_v1 = vpop.f32.mrf.mxu1 }
 0x53e   :  { %p7255_p3 = pnand %p7254_p2, %p7248_p13 }
 0x5b7   :  { %v2283_v61 = vpop.xlane.xlu0 %2282 }
 0x5b8   :  { %v2293_v53 = vsub.f32 %v2277_v13, %v2283_v61 }
 0x5ba   :  { %v2297_v30 = vmul.f32 1.442695, %v2293_v53 }
 0x5bc   :  { %6966 = vpow2.f32 %v2297_v30 }
 0x5bf   :  { %v2286_v2 = vpop.xlane.xlu1 %2285  ;;  %v2289_v20 = vpop.xlane.xlu0 %2288 }
 0x5c0   :  { %v2294_v46 = vsub.f32 %v2278_v56, %v2286_v2  ;;  %v2295_v48 = vsub.f32 %v2279_v55, %v2289_v20 }
 0x5c2   :  { %v2299_v16 = vmul.f32 1.442695, %v2294_v46  ;;  %v2301_v43 = vmul.f32 1.442695, %v2295_v48 }
 0x5c4   :  { %6968 = vpow2.f32 %v2299_v16 }
 0x5c5   :  { %6970 = vpow2.f32 %v2301_v43 }
 0x5c6   :  { %v2292_v42 = vpop.xlane.xlu1 %2291 }
 0x5c7   :  { %v2296_v32 = vsub.f32 %v2280_v15, %v2292_v42 }
 0x5c9   :  { %v6967_v57 = vpop.eup %6966  ;;  %v2303_v44 = vmul.f32 1.442695, %v2296_v32 }
 0x5ca   :  { %v2305_v33 = vsel %vm1202_vm2, %v6967_v57, 0.0 }
 0x5cb   :  { %6972 = vpow2.f32 %v2303_v44  ;;  %2306 = vadd.xlane.f32.xlu0 %v2305_v33 }
 0x5d1   :  { %v6969_v60 = vpop.eup %6968 }
 0x5d2   :  { %v6971_v13 = vpop.eup %6970  ;;  %v2308_v26 = vsel %vm1202_vm2, %v6969_v60, 0.0 }
 0x5d3   :  { %2309 = vadd.xlane.f32.xlu1 %v2308_v26  ;;  %v2311_v63 = vsel %vm1202_vm2, %v6971_v13, 0.0 }
 0x5d4   :  { %2312 = vadd.xlane.f32.xlu0 %v2311_v63 }
 0x5d8   :  { %v6973_v11 = vpop.eup %6972 }
 0x5d9   :  { %v2314_v19 = vsel %vm1202_vm2, %v6973_v11, 0.0 }
 0x5da   :  { %2315 = vadd.xlane.f32.xlu1 %v2314_v19 }
 0x654   :  { %v2307_v40 = vpop.xlane.xlu0 %2306 }
 0x655   :  { %6974 = vrcp.f32 %v2307_v40 }
 0x65c   :  { %v2310_v24 = vpop.xlane.xlu1 %2309 }
 0x65d   :  { %6976 = vrcp.f32 %v2310_v24  ;;  %v2313_v6 = vpop.xlane.xlu0 %2312 }
 0x65e   :  { %6978 = vrcp.f32 %v2313_v6 }
 0x662   :  { %v6975_v28 = vpop.eup %6974 }
 0x663   :  { %v2316_v47 = vpop.xlane.xlu1 %2315  ;;  %v2321_v41 = vmul.f32 %v6975_v28, %v6967_v57 }
 0x664   :  { %6980 = vrcp.f32 %v2316_v47 }
 0x665   :  { %v2325_v8 = vpack.c.bf16 %v2321_v41, %v2321_v41 }
 0x667   :  { %6594 = vmatmul.mubr.msk.bf16.vlgmr.msra.gmra.mxu0 %vm1202_vm2, %v2325_v8 }
 0x668   :  { %6604 = vmatpush3.bf16.msra.mxu0 %v7881_v12  ;;  %6605 = vmatprep.mubr.msk.bf16.mxu0 %vm7302_vm0, %v8631_v54 }
 0x669   :  { %6615 = vmatprep.subr.bf16.mxu0 %v8631_v54 }
 0x66a   :  { %v6977_v49 = vpop.eup %6976 }
 0x66b   :  { %v6979_v62 = vpop.eup %6978  ;;  %v2322_v4 = vmul.f32 %v6977_v49, %v6969_v60 }
 0x66c   :  { %v2323_v45 = vmul.f32 %v6979_v62, %v6971_v13  ;;  %v6865_v62 = vld [vmem:[#allocation11 + $0x8] sm:$0xff]  }
 0x66d   :  { %v2326_v56 = vpack.c.bf16 %v2322_v4, %v2322_v4 }
 0x66e   :  { %v2327_v55 = vpack.c.bf16 %v2323_v45, %v2323_v45 }
 0x66f   :  { %6600 = vmatmul.mubr.msk.bf16.vlgmr.msra.gmra.mxu1 %vm1202_vm2, %v2326_v56 }
 0x670   :  { %6606 = vmatmul.mubr.msk.bf16.vlgmr.msra.gmra.mxu0 %vm1202_vm2, %v2327_v55  ;;  %6610 = vmatpush3.bf16.msra.mxu1 %v7889_v3  ;;  %v6861_v3 = vld [vmem:[#allocation11 + $0x28] sm:$0xff]  }
 0x671   :  { %v6981_v36 = vpop.eup %6980  ;;  %6611 = vmatprep.mubr.msk.bf16.mxu1 %vm7302_vm0, %v8631_v54  ;;  %6631 = vmatprep.mubr.msk.bf16.mxu0 %vm7302_vm0, %v8631_v54 }
 0x672   :  { %v2324_v12 = vmul.f32 %v6981_v36, %v6973_v11  ;;  %6635 = vmatprep.subr.bf16.mxu1 %v8631_v54  ;;  %6616 = vmatpush3.bf16.msra.mxu0 %v6859_v18 }
 0x673   :  { %6617 = vmatprep.subr.bf16.mxu0 %v8631_v54 }
 0x674   :  { %v2328_v52 = vpack.c.bf16 %v2324_v12, %v2324_v12 }
 0x676   :  { %6618 = vmatpush3.bf16.msra.mxu0 %v6860_v14 }
 0x677   :  { %6612 = vmatmul.mubr.msk.bf16.vlgmr.msra.gmra.mxu1 %vm1202_vm2, %v2328_v52  ;;  %6619 = vmatprep.subr.bf16.mxu0 %v8631_v54 }
 0x678   :  { %6651 = vmatprep.mubr.msk.bf16.mxu1 %vm7302_vm0, %v8631_v54 }
 0x67a   :  { %6620 = vmatpush3.bf16.msra.mxu0 %v6861_v3 }
 0x67b   :  { %6621 = vmatprep.subr.bf16.mxu0 %v8631_v54 }
 0x67e   :  { %6622 = vmatpush3.bf16.msra.mxu0 %v6862_v38 }
 0x67f   :  { %6623 = vmatprep.subr.bf16.mxu0 %v8631_v54 }
 0x682   :  { %6624 = vmatpush3.bf16.msra.mxu0 %v6863_v29 }
 0x683   :  { %6625 = vmatprep.subr.bf16.mxu0 %v8631_v54 }
 0x686   :  { %6626 = vmatpush3.bf16.msra.mxu0 %v6864_v10  ;;  %v6866_v10 = vld [vmem:[#allocation11] sm:$0xff]  }
 0x687   :  { %6627 = vmatprep.subr.bf16.mxu0 %v8631_v54 }
 0x68a   :  { %6628 = vmatpush3.bf16.msra.mxu0 %v6865_v62  ;;  %v6881_v62 = vld [vmem:[#allocation14 + $0x34] ss:$8 sps:$4 sm:$0xff]  }
 0x68b   :  { %6629 = vmatprep.subr.bf16.mxu0 %v8631_v54 }
 0x68e   :  { %6630 = vmatpush3.bf16.msra.mxu0 %v6866_v10 }
 0x727   :  { %v2369_v35 = vpop.f32.mrf.mxu0 }
 0x729   :  { %v6595_v58 = vpop.f32.mrf.mxu0 }
 0x72b   :  { %v2372_v9 = vpop.f32.mrf.mxu0 }
 0x72d   :  { %v6596_v23 = vpop.f32.mrf.mxu0 }
 0x72f   :  { %v2415_v15 = vpop.f32.mrf.mxu1 }
 0x730   :  { %v2461_v37 = vpop.f32.mrf.mxu0 }
 0x731   :  { %v6601_v39 = vpop.f32.mrf.mxu1  ;;  %v2513_v2 = vcombine.low %v2369_v35, %v2461_v37  ;;  %v2514_v20 = vcombine.high %v2369_v35, %v2461_v37 }
 0x732   :  { %v6607_v1 = vpop.f32.mrf.mxu0 }
 0x733   :  { %v2418_v61 = vpop.f32.mrf.mxu1  ;;  %v2521_v32 = vrot.slane %v2513_v2, %v7540_v50  ;;  %v2528_v57 = vrot.slane %v2514_v20, %v7540_v50 }
 0x734   :  { %v2464_v53 = vpop.f32.mrf.mxu0 }
 0x735   :  { %v6602_v30 = vpop.f32.mrf.mxu1 }
 0x736   :  { %v6608_v46 = vpop.f32.mrf.mxu0 }
 0x737   :  { %v2507_v48 = vpop.f32.mrf.mxu1 }
 0x738   :  { %v2529_v16 = vcombine.low %v2415_v15, %v2507_v48  ;;  %v2530_v43 = vcombine.high %v2415_v15, %v2507_v48 }
 0x739   :  { %v6613_v42 = vpop.f32.mrf.mxu1 }
 0x73a   :  { %v2537_v44 = vrot.slane %v2529_v16, %v7540_v50  ;;  %v2544_v33 = vrot.slane %v2530_v43, %v7540_v50 }
 0x73b   :  { %v2510_v60 = vpop.f32.mrf.mxu1 }
 0x73c   :  { %v2545_v13 = vcombine.low %v2521_v32, %v2537_v44  ;;  %v2546_v26 = vcombine.high %v2521_v32, %v2537_v44  ;;  %v2561_v63 = vcombine.low %v2528_v57, %v2544_v33  ;;  %v2562_v11 = vcombine.high %v2528_v57, %v2544_v33 }
 0x73d   :  { %v6614_v19 = vpop.f32.mrf.mxu1  ;;  %v2778_v60 = vunpack.c.h.bf16 %v7026_v7 }
 0x73e   :  { %v2553_v40 = vrot.slane %v2545_v13, %v7543_v51  ;;  %v2560_v24 = vrot.slane %v2546_v26, %v7543_v51  ;;  %v2569_v6 = vrot.slane %v2561_v63, %v7543_v51  ;;  %v2576_v28 = vrot.slane %v2562_v11, %v7543_v51  ;;  %v6867_v19 = vld [vmem:[#allocation14 + $0x70] ss:$8 sps:$4 sm:$0xff]  }
 0x740   :  { %v2581_v47 = vcombine.low %v2553_v40, %v2560_v24  ;;  %v6255_v41 = vcombine.high %v2553_v40, %v2560_v24  ;;  %v2597_v8 = vcombine.low %v2569_v6, %v2576_v28  ;;  %v6256_v49 = vcombine.high %v2569_v6, %v2576_v28  ;;  %v6869_v40 = vld [vmem:[#allocation14 + $0x74] ss:$8 sps:$4 sm:$0xff]   ;;  %v6872_v24 = vld [vmem:[#allocation14 + $0x64] ss:$8 sps:$4 sm:$0xff]   ;;  %v6870_v6 = vld [vmem:[#allocation14 + $0x60] ss:$8 sps:$4 sm:$0xff]  }
 0x741   :  { %3056 = vmatprep.subr.bf16.mxu0 %v6869_v40  ;;  %v6875_v28 = vld [vmem:[#allocation14 + $0x54] ss:$8 sps:$4 sm:$0xff]  }
 0x742   :  { %v2588_v4 = vrot.slane %v2581_v47, %v7540_v50  ;;  %v2596_v45 = vrot.slane %v6255_v41, %v7540_v50  ;;  %v2604_v56 = vrot.slane %v2597_v8, %v7540_v50  ;;  %v2612_v55 = vrot.slane %v6256_v49, %v7540_v50  ;;  %v6873_v47 = vld [vmem:[#allocation14 + $0x50] ss:$8 sps:$4 sm:$0xff]   ;;  %v6878_v41 = vld [vmem:[#allocation14 + $0x44] ss:$8 sps:$4 sm:$0xff]   ;;  %v6876_v49 = vld [vmem:[#allocation14 + $0x40] ss:$8 sps:$4 sm:$0xff]  }
 0x743   :  { %v6892_v8 = vld [vmem:[#allocation13 + $0x38] sm:$0xff]  }
 0x744   :  { %v2614_v36 = vcombine.high %v2588_v4, %v2596_v45  ;;  %v2630_v12 = vcombine.high %v2604_v56, %v2612_v55  ;;  %v2613_v52 = vcombine.low %v2588_v4, %v2596_v45  ;;  %v2629_v18 = vcombine.low %v2604_v56, %v2612_v55  ;;  %6636 = vmatpush3.bf16.msra.mxu1 %v6892_v8  ;;  %v6879_v4 = vld [vmem:[#allocation14 + $0x30] ss:$8 sps:$4 sm:$0xff]   ;;  %v6884_v45 = vld [vmem:[#allocation14 + $0x24] ss:$8 sps:$4 sm:$0xff]   ;;  %v6882_v56 = vld [vmem:[#allocation14 + $0x20] ss:$8 sps:$4 sm:$0xff]  }
 0x745   :  { %6637 = vmatprep.subr.bf16.mxu1 %v8631_v54  ;;  %v6887_v55 = vld [vmem:[#allocation14 + $0x14] ss:$8 sps:$4 sm:$0xff]  }
 0x746   :  { %v2628_v14 = vrot.slane %v2614_v36, %v7543_v51  ;;  %v2644_v3 = vrot.slane %v2630_v12, %v7543_v51  ;;  %v2621_v38 = vrot.slane %v2613_v52, %v7543_v51  ;;  %v2637_v29 = vrot.slane %v2629_v18, %v7543_v51  ;;  %v6885_v36 = vld [vmem:[#allocation14 + $0x10] ss:$8 sps:$4 sm:$0xff]   ;;  %v6890_v12 = vld [vmem:[#allocation14 + $0x4] ss:$8 sps:$4 sm:$0xff]   ;;  %v6888_v52 = vld [vmem:[#allocation14] ss:$8 sps:$4 sm:$0xff]  }
 0x747   :  { %v6891_v18 = vld [vmem:[#allocation5] sm:$0xff]  }
 0x748   :  { %v2647_v35 = vcombine.low %v2628_v14, %v2644_v3  ;;  %v2646_v58 = vcombine.high %v2621_v38, %v2637_v29  ;;  %v2645_v9 = vcombine.low %v2621_v38, %v2637_v29  ;;  %v2648_v37 = vcombine.high %v2628_v14, %v2644_v3 }
 0x74a   :  { %v6801_v23 = vpack.i.bf16 %v2647_v35, %v1570_v17  ;;  %v6796_v15 = vpack.i.bf16 %v2646_v58, %v1569_v25  ;;  %v6806_v39 = vpack.i.bf16 %v2648_v37, %v1571_v5  ;;  %v6895_v37 = vld [vmem:[#allocation13 + $0x20] sm:$0xff]  }
 0x74c   :  { %6802 = vrot.lane.b32.xlu1 %v6801_v23, %s8628_s29  ;;  %6797 = vrot.lane.b32.xlu0 %v6796_v15, %s7300_s18  ;;  %v6893_v23 = vld [vmem:[#allocation13 + $0x30] sm:$0xff]   ;;  %v6894_v15 = vld [vmem:[#allocation13 + $0x28] sm:$0xff]  }
 0x74d   :  { %6638 = vmatpush3.bf16.msra.mxu1 %v6893_v23 }
 0x74e   :  { %6639 = vmatprep.subr.bf16.mxu1 %v8631_v54 }
 0x750   :  { %6807 = vrot.lane.b32.xlu1 %v6806_v39, %s7301_s30  ;;  %v6896_v39 = vld [vmem:[#allocation13 + $0x18] sm:$0xff]  }
 0x751   :  { %6640 = vmatpush3.bf16.msra.mxu1 %v6894_v15 }
 0x752   :  { %6641 = vmatprep.subr.bf16.mxu1 %v8631_v54 }
 0x755   :  { %6642 = vmatpush3.bf16.msra.mxu1 %v6895_v37 }
 0x756   :  { %6643 = vmatprep.subr.bf16.mxu1 %v8631_v54 }
 0x759   :  { %6644 = vmatpush3.bf16.msra.mxu1 %v6896_v39 }
 0x75a   :  { %6645 = vmatprep.subr.bf16.mxu1 %v8631_v54 }
 0x7be   :  { %v6803_v1 = vpop.permute.xlu1 %6802  ;;  %v6798_v61 = vpop.permute.xlu0 %6797 }
 0x7bf   :  { %v6800_v53 = vunpack.i.h.bf16 %v6798_v61  ;;  %v6799_v30 = vunpack.i.l.bf16 %v6798_v61  ;;  %v6805_v17 = vunpack.i.h.bf16 %v6803_v1  ;;  %v6804_v2 = vunpack.i.l.bf16 %v6803_v1  ;;  %v6897_v1 = vld [vmem:[#allocation13 + $0x10] sm:$0xff]   ;;  %v6898_v61 = vld [vmem:[#allocation13 + $0x8] sm:$0xff]  }
 0x7c0   :  { %6646 = vmatpush3.bf16.msra.mxu1 %v6897_v1 }
 0x7c1   :  { %v1584_v25 = vsel %vm1008_vm1, %v1568_v21, %v6799_v30  ;;  %v2661_v20 = vsel %vm1008_vm1, %v2645_v9, %v6800_v53  ;;  %v2777_v21 = vunpack.c.l.bf16 %v7026_v7  ;;  %6647 = vmatprep.subr.bf16.mxu1 %v8631_v54  ;;  %v6899_v53 = vld [vmem:[#allocation13] sm:$0xff]   ;;  %v8067_v30 = vld [vmem:[%s8597_s13] sm:$0x3] }
 0x7c2   :  { %v6808_v46 = vpop.permute.xlu1 %6807  ;;  %v1586_v5 = vsel %vm1585_vm4, %v1584_v25, %v6804_v2  ;;  %v2662_v48 = vsel %vm1585_vm4, %v2661_v20, %v6805_v17  ;;  %v8071_v17 = vrot.slane %v8067_v30, %v7509_v27 }
 0x7c3   :  { %v6810_v34 = vunpack.i.h.bf16 %v6808_v46  ;;  %v6809_v59 = vunpack.i.l.bf16 %v6808_v46 }
 0x7c4   :  { %6648 = vmatpush3.bf16.msra.mxu1 %v6898_v61 }
 0x7c5   :  { %v1588_v16 = vsel %vm1587_vm5, %v1586_v5, %v6809_v59  ;;  %v2663_v43 = vsel %vm1587_vm5, %v2662_v48, %v6810_v34  ;;  %6649 = vmatprep.subr.bf16.mxu1 %v8631_v54 }
 0x7c6   :  { %v2664_v42 = vpack.c.bf16 %v2663_v43, %v1588_v16 }
 0x7c8   :  { %6632 = vmatmul.mubr.bf16.vlgmr.msra.gmra.mxu0 %v2664_v42  ;;  %6650 = vmatpush3.bf16.msra.mxu1 %v6899_v53 }
 0x7c9   :  { %3088 = vmatprep.mubr.bf16.mxu0 %v7298_v0  ;;  %3057 = vmatpush1.bf16.msra.mxu0 %v6867_v19  ;;  %v8096_v19 = vpack.i.b16 %v7298_v0, %v7298_v0 }
 0x7ca   :  { %3058 = vmatprep.subr.bf16.mxu0 %v6872_v24  ;;  %6655 = vmatprep.subr.bf16.mxu1 %v8631_v54 }
 0x7cd   :  { %3059 = vmatpush1.bf16.msra.mxu0 %v6870_v6 }
 0x7ce   :  { %3060 = vmatprep.subr.bf16.mxu0 %v6875_v28 }
 0x7d1   :  { %3061 = vmatpush1.bf16.msra.mxu0 %v6873_v47 }
 0x7d2   :  { %3062 = vmatprep.subr.bf16.mxu0 %v6878_v41 }
 0x7d5   :  { %3063 = vmatpush1.bf16.msra.mxu0 %v6876_v49 }
 0x7d6   :  { %3064 = vmatprep.subr.bf16.mxu0 %v6881_v62 }
 0x7d9   :  { %3065 = vmatpush1.bf16.msra.mxu0 %v6879_v4 }
 0x7da   :  { %3066 = vmatprep.subr.bf16.mxu0 %v6884_v45 }
 0x7dd   :  { %3067 = vmatpush1.bf16.msra.mxu0 %v6882_v56 }
 0x7de   :  { %3068 = vmatprep.subr.bf16.mxu0 %v6887_v55 }
 0x7e1   :  { %3069 = vmatpush1.bf16.msra.mxu0 %v6885_v36 }
 0x7e2   :  { %3070 = vmatprep.subr.bf16.mxu0 %v6890_v12 }
 0x7e5   :  { %3071 = vmatpush1.bf16.msra.mxu0 %v6888_v52 }
 0x7e6   :  { %6685 = vmatprep.subr.bf16.mxu0 %v8631_v54 }
 0x7e8   :  { %3089 = vmatmul.mubr.bf16.vlgmr.msra.gmra.mxu0 %v6891_v18 }
 0x7e9   :  { %3098 = vmatprep.mubr.bf16.mxu0 %v7298_v0 }
 0x888   :  { %v2770_v32 = vpop.f32.mrf.mxu0 }
 0x889   :  { %v2771_v57 = vadd.f32 %v6257_v31, %v2770_v32  ;;  %v6266_v32 = vld [vmem:[%s8635_s8] ss:$0 sm:$0xff] }
 0x88a   :  { %v6633_v44 = vpop.f32.mrf.mxu0 }
 0x88b   :  { %v2779_v33 = vadd.f32 %v2777_v21, %v2771_v57 }
 0x88c   :  { %v2773_v13 = vpop.f32.mrf.mxu0 }
 0x88d   :  { %v2774_v26 = vadd.f32 %v6257_v31, %v2773_v13  ;;  %2781 = vadd.xlane.f32.xlu0 %v2779_v33 }
 0x88e   :  { %v6634_v63 = vpop.f32.mrf.mxu0 }
 0x88f   :  { %v2780_v11 = vadd.f32 %v2778_v60, %v2774_v26  ;;  %v6267_v60 = vld [vmem:[%s8593_s9] ss:$0 sm:$0xff] }
 0x891   :  { %2783 = vadd.xlane.f32.xlu1 %v2780_v11 }
 0x8a8   :  { %v3090_v2 = vpop.f32.mrf.mxu0 }
 0x8a9   :  { %v3091_v20 = vadd.f32 %v3090_v2, %v8071_v17 }
 0x8aa   :  { %v8073_v25 = vpop.f32.mrf.mxu0 }
 0x8ac   :  { %v3094_v46 = vpop.f32.mrf.mxu0 }
 0x8ad   :  { %v3095_v34 = vadd.f32 %v3094_v46, %v8071_v17 }
 0x8af   :  { %v3109_v59 = vpack.c.bf16 %v3095_v34, %v3091_v20 }
 0x8b1   :  { %3282 = vrot.lane.b32.xlu1 %v3109_v59, %s7301_s30  ;;  %v3292_v40 = vshrl.u32 %v3109_v59, 16 }
 0x8b5   :  { %3286 = vrot.lane.b32.xlu1 %v3109_v59, %s7300_s18 }
 0x916   :  { %v2782_v14 = vpop.xlane.xlu0 %2781 }
 0x917   :  { %v2786_v3 = vmul.f32 0.0078125, %v2782_v14 }
 0x919   :  { %v2788_v38 = vsub.f32 %v2779_v33, %v2786_v3 }
 0x91a   :  { %v2784_v29 = vpop.xlane.xlu1 %2783 }
 0x91b   :  { %v2787_v10 = vmul.f32 0.0078125, %v2784_v29  ;;  %v2790_v35 = vmul.f32 %v2788_v38, %v2788_v38 }
 0x91d   :  { %v2789_v58 = vsub.f32 %v2780_v11, %v2787_v10  ;;  %2792 = vadd.xlane.f32.xlu0 %v2790_v35 }
 0x91f   :  { %v2791_v9 = vmul.f32 %v2789_v58, %v2789_v58 }
 0x921   :  { %2794 = vadd.xlane.f32.xlu0 %v2791_v9 }
 0x923   :  { %v3283_v24 = vpop.permute.xlu1 %3282 }
 0x924   :  { %v3290_v6 = vpack.i.b16 %v3283_v24, %v3109_v59  ;;  %v3293_v28 = vshrl.u32 %v3283_v24, 16 }
 0x926   :  { %v3294_v41 = vpack.i.b16 %v3293_v28, %v3292_v40  ;;  %v3310_v8 = vcombine.high %v3290_v6, %v8096_v19  ;;  %v3317_v4 = vrot.slane %v3290_v6, %v7540_v50 }
 0x927   :  { %v3287_v62 = vpop.permute.xlu1 %3286 }
 0x928   :  { %v3376_v56 = vcombine.high %v3294_v41, %v8096_v19  ;;  %v3301_v55 = vshrl.u32 %v3287_v62, 16  ;;  %v3324_v36 = vrot.slane %v3310_v8, %v7540_v50  ;;  %v3383_v18 = vrot.slane %v3294_v41, %v7540_v50 }
 0x92a   :  { %v3390_v10 = vrot.slane %v3376_v56, %v7540_v50 }
 0x937   :  { %3284 = vrot.lane.b32.xlu0 %v3109_v59, %s8628_s29 }
 0x9a6   :  { %v2793_v5 = vpop.xlane.xlu0 %2792 }
 0x9a7   :  { %v2796_v48 = vmul.f32 0.0078125, %v2793_v5 }
 0x9a9   :  { %v2799_v16 = vadd.f32 1e-12, %v2796_v48 }
 0x9aa   :  { %v2795_v43 = vpop.xlane.xlu0 %2794 }
 0x9ab   :  { %6982 = vrsqrt.f32 %v2799_v16  ;;  %v2797_v42 = vmul.f32 0.0078125, %v2795_v43 }
 0x9ad   :  { %v2800_v31 = vadd.f32 1e-12, %v2797_v42 }
 0x9ae   :  { %v3285_v47 = vpop.permute.xlu0 %3284 }
 0x9af   :  { %6984 = vrsqrt.f32 %v2800_v31  ;;  %v3300_v49 = vshrl.u32 %v3285_v47, 16  ;;  %v3298_v45 = vpack.i.b16 %v3287_v62, %v3285_v47 }
 0x9b1   :  { %v3325_v12 = vcombine.high %v3298_v45, %v8096_v19  ;;  %v3332_v52 = vrot.slane %v3298_v45, %v7540_v50  ;;  %v3302_v14 = vpack.i.b16 %v3301_v55, %v3300_v49 }
 0x9b3   :  { %v3339_v3 = vrot.slane %v3325_v12, %v7540_v50  ;;  %v3341_v29 = vcombine.high %v3317_v4, %v3332_v52  ;;  %v3391_v35 = vcombine.high %v3302_v14, %v8096_v19 }
 0x9b5   :  { %v3356_v23 = vcombine.low %v3324_v36, %v3339_v3  ;;  %v3357_v15 = vcombine.high %v3324_v36, %v3339_v3  ;;  %v3355_v37 = vrot.slane %v3341_v29, %v7543_v51  ;;  %v3405_v39 = vrot.slane %v3391_v35, %v7540_v50 }
 0x9b7   :  { %v3422_v53 = vcombine.low %v3390_v10, %v3405_v39  ;;  %v3423_v2 = vcombine.high %v3390_v10, %v3405_v39  ;;  %v3364_v20 = vrot.slane %v3356_v23, %v7543_v51  ;;  %v3371_v46 = vrot.slane %v3357_v15, %v7543_v51  ;;  %v6268_v23 = vld [vmem:[%s8595_s11] ss:$0 sm:$0xff] }
 0x9b8   :  { %v6983_v7 = vpop.eup %6982 }
 0x9b9   :  { %v2803_v21 = vmul.f32 %v6983_v7, %v2788_v38  ;;  %v3340_v38 = vcombine.low %v3317_v4, %v3332_v52  ;;  %v3430_v5 = vrot.slane %v3422_v53, %v7543_v51  ;;  %v3437_v48 = vrot.slane %v3423_v2, %v7543_v51 }
 0x9ba   :  { %v3458_v42 = vcombine.low %v3364_v20, %v3371_v46  ;;  %v6296_v31 = vcombine.high %v3364_v20, %v3371_v46 }
 0x9bb   :  { %v2811_v33 = vmul.f32 %v6266_v32, %v2803_v21  ;;  %v3348_v9 = vrot.slane %v3340_v38, %v7543_v51 }
 0x9bc   :  { %v6985_v57 = vpop.eup %6984 }
 0x9bd   :  { %v2804_v44 = vmul.f32 %v6985_v57, %v2789_v58  ;;  %v8086_v26 = vadd.f32 %v6267_v60, %v2811_v33  ;;  %v3398_v58 = vrot.slane %v3302_v14, %v7540_v50  ;;  %v3442_v16 = vcombine.low %v3348_v9, %v3355_v37 }
 0x9be   :  { %v6295_v43 = vcombine.high %v3348_v9, %v3355_v37  ;;  %v6298_v33 = vcombine.high %v3430_v5, %v3437_v48 }
 0x9bf   :  { %v2812_v13 = vmul.f32 %v6266_v32, %v2804_v44  ;;  %v3406_v1 = vcombine.low %v3383_v18, %v3398_v58  ;;  %v3407_v61 = vcombine.high %v3383_v18, %v3398_v58  ;;  %v3449_v32 = vrot.slane %v3442_v16, %v7540_v50 }
 0x9c0   :  { %v3457_v57 = vrot.slane %v6295_v43, %v7540_v50  ;;  %v3508_v44 = vcombine.low %v3430_v5, %v3437_v48  ;;  %v3523_v28 = vrot.slane %v6298_v33, %v7540_v50 }
 0x9c1   :  { %v8088_v63 = vadd.f32 %v6267_v60, %v2812_v13  ;;  %v3414_v34 = vrot.slane %v3406_v1, %v7543_v51  ;;  %v3421_v59 = vrot.slane %v3407_v61, %v7543_v51  ;;  %v3465_v60 = vrot.slane %v3458_v42, %v7540_v50 }
 0x9c2   :  { %v3473_v13 = vrot.slane %v6296_v31, %v7540_v50  ;;  %v3474_v24 = vcombine.low %v3449_v32, %v3457_v57  ;;  %v3515_v6 = vrot.slane %v3508_v44, %v7540_v50 }
 0x9c3   :  { %v2822_v11 = vpack.c.bf16 %v8088_v63, %v8086_v26  ;;  %v3492_v7 = vcombine.low %v3414_v34, %v3421_v59  ;;  %v6297_v21 = vcombine.high %v3414_v34, %v3421_v59 }
 0x9c4   :  { %v3482_v47 = vcombine.low %v3465_v60, %v3473_v13  ;;  %v3481_v8 = vrot.slane %v3474_v24, %v7543_v51  ;;  %v3532_v49 = vcombine.low %v3515_v6, %v3523_v28 }
 0x9c5   :  { %6652 = vmatmul.mubr.bf16.vlgmr.msra.gmra.mxu1 %v2822_v11  ;;  %v3499_v11 = vrot.slane %v3492_v7, %v7540_v50  ;;  %v3507_v40 = vrot.slane %v6297_v21, %v7540_v50 }
 0x9c6   :  { %6657 = vmatprep.mubr.msk.bf16.mxu1 %vm7302_vm0, %v8631_v54  ;;  %v3489_v62 = vrot.slane %v3482_v47, %v7543_v51  ;;  %v3539_v45 = vrot.slane %v3532_v49, %v7543_v51 }
 0x9c7   :  { %v3524_v41 = vcombine.low %v3499_v11, %v3507_v40 }
 0x9c8   :  { %v3490_v56 = vcombine.low %v3481_v8, %v3489_v62  ;;  %v8130_v55 = vcombine.high %v3481_v8, %v3489_v62 }
 0x9c9   :  { %v3531_v4 = vrot.slane %v3524_v41, %v7543_v51 }
 0x9ca   :  { %v3545_v52 = vshrl.u32 %v3490_v56, 16  ;;  %v3551_v18 = vshrl.u32 %v8130_v55, 16 }
 0x9cb   :  { %v3540_v36 = vcombine.low %v3531_v4, %v3539_v45  ;;  %v8132_v12 = vcombine.high %v3531_v4, %v3539_v45 }
 0x9cd   :  { %v3544_v14 = vpack.i.b16 %v3540_v36, %v3490_v56  ;;  %v3546_v3 = vshrl.u32 %v3540_v36, 16  ;;  %v3550_v38 = vpack.i.b16 %v8132_v12, %v8130_v55  ;;  %v3552_v29 = vshrl.u32 %v8132_v12, 16 }
 0x9cf   :  { %v3829_v10 = vsel %vm1008_vm1, %v3544_v14, 0  ;;  %v8139_v35 = vpack.i.b16 %v3546_v3, %v3545_v52  ;;  %v8141_v58 = vpack.i.b16 %v3552_v29, %v3551_v18 }
 0x9d0   :  { %6656 = vmatpush3.bf16.xpose.msra.mxu1 %v3829_v10 }
 0x9d1   :  { %6661 = vmatprep.subr.bf16.mxu1 %v8631_v54 }
 0xa85   :  { %v2928_v9 = vpop.f32.mrf.mxu1 }
 0xa86   :  { %v2929_v39 = vadd.f32 %v6268_v23, %v2928_v9 }
 0xa87   :  { %v6653_v15 = vpop.f32.mrf.mxu1 }
 0xa89   :  { %v2931_v37 = vpop.f32.mrf.mxu1 }
 0xa8a   :  { %v2932_v1 = vadd.f32 %v6268_v23, %v2931_v37 }
 0xa8b   :  { %v6654_v61 = vpop.f32.mrf.mxu1 }
 0xa8c   :  { %v2935_v53 = vpack.c.bf16 %v2932_v1, %v2929_v39 }
 0xa8e   :  { %3116 = vrot.lane.b32.xlu0 %v2935_v53, %s8628_s29  ;;  %3114 = vrot.lane.b32.xlu1 %v2935_v53, %s7301_s30  ;;  %v4390_v2 = vrot.slane %v2935_v53, 4  ;;  %v3126_v34 = vrot.slane %v2935_v53, %v7540_v50 }
 0xa90   :  { %v4401_v48 = vrot.slane %v4390_v2, %v7540_v50 }
 0xa92   :  { %3118 = vrot.lane.b32.xlu1 %v2935_v53, %s7300_s18 }
 0xb00   :  { %v3117_v20 = vpop.permute.xlu0 %3116  ;;  %v3115_v46 = vpop.permute.xlu1 %3114 }
 0xb01   :  { %v3134_v59 = vrot.slane %v3117_v20, %v7540_v50  ;;  %v4392_v5 = vrot.slane %v3117_v20, 4  ;;  %v4391_v31 = vrot.slane %v3115_v46, 4  ;;  %v3160_v33 = vrot.slane %v3115_v46, %v7540_v50 }
 0xb03   :  { %v3135_v16 = vcombine.low %v3126_v34, %v3134_v59  ;;  %v3136_v43 = vcombine.high %v3126_v34, %v3134_v59  ;;  %v4409_v42 = vrot.slane %v4392_v5, %v7540_v50  ;;  %v4435_v8 = vrot.slane %v4391_v31, %v7540_v50 }
 0xb04   :  { %v3119_v7 = vpop.permute.xlu1 %3118 }
 0xb05   :  { %v3143_v21 = vrot.slane %v3135_v16, %v7543_v51  ;;  %v3150_v32 = vrot.slane %v3136_v43, %v7543_v51  ;;  %v4410_v57 = vcombine.low %v4401_v48, %v4409_v42  ;;  %v4411_v44 = vcombine.high %v4401_v48, %v4409_v42 }
 0xb06   :  { %v3168_v60 = vrot.slane %v3119_v7, %v7540_v50  ;;  %v4393_v13 = vrot.slane %v3119_v7, 4 }
 0xb07   :  { %v3151_v11 = vcombine.high %v3143_v21, %v7298_v0  ;;  %v3152_v40 = vcombine.high %v3150_v32, %v7298_v0  ;;  %v4418_v24 = vrot.slane %v4410_v57, %v7543_v51  ;;  %v4425_v6 = vrot.slane %v4411_v44, %v7543_v51 }
 0xb08   :  { %v3169_v28 = vcombine.low %v3160_v33, %v3168_v60  ;;  %v3170_v47 = vcombine.high %v3160_v33, %v3168_v60  ;;  %v3191_v41 = vshrl.u32 %v3143_v21, 16  ;;  %v4443_v49 = vrot.slane %v4393_v13, %v7540_v50 }
 0xb09   :  { %v3199_v62 = vshrl.u32 %v3151_v11, 16  ;;  %v3207_v4 = vshrl.u32 %v3150_v32, 16  ;;  %v3215_v45 = vshrl.u32 %v3152_v40, 16  ;;  %v4426_v56 = vcombine.high %v4418_v24, %v7298_v0 }
 0xb0a   :  { %v3177_v36 = vrot.slane %v3169_v28, %v7543_v51  ;;  %v3184_v52 = vrot.slane %v3170_v47, %v7543_v51  ;;  %v4444_v18 = vcombine.low %v4435_v8, %v4443_v49  ;;  %v4445_v14 = vcombine.high %v4435_v8, %v4443_v49 }
 0xb0b   :  { %v4427_v3 = vcombine.high %v4425_v6, %v7298_v0  ;;  %v4466_v29 = vshrl.u32 %v4418_v24, 16  ;;  %v4474_v10 = vshrl.u32 %v4426_v56, 16  ;;  %v4482_v9 = vshrl.u32 %v4425_v6, 16 }
 0xb0c   :  { %v3185_v23 = vcombine.high %v3177_v36, %v7298_v0  ;;  %v3186_v15 = vcombine.high %v3184_v52, %v7298_v0  ;;  %v3189_v37 = vpack.i.b16 %v3177_v36, %v3143_v21  ;;  %v3192_v39 = vshrl.u32 %v3177_v36, 16 }
 0xb0d   :  { %v3205_v1 = vpack.i.b16 %v3184_v52, %v3150_v32  ;;  %v3208_v61 = vshrl.u32 %v3184_v52, 16  ;;  %v4452_v53 = vrot.slane %v4444_v18, %v7543_v51  ;;  %v4459_v2 = vrot.slane %v4445_v14, %v7543_v51 }
 0xb0e   :  { %v3193_v20 = vpack.i.b16 %v3192_v39, %v3191_v41  ;;  %v3197_v46 = vpack.i.b16 %v3185_v23, %v3151_v11  ;;  %v3200_v34 = vshrl.u32 %v3185_v23, 16  ;;  %v3213_v59 = vpack.i.b16 %v3186_v15, %v3152_v40 }
 0xb0f   :  { %v3209_v5 = vpack.i.b16 %v3208_v61, %v3207_v4  ;;  %v3216_v48 = vshrl.u32 %v3186_v15, 16  ;;  %v3219_v16 = vcombine.low %v3189_v37, %v3205_v1  ;;  %v4460_v43 = vcombine.high %v4452_v53, %v7298_v0 }
 0xb10   :  { %v3201_v42 = vpack.i.b16 %v3200_v34, %v3199_v62  ;;  %v3227_v31 = vcombine.low %v3197_v46, %v3213_v59  ;;  %v4461_v7 = vcombine.high %v4459_v2, %v7298_v0  ;;  %v4464_v21 = vpack.i.b16 %v4452_v53, %v4418_v24 }
 0xb11   :  { %v4490_v32 = vshrl.u32 %v4427_v3, 16  ;;  %v3217_v57 = vpack.i.b16 %v3216_v48, %v3215_v45  ;;  %v3244_v44 = vcombine.low %v3193_v20, %v3209_v5  ;;  %v4467_v33 = vshrl.u32 %v4452_v53, 16 }
 0xb12   :  { %v3234_v60 = vrot.slane %v3227_v31, %v7540_v50  ;;  %v4472_v13 = vpack.i.b16 %v4460_v43, %v4426_v56  ;;  %v4475_v11 = vshrl.u32 %v4460_v43, 16  ;;  %v4480_v28 = vpack.i.b16 %v4459_v2, %v4425_v6 }
 0xb13   :  { %v3226_v40 = vrot.slane %v3219_v16, %v7540_v50  ;;  %v3252_v47 = vcombine.low %v3201_v42, %v3217_v57  ;;  %v4468_v41 = vpack.i.b16 %v4467_v33, %v4466_v29  ;;  %v4483_v8 = vshrl.u32 %v4459_v2, 16 }
 0xb14   :  { %v3251_v49 = vrot.slane %v3244_v44, %v7540_v50  ;;  %v4476_v62 = vpack.i.b16 %v4475_v11, %v4474_v10  ;;  %v4488_v4 = vpack.i.b16 %v4461_v7, %v4427_v3  ;;  %v4491_v36 = vshrl.u32 %v4461_v7, 16 }
 0xb15   :  { %v3235_v24 = vcombine.low %v3226_v40, %v3234_v60  ;;  %v3259_v45 = vrot.slane %v3252_v47, %v7540_v50  ;;  %v4484_v52 = vpack.i.b16 %v4483_v8, %v4482_v9  ;;  %v4494_v18 = vcombine.low %v4464_v21, %v4480_v28  ;;  %v6900_v28 = vld [vmem:[#allocation5 + $0x8] sm:$0xff]   ;;  %v4013_v40 = vld [vmem:[#allocation8] sm:$0xff] }
 0xb16   :  { %v4492_v14 = vpack.i.b16 %v4491_v36, %v4490_v32  ;;  %v4502_v23 = vcombine.low %v4472_v13, %v4488_v4  ;;  %v3875_v20 = vsel %vm1008_vm1, %v8139_v35, 0  ;;  %v3921_v44 = vsel %vm1008_vm1, %v3550_v38, 0  ;;  %3099 = vmatmul.mubr.bf16.gmra.mxu0 %v6900_v28 }
 0xb17   :  { %v3260_v56 = vcombine.low %v3251_v49, %v3259_v45  ;;  %v4519_v15 = vcombine.low %v4468_v41, %v4484_v52  ;;  %v4501_v6 = vrot.slane %v4494_v18, %v7540_v50  ;;  %v3242_v39 = vrot.slane %v3235_v24, %v7543_v51  ;;  %6687 = vmatprep.mubr.msk.bf16.mxu0 %vm7302_vm0, %v8631_v54 }
 0xb18   :  { %v4509_v37 = vrot.slane %v4502_v23, %v7540_v50  ;;  %v4527_v29 = vcombine.low %v4476_v62, %v4492_v14  ;;  %v3967_v11 = vsel %vm1008_vm1, %v8141_v58, 0 }
 0xb19   :  { %v3267_v10 = vrot.slane %v3260_v56, %v7543_v51  ;;  %v4526_v1 = vrot.slane %v4519_v15, %v7540_v50  ;;  %v3272_v43 = vshrl.u32 %v3242_v39, 16  ;;  %v3243_v60 = vcombine.high %v3242_v39, %v7298_v0 }
 0xb1a   :  { %v4510_v3 = vcombine.low %v4501_v6, %v4509_v37  ;;  %v4534_v61 = vrot.slane %v4527_v29, %v7540_v50 }
 0xb1b   :  { %v3271_v9 = vpack.i.b16 %v3267_v10, %v3242_v39  ;;  %v3273_v59 = vshrl.u32 %v3267_v10, 16  ;;  %v3268_v33 = vcombine.high %v3267_v10, %v7298_v0  ;;  %v3278_v12 = vshrl.u32 %v3243_v60, 16 }
 0xb1c   :  { %v8185_v53 = vrot.slane %v4510_v3, %v7543_v51  ;;  %v4535_v2 = vcombine.low %v4526_v1, %v4534_v61  ;;  %v8241_v39 = vrot.slane %v8067_v30, %v7501_v22  ;;  %v3096_v3 = vpop.f32.mrf.mxu0 }
 0xb1d   :  { %6658 = vmatmul.mubr.msk.bf16.vlgmr.msra.gmra.mxu1 %vm1008_vm1, %v3271_v9  ;;  %v3274_v32 = vpack.i.b16 %v3273_v59, %v3272_v43  ;;  %v3277_v13 = vpack.i.b16 %v3268_v33, %v3243_v60  ;;  %v3279_v55 = vshrl.u32 %v3268_v33, 16 }
 0xb1e   :  { %6662 = vmatpush3.bf16.xpose.msra.mxu1 %v3875_v20  ;;  %6663 = vmatprep.mubr.msk.bf16.mxu1 %vm7302_vm0, %v8631_v54  ;;  %v8193_v46 = vrot.slane %v4535_v2, %v7543_v51  ;;  %v8197_v34 = vcombine.high %v8185_v53, %v7298_v0  ;;  %v4547_v48 = vshrl.u32 %v8185_v53, 16  ;;  %v3093_v9 = vadd.f32 %v8073_v25, %v8241_v39 }
 0xb1f   :  { %6667 = vmatprep.subr.bf16.mxu1 %v8631_v54  ;;  %v3280_v38 = vpack.i.b16 %v3279_v55, %v3278_v12  ;;  %v3097_v2 = vadd.f32 %v3096_v3, %v8241_v39 }
 0xb20   :  { %v4546_v5 = vpack.i.b16 %v8193_v46, %v8185_v53  ;;  %v4548_v35 = vshrl.u32 %v8193_v46, 16  ;;  %v8206_v16 = vcombine.high %v8193_v46, %v7298_v0  ;;  %v4553_v7 = vshrl.u32 %v8197_v34, 16 }
 0xb21   :  { %v3110_v43 = vpack.c.bf16 %v3097_v2, %v3093_v9 }
 0xb22   :  { %v8208_v42 = vpack.i.b16 %v4548_v35, %v4547_v48  ;;  %v4552_v31 = vpack.i.b16 %v8206_v16, %v8197_v34  ;;  %v4554_v21 = vshrl.u32 %v8206_v16, 16 }
 0xb24   :  { %v8214_v57 = vpack.i.b16 %v4554_v21, %v4553_v7 }
 0xb25   :  { %6664 = vmatmul.mubr.msk.bf16.vlgmr.msra.gmra.mxu1 %vm1008_vm1, %v3274_v32 }
 0xb26   :  { %6668 = vmatpush3.bf16.xpose.msra.mxu1 %v3921_v44  ;;  %6669 = vmatprep.mubr.msk.bf16.mxu1 %vm7302_vm0, %v8631_v54 }
 0xb27   :  { %6673 = vmatprep.subr.bf16.mxu1 %v8631_v54 }
 0xb2d   :  { %6670 = vmatmul.mubr.msk.bf16.vlgmr.msra.gmra.mxu1 %vm1008_vm1, %v3277_v13 }
 0xb2e   :  { %6674 = vmatpush3.bf16.xpose.msra.mxu1 %v3967_v11  ;;  %6675 = vmatprep.mubr.msk.bf16.mxu1 %vm7302_vm0, %v8631_v54 }
 0xb2f   :  { %6679 = vmatprep.subr.bf16.mxu1 %v8631_v54 }
 0xb35   :  { %6676 = vmatmul.mubr.msk.bf16.vlgmr.msra.gmra.mxu1 %vm1008_vm1, %v3280_v38 }
 0xb36   :  { %6681 = vmatprep.mubr.msk.bf16.mxu1 %vm7302_vm0, %v8631_v54 }
 0xbdd   :  { %v3865_v58 = vpop.f32.mrf.mxu1 }
 0xbde   :  { %v4009_v47 = vmul.f32 0.17677669, %v3865_v58 }
 0xbdf   :  { %v6659_v41 = vpop.f32.mrf.mxu1 }
 0xbe0   :  { %v4014_v8 = vadd.f32 %v4013_v40, %v4009_v47 }
 0xbe1   :  { %v3868_v49 = vpop.f32.mrf.mxu1 }
 0xbe2   :  { %v4019_v62 = vsel %vm4018_vm6, %v4014_v8, -inf }
 0xbe3   :  { %4020 = vmax.xlane.f32.xlu0 %v4019_v62  ;;  %v6660_v4 = vpop.f32.mrf.mxu1 }
 0xbe5   :  { %v3911_v36 = vpop.f32.mrf.mxu1 }
 0xbe6   :  { %v4010_v24 = vmul.f32 0.17677669, %v3911_v36 }
 0xbe7   :  { %v6665_v45 = vpop.f32.mrf.mxu1 }
 0xbe8   :  { %v4015_v52 = vadd.f32 %v4013_v40, %v4010_v24 }
 0xbe9   :  { %v3914_v18 = vpop.f32.mrf.mxu1 }
 0xbea   :  { %v4022_v14 = vsel %vm4018_vm6, %v4015_v52, -inf }
 0xbeb   :  { %4023 = vmax.xlane.f32.xlu1 %v4022_v14  ;;  %v6666_v23 = vpop.f32.mrf.mxu1 }
 0xbed   :  { %v3957_v56 = vpop.f32.mrf.mxu1 }
 0xbee   :  { %v4011_v15 = vmul.f32 0.17677669, %v3957_v56 }
 0xbef   :  { %v6671_v6 = vpop.f32.mrf.mxu1 }
 0xbf0   :  { %v4016_v37 = vadd.f32 %v4013_v40, %v4011_v15 }
 0xbf1   :  { %v3960_v29 = vpop.f32.mrf.mxu1 }
 0xbf2   :  { %v4025_v10 = vsel %vm4018_vm6, %v4016_v37, -inf }
 0xbf3   :  { %4026 = vmax.xlane.f32.xlu0 %v4025_v10  ;;  %v6672_v1 = vpop.f32.mrf.mxu1 }
 0xbf5   :  { %v4003_v61 = vpop.f32.mrf.mxu1 }
 0xbf6   :  { %v4012_v20 = vmul.f32 0.17677669, %v4003_v61 }
 0xbf7   :  { %v6677_v59 = vpop.f32.mrf.mxu1 }
 0xbf8   :  { %v4017_v48 = vadd.f32 %v4013_v40, %v4012_v20  ;;  %v3565_v40 = vshrl.u32 %v3110_v43, 16 }
 0xbf9   :  { %v4006_v35 = vpop.f32.mrf.mxu1 }
 0xbfa   :  { %v4028_v7 = vsel %vm4018_vm6, %v4017_v48, -inf }
 0xbfb   :  { %4029 = vmax.xlane.f32.xlu0 %v4028_v7  ;;  %v6678_v30 = vpop.f32.mrf.mxu1 }
 0xbfc   :  { %3555 = vrot.lane.b32.xlu1 %v3110_v43, %s7301_s30 }
 0xc00   :  { %3559 = vrot.lane.b32.xlu1 %v3110_v43, %s7300_s18 }
 0xc11   :  { %3557 = vrot.lane.b32.xlu0 %v3110_v43, %s8628_s29 }
 0xc6c   :  { %v4021_v21 = vpop.xlane.xlu0 %4020 }
 0xc6d   :  { %v4031_v32 = vsub.f32 %v4014_v8, %v4021_v21  ;;  %v3100_v21 = vpop.f32.mrf.mxu0 }
 0xc6f   :  { %v4035_v25 = vmul.f32 1.442695, %v4031_v32 }
 0xc71   :  { %6986 = vpow2.f32 %v4035_v25 }
 0xc74   :  { %v4024_v44 = vpop.xlane.xlu1 %4023 }
 0xc75   :  { %v4032_v33 = vsub.f32 %v4015_v52, %v4024_v44 }
 0xc77   :  { %v4037_v60 = vmul.f32 1.442695, %v4032_v33 }
 0xc78   :  { %v3556_v12 = vpop.permute.xlu1 %3555 }
 0xc79   :  { %6988 = vpow2.f32 %v4037_v60  ;;  %v3566_v58 = vshrl.u32 %v3556_v12, 16  ;;  %v3563_v47 = vpack.i.b16 %v3556_v12, %v3110_v43 }
 0xc7b   :  { %v3567_v62 = vpack.i.b16 %v3566_v58, %v3565_v40  ;;  %v3577_v45 = vcombine.high %v3563_v47, %v8096_v19  ;;  %v3584_v15 = vrot.slane %v3563_v47, %v7540_v50 }
 0xc7c   :  { %v4027_v13 = vpop.xlane.xlu0 %4026  ;;  %v3560_v4 = vpop.permute.xlu1 %3559 }
 0xc7d   :  { %v4033_v55 = vsub.f32 %v4016_v37, %v4027_v13  ;;  %v3574_v18 = vshrl.u32 %v3560_v4, 16  ;;  %v3643_v56 = vcombine.high %v3567_v62, %v8096_v19  ;;  %v3591_v10 = vrot.slane %v3577_v45, %v7540_v50 }
 0xc7e   :  { %v8251_v11 = vpop.eup %6986  ;;  %v3650_v2 = vrot.slane %v3567_v62, %v7540_v50 }
 0xc7f   :  { %v4043_v38 = vsel %vm4018_vm6, %v8251_v11, 0.0  ;;  %v4039_v28 = vmul.f32 1.442695, %v4033_v55  ;;  %v3657_v20 = vrot.slane %v3643_v56, %v7540_v50 }
 0xc80   :  { %4044 = vadd.xlane.f32.xlu1 %v4043_v38 }
 0xc81   :  { %6990 = vpow2.f32 %v4039_v28 }
 0xc84   :  { %v4030_v41 = vpop.xlane.xlu0 %4029 }
 0xc85   :  { %v4034_v8 = vsub.f32 %v4017_v48, %v4030_v41 }
 0xc86   :  { %v8255_v49 = vpop.eup %6988 }
 0xc87   :  { %v4041_v36 = vmul.f32 1.442695, %v4034_v8  ;;  %v4046_v24 = vsel %vm4018_vm6, %v8255_v49, 0.0 }
 0xc88   :  { %4047 = vadd.xlane.f32.xlu0 %v4046_v24  ;;  %v3558_v52 = vpop.permute.xlu0 %3557 }
 0xc89   :  { %6992 = vpow2.f32 %v4041_v36  ;;  %v3571_v14 = vpack.i.b16 %v3560_v4, %v3558_v52  ;;  %v3573_v23 = vshrl.u32 %v3558_v52, 16  ;;  %v8283_v4 = vpop.f32.mrf.mxu0 }
 0xc8b   :  { %v3575_v6 = vpack.i.b16 %v3574_v18, %v3573_v23  ;;  %v3592_v37 = vcombine.high %v3571_v14, %v8096_v19  ;;  %v3599_v29 = vrot.slane %v3571_v14, %v7540_v50 }
 0xc8d   :  { %v3606_v3 = vrot.slane %v3592_v37, %v7540_v50  ;;  %v3607_v1 = vcombine.low %v3584_v15, %v3599_v29  ;;  %v3608_v61 = vcombine.high %v3584_v15, %v3599_v29  ;;  %v3658_v9 = vcombine.high %v3575_v6, %v8096_v19 }
 0xc8e   :  { %v3665_v59 = vrot.slane %v3575_v6, %v7540_v50  ;;  %v8270_v48 = vpop.eup %6990 }
 0xc8f   :  { %v3615_v35 = vrot.slane %v3607_v1, %v7543_v51  ;;  %v3622_v43 = vrot.slane %v3608_v61, %v7543_v51  ;;  %v3623_v7 = vcombine.low %v3591_v10, %v3606_v3  ;;  %v3624_v30 = vcombine.high %v3591_v10, %v3606_v3  ;;  %v3104_v1 = vpop.f32.mrf.mxu0 }
 0xc90   :  { %v3672_v32 = vrot.slane %v3658_v9, %v7540_v50  ;;  %v3673_v25 = vcombine.low %v3650_v2, %v3665_v59  ;;  %v3674_v44 = vcombine.high %v3650_v2, %v3665_v59  ;;  %v4049_v33 = vsel %vm4018_vm6, %v8270_v48, 0.0 }
 0xc91   :  { %v3631_v60 = vrot.slane %v3623_v7, %v7543_v51  ;;  %v3638_v13 = vrot.slane %v3624_v30, %v7543_v51  ;;  %v3709_v55 = vcombine.low %v3615_v35, %v3622_v43  ;;  %v6299_v12 = vcombine.high %v3615_v35, %v3622_v43  ;;  %4050 = vadd.xlane.f32.xlu1 %v4049_v33 }
 0xc92   :  { %v3681_v38 = vrot.slane %v3673_v25, %v7543_v51  ;;  %v3688_v28 = vrot.slane %v3674_v44, %v7543_v51  ;;  %v3689_v58 = vcombine.low %v3657_v20, %v3672_v32  ;;  %v3690_v40 = vcombine.high %v3657_v20, %v3672_v32 }
 0xc93   :  { %v3716_v47 = vrot.slane %v3709_v55, %v7540_v50  ;;  %v3724_v41 = vrot.slane %v6299_v12, %v7540_v50  ;;  %v3725_v8 = vcombine.low %v3631_v60, %v3638_v13  ;;  %v6300_v62 = vcombine.high %v3631_v60, %v3638_v13 }
 0xc94   :  { %v3697_v36 = vrot.slane %v3689_v58, %v7543_v51  ;;  %v3704_v24 = vrot.slane %v3690_v40, %v7543_v51  ;;  %v3759_v45 = vcombine.low %v3681_v38, %v3688_v28  ;;  %v6301_v52 = vcombine.high %v3681_v38, %v3688_v28 }
 0xc95   :  { %v3732_v18 = vrot.slane %v3725_v8, %v7540_v50  ;;  %v3740_v14 = vrot.slane %v6300_v62, %v7540_v50  ;;  %v3741_v23 = vcombine.low %v3716_v47, %v3724_v41  ;;  %v3101_v35 = vadd.f32 %v3100_v21, %v8071_v17 }
 0xc96   :  { %v8289_v56 = vpop.eup %6992  ;;  %v3766_v15 = vrot.slane %v3759_v45, %v7540_v50  ;;  %v3774_v6 = vrot.slane %v6301_v52, %v7540_v50  ;;  %v3775_v37 = vcombine.low %v3697_v36, %v3704_v24  ;;  %v6302_v29 = vcombine.high %v3697_v36, %v3704_v24 }
 0xc97   :  { %v4052_v10 = vsel %vm4018_vm6, %v8289_v56, 0.0  ;;  %v3749_v3 = vcombine.low %v3732_v18, %v3740_v14  ;;  %v3748_v20 = vrot.slane %v3741_v23, %v7543_v51  ;;  %v3105_v7 = vadd.f32 %v3104_v1, %v8071_v17 }
 0xc98   :  { %4053 = vadd.xlane.f32.xlu0 %v4052_v10  ;;  %v3782_v61 = vrot.slane %v3775_v37, %v7540_v50  ;;  %v3790_v9 = vrot.slane %v6302_v29, %v7540_v50  ;;  %v3791_v2 = vcombine.low %v3766_v15, %v3774_v6 }
 0xc99   :  { %v3756_v59 = vrot.slane %v3749_v3, %v7543_v51  ;;  %v3111_v60 = vpack.c.bf16 %v3105_v7, %v3101_v35 }
 0xc9a   :  { %v3799_v43 = vcombine.low %v3782_v61, %v3790_v9  ;;  %v3798_v25 = vrot.slane %v3791_v2, %v7543_v51 }
 0xc9b   :  { %v3757_v30 = vcombine.low %v3748_v20, %v3756_v59  ;;  %v3758_v32 = vcombine.high %v3748_v20, %v3756_v59  ;;  %v4567_v1 = vshrl.u32 %v3111_v60, 16 }
 0xc9c   :  { %v3806_v44 = vrot.slane %v3799_v43, %v7543_v51 }
 0xc9d   :  { %v3813_v55 = vshrl.u32 %v3757_v30, 16  ;;  %v3821_v12 = vshrl.u32 %v3758_v32, 16 }
 0xc9e   :  { %v3807_v33 = vcombine.low %v3798_v25, %v3806_v44  ;;  %v3808_v13 = vcombine.high %v3798_v25, %v3806_v44 }
 0xca0   :  { %v3811_v38 = vpack.i.b16 %v3807_v33, %v3757_v30  ;;  %v3814_v28 = vshrl.u32 %v3807_v33, 16  ;;  %v3819_v58 = vpack.i.b16 %v3808_v13, %v3758_v32  ;;  %v3822_v40 = vshrl.u32 %v3808_v13, 16 }
 0xca2   :  { %6680 = vmatpush3.bf16.msra.mxu1 %v3811_v38  ;;  %v3815_v21 = vpack.i.b16 %v3814_v28, %v3813_v55  ;;  %4559 = vrot.lane.b32.xlu1 %v3111_v60, %s8628_s29  ;;  %v3823_v17 = vpack.i.b16 %v3822_v40, %v3821_v12 }
 0xca3   :  { %6691 = vmatprep.subr.bf16.mxu1 %v8631_v54 }
 0xca4   :  { %6686 = vmatpush3.bf16.msra.mxu0 %v3815_v21 }
 0xca5   :  { %6697 = vmatprep.subr.bf16.mxu0 %v8631_v54 }
 0xca6   :  { %4561 = vrot.lane.b32.xlu1 %v3111_v60, %s7300_s18 }
 0xcae   :  { %4557 = vrot.lane.b32.xlu0 %v3111_v60, %s7301_s30 }
 0xd09   :  { %v4045_v47 = vpop.xlane.xlu1 %4044 }
 0xd0a   :  { %6994 = vrcp.f32 %v4045_v47 }
 0xd11   :  { %v4048_v41 = vpop.xlane.xlu0 %4047 }
 0xd12   :  { %6996 = vrcp.f32 %v4048_v41 }
 0xd17   :  { %v6995_v8 = vpop.eup %6994 }
 0xd18   :  { %v4059_v62 = vmul.f32 %v6995_v8, %v8251_v11 }
 0xd1a   :  { %v4051_v36 = vpop.xlane.xlu1 %4050  ;;  %v4063_v24 = vpack.c.bf16 %v4059_v62, %v4059_v62 }
 0xd1b   :  { %6998 = vrcp.f32 %v4051_v36 }
 0xd1c   :  { %6682 = vmatmul.mubr.msk.bf16.vlgmr.msra.gmra.mxu1 %vm4018_vm6, %v4063_v24 }
 0xd1d   :  { %6692 = vmatpush3.bf16.msra.mxu1 %v3819_v58  ;;  %6693 = vmatprep.mubr.msk.bf16.mxu1 %vm7302_vm0, %v8631_v54 }
 0xd1e   :  { %v4560_v45 = vpop.permute.xlu1 %4559  ;;  %6703 = vmatprep.subr.bf16.mxu1 %v8631_v54 }
 0xd1f   :  { %v6997_v52 = vpop.eup %6996  ;;  %v4575_v11 = vshrl.u32 %v4560_v45, 16 }
 0xd20   :  { %v4060_v18 = vmul.f32 %v6997_v52, %v8255_v49 }
 0xd21   :  { %v4054_v14 = vpop.xlane.xlu0 %4053 }
 0xd22   :  { %v4064_v23 = vpack.c.bf16 %v4060_v18, %v4060_v18  ;;  %v4562_v15 = vpop.permute.xlu1 %4561  ;;  %7000 = vrcp.f32 %v4054_v14 }
 0xd23   :  { %v4573_v6 = vpack.i.b16 %v4562_v15, %v4560_v45  ;;  %v4576_v37 = vshrl.u32 %v4562_v15, 16 }
 0xd24   :  { %6688 = vmatmul.mubr.msk.bf16.vlgmr.msra.gmra.mxu0 %vm4018_vm6, %v4064_v23 }
 0xd25   :  { %v4577_v29 = vpack.i.b16 %v4576_v37, %v4575_v11  ;;  %v4594_v10 = vcombine.high %v4573_v6, %v8096_v19  ;;  %6698 = vmatpush3.bf16.msra.mxu0 %v3823_v17  ;;  %v4558_v3 = vpop.permute.xlu0 %4557  ;;  %6699 = vmatprep.mubr.msk.bf16.mxu0 %vm7302_vm0, %v8631_v54  ;;  %v4601_v2 = vrot.slane %v4573_v6, %v7540_v50 }
 0xd26   :  { %v4565_v61 = vpack.i.b16 %v4558_v3, %v3111_v60  ;;  %v4568_v49 = vshrl.u32 %v4558_v3, 16  ;;  %6709 = vmatprep.subr.bf16.mxu0 %v8631_v54 }
 0xd27   :  { %v4608_v43 = vrot.slane %v4594_v10, %v7540_v50  ;;  %v4660_v7 = vcombine.high %v4577_v29, %v8096_v19  ;;  %v4667_v60 = vrot.slane %v4577_v29, %v7540_v50 }
 0xd28   :  { %v6999_v9 = vpop.eup %6998  ;;  %v4569_v20 = vpack.i.b16 %v4568_v49, %v4567_v1  ;;  %v4579_v59 = vcombine.high %v4565_v61, %v8096_v19  ;;  %v4586_v35 = vrot.slane %v4565_v61, %v7540_v50 }
 0xd29   :  { %v4061_v30 = vmul.f32 %v6999_v9, %v8270_v48  ;;  %v4674_v40 = vrot.slane %v4660_v7, %v7540_v50 }
 0xd2a   :  { %v4593_v32 = vrot.slane %v4579_v59, %v7540_v50  ;;  %v4609_v25 = vcombine.low %v4586_v35, %v4601_v2  ;;  %v4610_v44 = vcombine.high %v4586_v35, %v4601_v2  ;;  %v4645_v33 = vcombine.high %v4569_v20, %v8096_v19 }
 0xd2b   :  { %v4652_v13 = vrot.slane %v4569_v20, %v7540_v50  ;;  %v4065_v55 = vpack.c.bf16 %v4061_v30, %v4061_v30 }
 0xd2c   :  { %v4617_v12 = vrot.slane %v4609_v25, %v7543_v51  ;;  %v4624_v38 = vrot.slane %v4610_v44, %v7543_v51  ;;  %v4625_v28 = vcombine.low %v4593_v32, %v4608_v43  ;;  %v4626_v58 = vcombine.high %v4593_v32, %v4608_v43 }
 0xd2d   :  { %v4659_v48 = vrot.slane %v4645_v33, %v7540_v50  ;;  %v4675_v21 = vcombine.low %v4652_v13, %v4667_v60  ;;  %v4676_v17 = vcombine.high %v4652_v13, %v4667_v60  ;;  %6694 = vmatmul.mubr.msk.bf16.vlgmr.msra.gmra.mxu1 %vm4018_vm6, %v4065_v55 }
 0xd2e   :  { %v4633_v47 = vrot.slane %v4625_v28, %v7543_v51  ;;  %v4640_v41 = vrot.slane %v4626_v58, %v7543_v51  ;;  %v4711_v8 = vcombine.low %v4617_v12, %v4624_v38  ;;  %v6313_v62 = vcombine.high %v4617_v12, %v4624_v38  ;;  %6705 = vmatprep.mubr.msk.bf16.mxu1 %vm7302_vm0, %v8631_v54 }
 0xd2f   :  { %v7001_v36 = vpop.eup %7000  ;;  %v4683_v24 = vrot.slane %v4675_v21, %v7543_v51  ;;  %v4690_v45 = vrot.slane %v4676_v17, %v7543_v51  ;;  %v4691_v52 = vcombine.low %v4659_v48, %v4674_v40  ;;  %v4692_v18 = vcombine.high %v4659_v48, %v4674_v40 }
 0xd30   :  { %v4718_v14 = vrot.slane %v4711_v8, %v7540_v50  ;;  %v4726_v23 = vrot.slane %v6313_v62, %v7540_v50  ;;  %v4727_v15 = vcombine.low %v4633_v47, %v4640_v41  ;;  %v6314_v11 = vcombine.high %v4633_v47, %v4640_v41 }
 0xd31   :  { %v4699_v6 = vrot.slane %v4691_v52, %v7543_v51  ;;  %v4706_v37 = vrot.slane %v4692_v18, %v7543_v51  ;;  %v4761_v29 = vcombine.low %v4683_v24, %v4690_v45  ;;  %v6315_v10 = vcombine.high %v4683_v24, %v4690_v45 }
 0xd32   :  { %v4062_v3 = vmul.f32 %v7001_v36, %v8289_v56  ;;  %v4734_v1 = vrot.slane %v4727_v15, %v7540_v50  ;;  %v4742_v61 = vrot.slane %v6314_v11, %v7540_v50  ;;  %v4743_v49 = vcombine.low %v4718_v14, %v4726_v23 }
 0xd33   :  { %v4777_v9 = vcombine.low %v4699_v6, %v4706_v37  ;;  %v6316_v2 = vcombine.high %v4699_v6, %v4706_v37  ;;  %v4768_v20 = vrot.slane %v4761_v29, %v7540_v50  ;;  %v4776_v59 = vrot.slane %v6315_v10, %v7540_v50 }
 0xd34   :  { %v4066_v35 = vpack.c.bf16 %v4062_v3, %v4062_v3  ;;  %v4751_v43 = vcombine.low %v4734_v1, %v4742_v61  ;;  %v4750_v25 = vrot.slane %v4743_v49, %v7543_v51 }
 0xd35   :  { %v4784_v7 = vrot.slane %v4777_v9, %v7540_v50  ;;  %v4792_v30 = vrot.slane %v6316_v2, %v7540_v50  ;;  %v4793_v32 = vcombine.low %v4768_v20, %v4776_v59 }
 0xd36   :  { %6700 = vmatmul.mubr.msk.bf16.vlgmr.msra.gmra.mxu0 %vm4018_vm6, %v4066_v35  ;;  %v4758_v56 = vrot.slane %v4751_v43, %v7543_v51 }
 0xd37   :  { %v4801_v44 = vcombine.low %v4784_v7, %v4792_v30  ;;  %6711 = vmatprep.mubr.msk.bf16.mxu0 %vm7302_vm0, %v8631_v54  ;;  %v4800_v60 = vrot.slane %v4793_v32, %v7543_v51 }
 0xd38   :  { %v4759_v33 = vcombine.low %v4750_v25, %v4758_v56  ;;  %v4760_v21 = vcombine.high %v4750_v25, %v4758_v56 }
 0xd39   :  { %v4808_v13 = vrot.slane %v4801_v44, %v7543_v51 }
 0xd3a   :  { %v4814_v38 = vshrl.u32 %v4759_v33, 16  ;;  %v4820_v8 = vshrl.u32 %v4760_v21, 16 }
 0xd3b   :  { %v4809_v55 = vcombine.low %v4800_v60, %v4808_v13  ;;  %v4810_v58 = vcombine.high %v4800_v60, %v4808_v13 }
 0xd3d   :  { %v4813_v12 = vpack.i.b16 %v4809_v55, %v4759_v33  ;;  %v4815_v28 = vshrl.u32 %v4809_v55, 16  ;;  %v4821_v47 = vshrl.u32 %v4810_v58, 16  ;;  %v4819_v41 = vpack.i.b16 %v4810_v58, %v4760_v21 }
 0xd3f   :  { %v5098_v40 = vsel %vm1008_vm1, %v4813_v12, 0  ;;  %v4816_v48 = vpack.i.b16 %v4815_v28, %v4814_v38  ;;  %v4822_v62 = vpack.i.b16 %v4821_v47, %v4820_v8  ;;  %v5190_v36 = vsel %vm1008_vm1, %v4819_v41, 0 }
 0xd40   :  { %6704 = vmatpush3.bf16.xpose.msra.mxu1 %v5098_v40 }
 0xd41   :  { %v5144_v17 = vsel %vm1008_vm1, %v4816_v48, 0  ;;  %6715 = vmatprep.subr.bf16.mxu1 %v8631_v54  ;;  %v5236_v24 = vsel %vm1008_vm1, %v4822_v62, 0  ;;  %v5283_v62 = vld [vmem:[#allocation8 + $0x8] sm:$0xff] }
 0xd42   :  { %6710 = vmatpush3.bf16.xpose.msra.mxu0 %v5144_v17 }
 0xd43   :  { %6721 = vmatprep.subr.bf16.mxu0 %v8631_v54 }
 0xd47   :  { %6706 = vmatmul.mubr.msk.bf16.vlgmr.msra.gmra.mxu1 %vm1008_vm1, %v4546_v5 }
 0xd48   :  { %6716 = vmatpush3.bf16.xpose.msra.mxu1 %v5190_v36  ;;  %6717 = vmatprep.mubr.msk.bf16.mxu1 %vm7302_vm0, %v8631_v54 }
 0xd49   :  { %6712 = vmatmul.mubr.msk.bf16.vlgmr.msra.gmra.mxu0 %vm1008_vm1, %v8208_v42  ;;  %6727 = vmatprep.subr.bf16.mxu1 %v8631_v54  ;;  %v8386_v42 = vpop.f32.mrf.mxu0 }
 0xd4a   :  { %6722 = vmatpush3.bf16.xpose.msra.mxu0 %v5236_v24  ;;  %6723 = vmatprep.mubr.msk.bf16.mxu0 %vm7302_vm0, %v8631_v54 }
 0xd4b   :  { %6733 = vmatprep.subr.bf16.mxu0 %v8631_v54 }
 0xd4f   :  { %6718 = vmatmul.mubr.msk.bf16.vlgmr.msra.gmra.mxu1 %vm1008_vm1, %v4552_v31 }
 0xd50   :  { %6729 = vmatprep.mubr.msk.bf16.mxu1 %vm7302_vm0, %v8631_v54 }
 0xd51   :  { %6724 = vmatmul.mubr.msk.bf16.vlgmr.msra.gmra.mxu0 %vm1008_vm1, %v8214_v57 }
 0xd52   :  { %6735 = vmatprep.mubr.msk.bf16.mxu0 %vm7302_vm0, %v8631_v54 }
 0xddc   :  { %v4104_v53 = vpop.f32.mrf.mxu1 }
 0xdde   :  { %v6683_v46 = vpop.f32.mrf.mxu1 }
 0xde0   :  { %v4107_v5 = vpop.f32.mrf.mxu1 }
 0xde2   :  { %v6684_v45 = vpop.f32.mrf.mxu1 }
 0xde4   :  { %v4147_v52 = vpop.f32.mrf.mxu0 }
 0xde6   :  { %v6689_v18 = vpop.f32.mrf.mxu0 }
 0xde8   :  { %v4150_v34 = vpop.f32.mrf.mxu0 }
 0xdea   :  { %v6690_v16 = vpop.f32.mrf.mxu0 }
 0xded   :  { %v4190_v31 = vpop.f32.mrf.mxu1 }
 0xdee   :  { %v4239_v14 = vcombine.low %v4104_v53, %v4190_v31  ;;  %v4240_v23 = vcombine.high %v4104_v53, %v4190_v31 }
 0xdef   :  { %v6695_v15 = vpop.f32.mrf.mxu1 }
 0xdf0   :  { %v4247_v3 = vrot.slane %v4239_v14, %v7540_v50  ;;  %v4254_v1 = vrot.slane %v4240_v23, %v7540_v50 }
 0xdf1   :  { %v4193_v11 = vpop.f32.mrf.mxu1 }
 0xdf3   :  { %v6696_v6 = vpop.f32.mrf.mxu1 }
 0xdf6   :  { %v4233_v57 = vpop.f32.mrf.mxu0 }
 0xdf7   :  { %v4255_v37 = vcombine.low %v4147_v52, %v4233_v57  ;;  %v4256_v29 = vcombine.high %v4147_v52, %v4233_v57 }
 0xdf8   :  { %v6701_v10 = vpop.f32.mrf.mxu0 }
 0xdf9   :  { %v4263_v61 = vrot.slane %v4255_v37, %v7540_v50  ;;  %v4270_v49 = vrot.slane %v4256_v29, %v7540_v50 }
 0xdfa   :  { %v4236_v9 = vpop.f32.mrf.mxu0 }
 0xdfb   :  { %v4271_v2 = vcombine.low %v4247_v3, %v4263_v61  ;;  %v4272_v20 = vcombine.high %v4247_v3, %v4263_v61  ;;  %v4287_v59 = vcombine.low %v4254_v1, %v4270_v49  ;;  %v4288_v35 = vcombine.high %v4254_v1, %v4270_v49 }
 0xdfc   :  { %v6702_v43 = vpop.f32.mrf.mxu0 }
 0xdfd   :  { %v4279_v7 = vrot.slane %v4271_v2, %v7543_v51  ;;  %v4286_v30 = vrot.slane %v4272_v20, %v7543_v51  ;;  %v4295_v32 = vrot.slane %v4287_v59, %v7543_v51  ;;  %v4302_v56 = vrot.slane %v4288_v35, %v7543_v51 }
 0xdff   :  { %v4307_v25 = vcombine.low %v4279_v7, %v4286_v30  ;;  %v6311_v44 = vcombine.high %v4279_v7, %v4286_v30  ;;  %v4323_v33 = vcombine.low %v4295_v32, %v4302_v56  ;;  %v6312_v60 = vcombine.high %v4295_v32, %v4302_v56 }
 0xe00   :  { %v3103_v30 = vadd.f32 %v8283_v4, %v8241_v39  ;;  %v3107_v32 = vadd.f32 %v8386_v42, %v8241_v39 }
 0xe01   :  { %v4314_v13 = vrot.slane %v4307_v25, %v7540_v50  ;;  %v4322_v55 = vrot.slane %v6311_v44, %v7540_v50  ;;  %v4330_v12 = vrot.slane %v4323_v33, %v7540_v50  ;;  %v4338_v38 = vrot.slane %v6312_v60, %v7540_v50 }
 0xe02   :  { %v3112_v56 = vpack.c.bf16 %v3107_v32, %v3103_v30 }
 0xe03   :  { %v4340_v28 = vcombine.high %v4314_v13, %v4322_v55  ;;  %v4356_v58 = vcombine.high %v4330_v12, %v4338_v38  ;;  %v4339_v40 = vcombine.low %v4314_v13, %v4322_v55  ;;  %v4355_v48 = vcombine.low %v4330_v12, %v4338_v38 }
 0xe05   :  { %v8401_v21 = vrot.slane %v4340_v28, %v7543_v51  ;;  %v8404_v17 = vrot.slane %v4356_v58, %v7543_v51  ;;  %v8407_v47 = vrot.slane %v4339_v40, %v7543_v51  ;;  %v8410_v41 = vrot.slane %v4355_v48, %v7543_v51 }
 0xe07   :  { %v5134_v8 = vpop.f32.mrf.mxu1  ;;  %v4373_v36 = vcombine.low %v8401_v21, %v8404_v17  ;;  %v4371_v24 = vcombine.low %v8407_v47, %v8410_v41  ;;  %v4372_v53 = vcombine.high %v8407_v47, %v8410_v41  ;;  %v4374_v46 = vcombine.high %v8401_v21, %v8404_v17  ;;  %v6331_v47 = vld [vmem:[%s8599_s15] ss:$0 sm:$0xff] }
 0xe08   :  { %v5278_v5 = vmul.f32 0.17677669, %v5134_v8 }
 0xe09   :  { %v6707_v45 = vpop.f32.mrf.mxu1  ;;  %v5180_v52 = vpop.f32.mrf.mxu0 }
 0xe0a   :  { %v5279_v18 = vmul.f32 0.17677669, %v5180_v52  ;;  %v5284_v34 = vadd.f32 %v5283_v62, %v5278_v5 }
 0xe0b   :  { %v5137_v16 = vpop.f32.mrf.mxu1  ;;  %v6713_v31 = vpop.f32.mrf.mxu0 }
 0xe0c   :  { %v5288_v14 = vsel %vm4018_vm6, %v5284_v34, -inf  ;;  %v5285_v23 = vadd.f32 %v5283_v62, %v5279_v18  ;;  %v4834_v31 = vshrl.u32 %v3112_v56, 16 }
 0xe0d   :  { %v5183_v15 = vpop.f32.mrf.mxu0  ;;  %5289 = vmax.xlane.f32.xlu0 %v5288_v14  ;;  %v6708_v11 = vpop.f32.mrf.mxu1 }
 0xe0e   :  { %v5291_v6 = vsel %vm4018_vm6, %v5285_v23, -inf }
 0xe0f   :  { %5292 = vmax.xlane.f32.xlu1 %v5291_v6  ;;  %v6714_v57 = vpop.f32.mrf.mxu0  ;;  %v5226_v37 = vpop.f32.mrf.mxu1 }
 0xe10   :  { %v5280_v29 = vmul.f32 0.17677669, %v5226_v37 }
 0xe11   :  { %v6719_v10 = vpop.f32.mrf.mxu1  ;;  %v5272_v3 = vpop.f32.mrf.mxu0 }
 0xe12   :  { %v5281_v1 = vmul.f32 0.17677669, %v5272_v3  ;;  %v5286_v61 = vadd.f32 %v5283_v62, %v5280_v29 }
 0xe13   :  { %v5229_v49 = vpop.f32.mrf.mxu1  ;;  %v6725_v9 = vpop.f32.mrf.mxu0 }
 0xe14   :  { %v5294_v2 = vsel %vm4018_vm6, %v5286_v61, -inf  ;;  %v5287_v20 = vadd.f32 %v5283_v62, %v5281_v1 }
 0xe15   :  { %v5275_v59 = vpop.f32.mrf.mxu0  ;;  %5295 = vmax.xlane.f32.xlu0 %v5294_v2  ;;  %v6720_v35 = vpop.f32.mrf.mxu1 }
 0xe16   :  { %v5297_v7 = vsel %vm4018_vm6, %v5287_v20, -inf }
 0xe17   :  { %v6726_v43 = vpop.f32.mrf.mxu0 }
 0xe19   :  { %5298 = vmax.xlane.f32.xlu0 %v5297_v7 }
 0xe20   :  { %4824 = vrot.lane.b32.xlu1 %v3112_v56, %s7301_s30 }
 0xe96   :  { %v5290_v25 = vpop.xlane.xlu0 %5289 }
 0xe97   :  { %v5300_v44 = vsub.f32 %v5284_v34, %v5290_v25 }
 0xe98   :  { %v5293_v33 = vpop.xlane.xlu1 %5292 }
 0xe99   :  { %v5304_v60 = vmul.f32 1.442695, %v5300_v44  ;;  %v5301_v13 = vsub.f32 %v5285_v23, %v5293_v33 }
 0xe9b   :  { %7002 = vpow2.f32 %v5304_v60  ;;  %v5306_v55 = vmul.f32 1.442695, %v5301_v13 }
 0xe9c   :  { %v4825_v18 = vpop.permute.xlu1 %4824 }
 0xe9d   :  { %7004 = vpow2.f32 %v5306_v55  ;;  %v4835_v34 = vshrl.u32 %v4825_v18, 16  ;;  %v4832_v14 = vpack.i.b16 %v4825_v18, %v3112_v56 }
 0xe9e   :  { %v5296_v42 = vpop.xlane.xlu0 %5295 }
 0xe9f   :  { %v5302_v58 = vsub.f32 %v5286_v61, %v5296_v42  ;;  %v4836_v15 = vpack.i.b16 %v4835_v34, %v4834_v31  ;;  %v4846_v6 = vcombine.high %v4832_v14, %v8096_v19  ;;  %v4853_v1 = vrot.slane %v4832_v14, %v7540_v50 }
 0xea1   :  { %v5308_v48 = vmul.f32 1.442695, %v5302_v58  ;;  %v4912_v3 = vcombine.high %v4836_v15, %v8096_v19  ;;  %v4860_v2 = vrot.slane %v4846_v6, %v7540_v50  ;;  %v4919_v7 = vrot.slane %v4836_v15, %v7540_v50 }
 0xea2   :  { %v5299_v28 = vpop.xlane.xlu0 %5298 }
 0xea3   :  { %v5303_v40 = vsub.f32 %v5287_v20, %v5299_v28  ;;  %7006 = vpow2.f32 %v5308_v48  ;;  %v4926_v30 = vrot.slane %v4912_v3, %v7540_v50 }
 0xea5   :  { %v5310_v8 = vmul.f32 1.442695, %v5303_v40 }
 0xea7   :  { %7008 = vpow2.f32 %v5310_v8 }
 0xea8   :  { %v8429_v12 = vpop.eup %7002 }
 0xea9   :  { %v5312_v38 = vsel %vm4018_vm6, %v8429_v12, 0.0 }
 0xeaa   :  { %v8433_v4 = vpop.eup %7004  ;;  %5313 = vadd.xlane.f32.xlu1 %v5312_v38 }
 0xeab   :  { %v5315_v39 = vsel %vm4018_vm6, %v8433_v4, 0.0 }
 0xeac   :  { %5316 = vadd.xlane.f32.xlu0 %v5315_v39 }
 0xeb0   :  { %v8439_v62 = vpop.eup %7006 }
 0xeb1   :  { %v5318_v45 = vsel %vm4018_vm6, %v8439_v62, 0.0 }
 0xeb4   :  { %v8441_v5 = vpop.eup %7008 }
 0xeb5   :  { %v5321_v52 = vsel %vm4018_vm6, %v8441_v5, 0.0 }
 0xebb   :  { %4828 = vrot.lane.b32.xlu1 %v3112_v56, %s7300_s18 }
 0xec2   :  { %4826 = vrot.lane.b32.xlu0 %v3112_v56, %s8628_s29 }
 0xedf   :  { %5319 = vadd.xlane.f32.xlu1 %v5318_v45 }
 0xee1   :  { %5322 = vadd.xlane.f32.xlu0 %v5321_v52 }
 0xf33   :  { %v5314_v16 = vpop.xlane.xlu1 %5313 }
 0xf34   :  { %7010 = vrcp.f32 %v5314_v16 }
 0xf35   :  { %v5317_v23 = vpop.xlane.xlu0 %5316 }
 0xf36   :  { %7012 = vrcp.f32 %v5317_v23 }
 0xf37   :  { %v4829_v11 = vpop.permute.xlu1 %4828 }
 0xf38   :  { %v4843_v37 = vshrl.u32 %v4829_v11, 16 }
 0xf39   :  { %v4827_v57 = vpop.permute.xlu0 %4826 }
 0xf3a   :  { %v4840_v29 = vpack.i.b16 %v4829_v11, %v4827_v57  ;;  %v4842_v10 = vshrl.u32 %v4827_v57, 16 }
 0xf3c   :  { %v4844_v61 = vpack.i.b16 %v4843_v37, %v4842_v10  ;;  %v4861_v49 = vcombine.high %v4840_v29, %v8096_v19  ;;  %v4868_v9 = vrot.slane %v4840_v29, %v7540_v50 }
 0xf3e   :  { %v4875_v20 = vrot.slane %v4861_v49, %v7540_v50  ;;  %v4876_v59 = vcombine.low %v4853_v1, %v4868_v9  ;;  %v4877_v35 = vcombine.high %v4853_v1, %v4868_v9  ;;  %v4927_v43 = vcombine.high %v4844_v61, %v8096_v19 }
 0xf3f   :  { %v4934_v32 = vrot.slane %v4844_v61, %v7540_v50 }
 0xf40   :  { %v4884_v56 = vrot.slane %v4876_v59, %v7543_v51  ;;  %v4891_v25 = vrot.slane %v4877_v35, %v7543_v51  ;;  %v4892_v44 = vcombine.low %v4860_v2, %v4875_v20  ;;  %v4893_v33 = vcombine.high %v4860_v2, %v4875_v20 }
 0xf41   :  { %v4941_v60 = vrot.slane %v4927_v43, %v7540_v50  ;;  %v4942_v13 = vcombine.low %v4919_v7, %v4934_v32  ;;  %v4943_v55 = vcombine.high %v4919_v7, %v4934_v32  ;;  %v7011_v20 = vpop.eup %7010 }
 0xf42   :  { %v4900_v19 = vrot.slane %v4892_v44, %v7543_v51  ;;  %v4907_v38 = vrot.slane %v4893_v33, %v7543_v51  ;;  %v4978_v39 = vcombine.low %v4884_v56, %v4891_v25  ;;  %v6317_v42 = vcombine.high %v4884_v56, %v4891_v25 }
 0xf43   :  { %v4950_v28 = vrot.slane %v4942_v13, %v7543_v51  ;;  %v4957_v58 = vrot.slane %v4943_v55, %v7543_v51  ;;  %v4958_v40 = vcombine.low %v4926_v30, %v4941_v60  ;;  %v4959_v48 = vcombine.high %v4926_v30, %v4941_v60  ;;  %v7013_v7 = vpop.eup %7012 }
 0xf44   :  { %v4985_v8 = vrot.slane %v4978_v39, %v7540_v50  ;;  %v4993_v45 = vrot.slane %v6317_v42, %v7540_v50  ;;  %v4994_v52 = vcombine.low %v4900_v19, %v4907_v38  ;;  %v6318_v18 = vcombine.high %v4900_v19, %v4907_v38 }
 0xf45   :  { %v4966_v34 = vrot.slane %v4958_v40, %v7543_v51  ;;  %v4973_v16 = vrot.slane %v4959_v48, %v7543_v51  ;;  %v5028_v31 = vcombine.low %v4950_v28, %v4957_v58  ;;  %v6319_v14 = vcombine.high %v4950_v28, %v4957_v58 }
 0xf46   :  { %v5001_v23 = vrot.slane %v4994_v52, %v7540_v50  ;;  %v5009_v15 = vrot.slane %v6318_v18, %v7540_v50  ;;  %v5010_v11 = vcombine.low %v4985_v8, %v4993_v45  ;;  %v5328_v56 = vmul.f32 %v7011_v20, %v8429_v12 }
 0xf47   :  { %v5035_v6 = vrot.slane %v5028_v31, %v7540_v50  ;;  %v5043_v57 = vrot.slane %v6319_v14, %v7540_v50  ;;  %v5044_v37 = vcombine.low %v4966_v34, %v4973_v16  ;;  %v6320_v29 = vcombine.high %v4966_v34, %v4973_v16  ;;  %v6901_v34 = vld [vmem:[#allocation16 + $0x38] sm:$0xff]   ;;  %v6902_v16 = vld [vmem:[#allocation16 + $0x30] sm:$0xff]  }
 0xf48   :  { %v5018_v10 = vcombine.low %v5001_v23, %v5009_v15  ;;  %v5017_v9 = vrot.slane %v5010_v11, %v7543_v51  ;;  %v5329_v13 = vmul.f32 %v7013_v7, %v8433_v4  ;;  %v5332_v38 = vpack.c.bf16 %v5328_v56, %v5328_v56  ;;  %v6905_v31 = vld [vmem:[#allocation16 + $0x18] sm:$0xff]   ;;  %v6906_v14 = vld [vmem:[#allocation16 + $0x10] sm:$0xff]  }
 0xf49   :  { %v5051_v3 = vrot.slane %v5044_v37, %v7540_v50  ;;  %v5059_v1 = vrot.slane %v6320_v29, %v7540_v50  ;;  %v5060_v61 = vcombine.low %v5035_v6, %v5043_v57 }
 0xf4a   :  { %v5025_v49 = vrot.slane %v5018_v10, %v7543_v51  ;;  %v5333_v28 = vpack.c.bf16 %v5329_v13, %v5329_v13 }
 0xf4b   :  { %v5068_v2 = vcombine.low %v5051_v3, %v5059_v1  ;;  %v5067_v35 = vrot.slane %v5060_v61, %v7543_v51 }
 0xf4c   :  { %v5026_v59 = vcombine.low %v5017_v9, %v5025_v49  ;;  %v5027_v60 = vcombine.high %v5017_v9, %v5025_v49 }
 0xf4d   :  { %v5075_v43 = vrot.slane %v5068_v2, %v7543_v51 }
 0xf4e   :  { %v5082_v44 = vshrl.u32 %v5026_v59, 16  ;;  %v5090_v42 = vshrl.u32 %v5027_v60, 16 }
 0xf4f   :  { %v5076_v30 = vcombine.low %v5067_v35, %v5075_v43  ;;  %v5077_v32 = vcombine.high %v5067_v35, %v5075_v43 }
 0xf51   :  { %v5080_v25 = vpack.i.b16 %v5076_v30, %v5026_v59  ;;  %v5083_v33 = vshrl.u32 %v5076_v30, 16  ;;  %v5091_v19 = vshrl.u32 %v5077_v32, 16  ;;  %v5088_v39 = vpack.i.b16 %v5077_v32, %v5027_v60 }
 0xf53   :  { %6728 = vmatpush3.bf16.msra.mxu1 %v5080_v25  ;;  %v5084_v55 = vpack.i.b16 %v5083_v33, %v5082_v44  ;;  %v5092_v12 = vpack.i.b16 %v5091_v19, %v5090_v42 }
 0xf54   :  { %6739 = vmatprep.subr.bf16.mxu1 %v8631_v54 }
 0xf55   :  { %6734 = vmatpush3.bf16.msra.mxu0 %v5084_v55 }
 0xf56   :  { %6730 = vmatmul.mubr.msk.bf16.vlgmr.msra.gmra.mxu1 %vm4018_vm6, %v5332_v38  ;;  %6745 = vmatprep.subr.bf16.mxu0 %v8631_v54 }
 0xf57   :  { %6740 = vmatpush3.bf16.msra.mxu1 %v5088_v39  ;;  %6741 = vmatprep.mubr.msk.bf16.mxu1 %vm7302_vm0, %v8631_v54 }
 0xf58   :  { %6736 = vmatmul.mubr.msk.bf16.vlgmr.msra.gmra.mxu0 %vm4018_vm6, %v5333_v28  ;;  %6751 = vmatprep.subr.bf16.mxu1 %v8631_v54 }
 0xf59   :  { %6746 = vmatpush3.bf16.msra.mxu0 %v5092_v12  ;;  %6747 = vmatprep.mubr.msk.bf16.mxu0 %vm7302_vm0, %v8631_v54 }
 0xf68   :  { %v5320_v4 = vpop.xlane.xlu1 %5319 }
 0xf69   :  { %7014 = vrcp.f32 %v5320_v4 }
 0xf6a   :  { %v5323_v58 = vpop.xlane.xlu0 %5322 }
 0xf6b   :  { %7016 = vrcp.f32 %v5323_v58 }
 0xf76   :  { %v7015_v40 = vpop.eup %7014 }
 0xf77   :  { %v5330_v48 = vmul.f32 %v7015_v40, %v8439_v62  ;;  %v6903_v62 = vld [vmem:[#allocation16 + $0x28] sm:$0xff]  }
 0xf78   :  { %v7017_v8 = vpop.eup %7016  ;;  %v6907_v40 = vld [vmem:[#allocation16 + $0x8] sm:$0xff]  }
 0xf79   :  { %v5334_v45 = vpack.c.bf16 %v5330_v48, %v5330_v48  ;;  %v5331_v52 = vmul.f32 %v7017_v8, %v8441_v5  ;;  %v6904_v5 = vld [vmem:[#allocation16 + $0x20] sm:$0xff]  }
 0xf7b   :  { %6742 = vmatmul.mubr.msk.bf16.vlgmr.msra.gmra.mxu1 %vm4018_vm6, %v5334_v45  ;;  %v5335_v18 = vpack.c.bf16 %v5331_v52, %v5331_v52 }
 0xf7c   :  { %6767 = vmatprep.mubr.msk.bf16.mxu1 %vm7302_vm0, %v8631_v54  ;;  %6752 = vmatpush3.bf16.msra.mxu1 %v6901_v34 }
 0xf7d   :  { %6748 = vmatmul.mubr.msk.bf16.vlgmr.msra.gmra.mxu0 %vm4018_vm6, %v5335_v18  ;;  %6753 = vmatprep.subr.bf16.mxu1 %v8631_v54 }
 0xf7e   :  { %5955 = vmatprep.mubr.bf16.mxu0 %v7298_v0 }
 0xf80   :  { %6754 = vmatpush3.bf16.msra.mxu1 %v6902_v16 }
 0xf81   :  { %6755 = vmatprep.subr.bf16.mxu1 %v8631_v54 }
 0xf84   :  { %6756 = vmatpush3.bf16.msra.mxu1 %v6903_v62 }
 0xf85   :  { %6757 = vmatprep.subr.bf16.mxu1 %v8631_v54 }
 0xf88   :  { %6758 = vmatpush3.bf16.msra.mxu1 %v6904_v5 }
 0xf89   :  { %6759 = vmatprep.subr.bf16.mxu1 %v8631_v54 }
 0xf8c   :  { %6760 = vmatpush3.bf16.msra.mxu1 %v6905_v31 }
 0xf8d   :  { %6761 = vmatprep.subr.bf16.mxu1 %v8631_v54 }
 0xf90   :  { %6762 = vmatpush3.bf16.msra.mxu1 %v6906_v14 }
 0xf91   :  { %6763 = vmatprep.subr.bf16.mxu1 %v8631_v54 }
 0xf94   :  { %6764 = vmatpush3.bf16.msra.mxu1 %v6907_v40  ;;  %v6918_v40 = vld [vmem:[#allocation17 + $0x40] ss:$8 sps:$4 sm:$0xff]  }
 0xf95   :  { %6765 = vmatprep.subr.bf16.mxu1 %v8631_v54 }
0x1016   :  { %v5373_v23 = vpop.f32.mrf.mxu1 }
0x1018   :  { %v6731_v15 = vpop.f32.mrf.mxu1  ;;  %v5416_v11 = vpop.f32.mrf.mxu0 }
0x1019   :  { %v6908_v15 = vld [vmem:[#allocation16] sm:$0xff]  }
0x101a   :  { %v5376_v6 = vpop.f32.mrf.mxu1  ;;  %v6737_v57 = vpop.f32.mrf.mxu0  ;;  %6766 = vmatpush3.bf16.msra.mxu1 %v6908_v15  ;;  %v6937_v15 = vld [vmem:[#allocation19 + $0x68] sm:$0xff]  }
0x101c   :  { %v6732_v37 = vpop.f32.mrf.mxu1  ;;  %v5419_v29 = vpop.f32.mrf.mxu0 }
0x101e   :  { %v6738_v10 = vpop.f32.mrf.mxu0 }
0x103b   :  { %v5459_v3 = vpop.f32.mrf.mxu1 }
0x103c   :  { %v5508_v1 = vcombine.low %v5373_v23, %v5459_v3  ;;  %v5509_v61 = vcombine.high %v5373_v23, %v5459_v3 }
0x103d   :  { %v6743_v49 = vpop.f32.mrf.mxu1  ;;  %v5502_v9 = vpop.f32.mrf.mxu0 }
0x103e   :  { %v5524_v2 = vcombine.low %v5416_v11, %v5502_v9  ;;  %v5525_v20 = vcombine.high %v5416_v11, %v5502_v9  ;;  %v5516_v43 = vrot.slane %v5508_v1, %v7540_v50  ;;  %v5523_v7 = vrot.slane %v5509_v61, %v7540_v50 }
0x103f   :  { %v5462_v59 = vpop.f32.mrf.mxu1  ;;  %v6749_v35 = vpop.f32.mrf.mxu0 }
0x1040   :  { %v5532_v30 = vrot.slane %v5524_v2, %v7540_v50  ;;  %v5539_v32 = vrot.slane %v5525_v20, %v7540_v50 }
0x1041   :  { %v6744_v56 = vpop.f32.mrf.mxu1  ;;  %v5505_v25 = vpop.f32.mrf.mxu0 }
0x1042   :  { %v5540_v44 = vcombine.low %v5516_v43, %v5532_v30  ;;  %v5541_v33 = vcombine.high %v5516_v43, %v5532_v30  ;;  %v5556_v60 = vcombine.low %v5523_v7, %v5539_v32  ;;  %v5557_v13 = vcombine.high %v5523_v7, %v5539_v32 }
0x1043   :  { %v6750_v55 = vpop.f32.mrf.mxu0 }
0x1044   :  { %v5548_v19 = vrot.slane %v5540_v44, %v7543_v51  ;;  %v5555_v38 = vrot.slane %v5541_v33, %v7543_v51  ;;  %v5564_v39 = vrot.slane %v5556_v60, %v7543_v51  ;;  %v5571_v42 = vrot.slane %v5557_v13, %v7543_v51  ;;  %v6909_v44 = vld [vmem:[#allocation17 + $0x70] ss:$8 sps:$4 sm:$0xff]   ;;  %v6911_v33 = vld [vmem:[#allocation17 + $0x74] ss:$8 sps:$4 sm:$0xff]  }
0x1045   :  { %5923 = vmatprep.subr.bf16.mxu0 %v6911_v33 }
0x1046   :  { %v5576_v28 = vcombine.low %v5548_v19, %v5555_v38  ;;  %v6329_v12 = vcombine.high %v5548_v19, %v5555_v38  ;;  %v5592_v4 = vcombine.low %v5564_v39, %v5571_v42  ;;  %v6330_v58 = vcombine.high %v5564_v39, %v5571_v42  ;;  %5924 = vmatpush1.bf16.msra.mxu0 %v6909_v44  ;;  %v6912_v42 = vld [vmem:[#allocation17 + $0x60] ss:$8 sps:$4 sm:$0xff]  }
0x1048   :  { %v5583_v48 = vrot.slane %v5576_v28, %v7540_v50  ;;  %v5591_v8 = vrot.slane %v6329_v12, %v7540_v50  ;;  %v5599_v45 = vrot.slane %v5592_v4, %v7540_v50  ;;  %v5607_v52 = vrot.slane %v6330_v58, %v7540_v50  ;;  %v6914_v28 = vld [vmem:[#allocation17 + $0x64] ss:$8 sps:$4 sm:$0xff]   ;;  %v6915_v12 = vld [vmem:[#allocation17 + $0x50] ss:$8 sps:$4 sm:$0xff]   ;;  %v6917_v4 = vld [vmem:[#allocation17 + $0x54] ss:$8 sps:$4 sm:$0xff]  }
0x1049   :  { %5925 = vmatprep.subr.bf16.mxu0 %v6914_v28  ;;  %v6920_v58 = vld [vmem:[#allocation17 + $0x44] ss:$8 sps:$4 sm:$0xff]  }
0x104a   :  { %v5609_v18 = vcombine.high %v5583_v48, %v5591_v8  ;;  %v5625_v34 = vcombine.high %v5599_v45, %v5607_v52  ;;  %v5608_v16 = vcombine.low %v5583_v48, %v5591_v8  ;;  %v5624_v62 = vcombine.low %v5599_v45, %v5607_v52  ;;  %5926 = vmatpush1.bf16.msra.mxu0 %v6912_v42  ;;  %v6923_v48 = vld [vmem:[#allocation17 + $0x34] ss:$8 sps:$4 sm:$0xff]   ;;  %v6921_v8 = vld [vmem:[#allocation17 + $0x30] ss:$8 sps:$4 sm:$0xff]   ;;  %v6926_v45 = vld [vmem:[#allocation17 + $0x24] ss:$8 sps:$4 sm:$0xff]  }
0x104b   :  { %5927 = vmatprep.subr.bf16.mxu0 %v6917_v4  ;;  %v6924_v52 = vld [vmem:[#allocation17 + $0x20] ss:$8 sps:$4 sm:$0xff]  }
0x104c   :  { %v5623_v5 = vrot.slane %v5609_v18, %v7543_v51  ;;  %v5639_v31 = vrot.slane %v5625_v34, %v7543_v51  ;;  %v5616_v14 = vrot.slane %v5608_v16, %v7543_v51  ;;  %v5632_v23 = vrot.slane %v5624_v62, %v7543_v51  ;;  %v6929_v18 = vld [vmem:[#allocation17 + $0x14] ss:$8 sps:$4 sm:$0xff]   ;;  %v6927_v34 = vld [vmem:[#allocation17 + $0x10] ss:$8 sps:$4 sm:$0xff]   ;;  %v6932_v16 = vld [vmem:[#allocation17 + $0x4] ss:$8 sps:$4 sm:$0xff]  }
0x104d   :  { %v6930_v62 = vld [vmem:[#allocation17] ss:$8 sps:$4 sm:$0xff]  }
0x104e   :  { %v5642_v11 = vcombine.low %v5623_v5, %v5639_v31  ;;  %v5641_v6 = vcombine.high %v5616_v14, %v5632_v23  ;;  %v5640_v57 = vcombine.low %v5616_v14, %v5632_v23  ;;  %v5643_v37 = vcombine.high %v5623_v5, %v5639_v31  ;;  %5928 = vmatpush1.bf16.msra.mxu0 %v6915_v12  ;;  %v6933_v5 = vld [vmem:[#allocation19 + $0x78] sm:$0xff]   ;;  %v6935_v14 = vld [vmem:[#allocation19 + $0x70] sm:$0xff]  }
0x104f   :  { %5929 = vmatprep.subr.bf16.mxu0 %v6920_v58  ;;  %v6934_v31 = vld [vmem:[#allocation19 + $0x38] sm:$0xff]   ;;  %6477 = vmatprep.subr.bf16.mxu1 %v6933_v5  ;;  %v6936_v23 = vld [vmem:[#allocation19 + $0x30] sm:$0xff]  }
0x1050   :  { %v6816_v50 = vpack.i.bf16 %v5642_v11, %v4373_v36  ;;  %v6811_v54 = vpack.i.bf16 %v5641_v6, %v4372_v53  ;;  %v6821_v51 = vpack.i.bf16 %v5643_v37, %v4374_v46  ;;  %v6938_v11 = vld [vmem:[#allocation19 + $0x28] sm:$0xff]   ;;  %v6939_v6 = vld [vmem:[#allocation19 + $0x60] sm:$0xff]  }
0x1052   :  { %6817 = vrot.lane.b32.xlu1 %v6816_v50, %s8628_s29  ;;  %6812 = vrot.lane.b32.xlu0 %v6811_v54, %s7300_s18  ;;  %v6941_v50 = vld [vmem:[#allocation19 + $0x58] sm:$0xff]  }
0x1053   :  { %5930 = vmatpush1.bf16.msra.mxu0 %v6918_v40  ;;  %v6942_v54 = vld [vmem:[#allocation19 + $0x18] sm:$0xff]  }
0x1054   :  { %5931 = vmatprep.subr.bf16.mxu0 %v6923_v48 }
0x1056   :  { %6822 = vrot.lane.b32.xlu1 %v6821_v51, %s7301_s30 }
0x1057   :  { %5932 = vmatpush1.bf16.msra.mxu0 %v6921_v8 }
0x1058   :  { %5933 = vmatprep.subr.bf16.mxu0 %v6926_v45 }
0x105b   :  { %5934 = vmatpush1.bf16.msra.mxu0 %v6924_v52 }
0x105c   :  { %5935 = vmatprep.subr.bf16.mxu0 %v6929_v18 }
0x105f   :  { %5936 = vmatpush1.bf16.msra.mxu0 %v6927_v34 }
0x1060   :  { %5937 = vmatprep.subr.bf16.mxu0 %v6932_v16 }
0x1063   :  { %5938 = vmatpush1.bf16.msra.mxu0 %v6930_v62 }
0x10c4   :  { %v6818_v29 = vpop.permute.xlu1 %6817  ;;  %v6813_v10 = vpop.permute.xlu0 %6812 }
0x10c5   :  { %v6815_v3 = vunpack.i.h.bf16 %v6813_v10  ;;  %v6814_v1 = vunpack.i.l.bf16 %v6813_v10  ;;  %v6820_v36 = vunpack.i.h.bf16 %v6818_v29  ;;  %v6819_v61 = vunpack.i.l.bf16 %v6818_v29 }
0x10c7   :  { %v4387_v53 = vsel %vm1008_vm1, %v4371_v24, %v6814_v1  ;;  %v5656_v49 = vsel %vm1008_vm1, %v5640_v57, %v6815_v3  ;;  %v6940_v57 = vld [vmem:[#allocation19 + $0x20] sm:$0xff]  }
0x10c8   :  { %v6823_v9 = vpop.permute.xlu1 %6822  ;;  %v4388_v21 = vsel %vm1585_vm4, %v4387_v53, %v6819_v61  ;;  %v5657_v17 = vsel %vm1585_vm4, %v5656_v49, %v6820_v36  ;;  %v6340_v53 = vld [vmem:[%s8600_s16] ss:$0 sm:$0xff] }
0x10c9   :  { %v6825_v2 = vunpack.i.h.bf16 %v6823_v9  ;;  %v6824_v20 = vunpack.i.l.bf16 %v6823_v9 }
0x10cb   :  { %v4389_v46 = vsel %vm1587_vm5, %v4388_v21, %v6824_v20  ;;  %v5658_v59 = vsel %vm1587_vm5, %v5657_v17, %v6825_v2  ;;  %v6341_v20 = vld [vmem:[%s8601_s17] ss:$0 sm:$0xff] }
0x10cc   :  { %v5659_v35 = vpack.c.bf16 %v5658_v59, %v4389_v46 }
0x10ce   :  { %6768 = vmatmul.mubr.bf16.vlgmr.msra.gmra.mxu1 %v5659_v35  ;;  %v6943_v35 = vld [vmem:[#allocation19 + $0x50] sm:$0xff]  }
0x10cf   :  { %6478 = vmatpush3.bf16.msra.mxu1 %v6934_v31 }
0x10d0   :  { %6479 = vmatprep.subr.bf16.mxu1 %v6935_v14 }
0x10d3   :  { %6480 = vmatpush3.bf16.msra.mxu1 %v6936_v23 }
0x10d4   :  { %6481 = vmatprep.subr.bf16.mxu1 %v6937_v15 }
0x10d7   :  { %6482 = vmatpush3.bf16.msra.mxu1 %v6938_v11 }
0x10d8   :  { %6483 = vmatprep.subr.bf16.mxu1 %v6939_v6 }
0x10db   :  { %6484 = vmatpush3.bf16.msra.mxu1 %v6940_v57 }
0x10dc   :  { %6485 = vmatprep.subr.bf16.mxu1 %v6941_v50 }
0x10df   :  { %6486 = vmatpush3.bf16.msra.mxu1 %v6942_v54 }
0x10e0   :  { %6487 = vmatprep.subr.bf16.mxu1 %v6943_v35 }
0x118e   :  { %v5765_v41 = vpop.f32.mrf.mxu1 }
0x118f   :  { %v5766_v24 = vadd.f32 %v6331_v47, %v5765_v41  ;;  %v6945_v41 = vld [vmem:[#allocation19 + $0x48] sm:$0xff]  }
0x1190   :  { %v6769_v43 = vpop.f32.mrf.mxu1 }
0x1191   :  { %v5772_v7 = vadd.f32 %v5766_v24, %v8086_v26  ;;  %v6946_v24 = vld [vmem:[#allocation19 + $0x8] sm:$0xff]   ;;  %v6947_v43 = vld [vmem:[#allocation19 + $0x40] sm:$0xff]  }
0x1192   :  { %v5768_v30 = vpop.f32.mrf.mxu1 }
0x1193   :  { %v5769_v32 = vadd.f32 %v6331_v47, %v5768_v30  ;;  %5774 = vadd.xlane.f32.xlu0 %v5772_v7  ;;  %v6944_v47 = vld [vmem:[#allocation19 + $0x10] sm:$0xff]   ;;  %v5831_v30 = vld [vmem:[%s8603_s19] sm:$0x3] }
0x1194   :  { %v6770_v56 = vpop.f32.mrf.mxu1  ;;  %6488 = vmatpush3.bf16.msra.mxu1 %v6944_v47  ;;  %v5840_v44 = vrot.slane %v5831_v30, %v7501_v22 }
0x1195   :  { %v5773_v25 = vadd.f32 %v5769_v32, %v8088_v63  ;;  %6489 = vmatprep.subr.bf16.mxu1 %v6945_v41  ;;  %v5836_v56 = vrot.slane %v5831_v30, %v7509_v27  ;;  %v6358_v27 = vld [vmem:[%s8605_s21] ss:$0 sm:$0xff] }
0x1197   :  { %5776 = vadd.xlane.f32.xlu1 %v5773_v25 }
0x1198   :  { %6490 = vmatpush3.bf16.msra.mxu1 %v6946_v24 }
0x1199   :  { %6491 = vmatprep.subr.bf16.mxu1 %v6947_v43 }
0x121c   :  { %v5775_v60 = vpop.xlane.xlu0 %5774 }
0x121d   :  { %v5778_v13 = vmul.f32 0.0078125, %v5775_v60 }
0x121f   :  { %v8546_v55 = vsub.f32 %v5772_v7, %v5778_v13  ;;  %v6948_v7 = vld [vmem:[#allocation19] sm:$0xff]  }
0x1220   :  { %v5777_v19 = vpop.xlane.xlu1 %5776  ;;  %6492 = vmatpush3.bf16.msra.mxu1 %v6948_v7 }
0x1221   :  { %v5779_v38 = vmul.f32 0.0078125, %v5777_v19  ;;  %v5782_v26 = vmul.f32 %v8546_v55, %v8546_v55 }
0x1223   :  { %v8550_v39 = vsub.f32 %v5773_v25, %v5779_v38  ;;  %5784 = vadd.xlane.f32.xlu0 %v5782_v26 }
0x1225   :  { %v5783_v63 = vmul.f32 %v8550_v39, %v8550_v39 }
0x1227   :  { %5786 = vadd.xlane.f32.xlu0 %v5783_v63 }
0x12ac   :  { %v5785_v37 = vpop.xlane.xlu0 %5784 }
0x12ad   :  { %v5788_v51 = vmul.f32 0.0078125, %v5785_v37  ;;  %v6375_v37 = vld [vmem:[%s8606_s22] ss:$0 sm:$0xff] }
0x12af   :  { %v5791_v29 = vadd.f32 1e-12, %v5788_v51 }
0x12b0   :  { %v5787_v10 = vpop.xlane.xlu0 %5786 }
0x12b1   :  { %7018 = vrsqrt.f32 %v5791_v29  ;;  %v5789_v3 = vmul.f32 0.0078125, %v5787_v10  ;;  %v6376_v29 = vld [vmem:[%s8607_s23] ss:$0 sm:$0xff] }
0x12b3   :  { %v5792_v1 = vadd.f32 1e-12, %v5789_v3 }
0x12b5   :  { %7020 = vrsqrt.f32 %v5792_v1 }
0x12be   :  { %v7019_v36 = vpop.eup %7018 }
0x12bf   :  { %v5795_v61 = vmul.f32 %v7019_v36, %v8546_v55 }
0x12c1   :  { %v5803_v2 = vmul.f32 %v6340_v53, %v5795_v61 }
0x12c2   :  { %v7021_v49 = vpop.eup %7020 }
0x12c3   :  { %v5796_v9 = vmul.f32 %v7021_v49, %v8550_v39  ;;  %v5812_v17 = vadd.f32 %v6341_v20, %v5803_v2 }
0x12c5   :  { %v5804_v21 = vmul.f32 %v6340_v53, %v5796_v9 }
0x12c7   :  { %v5813_v46 = vadd.f32 %v6341_v20, %v5804_v21 }
0x12c9   :  { %v5814_v59 = vpack.c.bf16 %v5813_v46, %v5812_v17 }
0x12cb   :  { %5956 = vmatmul.mubr.bf16.vlgmr.msra.gmra.mxu0 %v5814_v59 }
0x138b   :  { %v5957_v32 = vpop.f32.mrf.mxu0 }
0x138c   :  { %v5958_v13 = vadd.f32 %v5957_v32, %v5836_v56 }
0x138d   :  { %v5959_v25 = vpop.f32.mrf.mxu0 }
0x138e   :  { %v5960_v19 = vadd.f32 %v5959_v25, %v5840_v44 }
0x138f   :  { %v5961_v33 = vpop.f32.mrf.mxu0 }
0x1390   :  { %v5962_v60 = vadd.f32 %v5961_v33, %v5836_v56 }
0x1391   :  { %v5963_v55 = vpop.f32.mrf.mxu0 }
0x1392   :  { %v5964_v38 = vadd.f32 %v5963_v55, %v5840_v44  ;;  %v5966_v26 = vpack.c.bf16 %v5962_v60, %v5958_v13 }
0x1394   :  { %v5967_v39 = vpack.c.bf16 %v5964_v38, %v5960_v19  ;;  %v5968_v42 = vmax.bf16 %v7298_v0, %v5966_v26 }
0x1396   :  { %v5969_v63 = vmax.bf16 %v7298_v0, %v5967_v39 }
0x1398   :  { %6137 = vmatprep.mubr.bf16.mxu1 %v5969_v63 }
0x1399   :  { %6138 = vmatmul.mubr.bf16.vlgmr.msra.gmra.mxu1 %v5968_v42 }
0x1459   :  { %v6493_v28 = vpop.f32.mrf.mxu1 }
0x145b   :  { %v6494_v22 = vpop.f32.mrf.mxu1 }
0x145c   :  { %v6495_v12 = vadd.f32 %v6494_v22, %v6493_v28 }
0x145d   :  { %v6496_v4 = vpop.f32.mrf.mxu1 }
0x145e   :  { %v6140_v58 = vadd.f32 %v6495_v12, %v6358_v27 }
0x145f   :  { %v6497_v40 = vpop.f32.mrf.mxu1 }
0x1460   :  { %v6498_v48 = vadd.f32 %v6497_v40, %v6496_v4  ;;  %v6146_v8 = vadd.f32 %v6140_v58, %v5812_v17 }
0x1462   :  { %v6143_v45 = vadd.f32 %v6498_v48, %v6358_v27  ;;  %6148 = vadd.xlane.f32.xlu1 %v6146_v8 }
0x1464   :  { %v6147_v52 = vadd.f32 %v6143_v45, %v5813_v46 }
0x1466   :  { %6150 = vadd.xlane.f32.xlu0 %v6147_v52 }
0x14eb   :  { %v6149_v18 = vpop.xlane.xlu1 %6148 }
0x14ec   :  { %v6152_v0 = vmul.f32 0.0078125, %v6149_v18 }
0x14ee   :  { %v6154_v34 = vsub.f32 %v6146_v8, %v6152_v0 }
0x14ef   :  { %v6151_v16 = vpop.xlane.xlu0 %6150 }
0x14f0   :  { %v6153_v62 = vmul.f32 0.0078125, %v6151_v16  ;;  %v6156_v5 = vmul.f32 %v6154_v34, %v6154_v34 }
0x14f2   :  { %v6155_v31 = vsub.f32 %v6147_v52, %v6153_v62  ;;  %6158 = vadd.xlane.f32.xlu1 %v6156_v5 }
0x14f4   :  { %v6157_v14 = vmul.f32 %v6155_v31, %v6155_v31 }
0x14f6   :  { %6160 = vadd.xlane.f32.xlu0 %v6157_v14 }
0x157b   :  { %v6159_v23 = vpop.xlane.xlu1 %6158 }
0x157c   :  { %v6162_v15 = vmul.f32 0.0078125, %v6159_v23 }
0x157e   :  { %v6165_v11 = vadd.f32 1e-12, %v6162_v15 }
0x157f   :  { %v6161_v6 = vpop.xlane.xlu0 %6160 }
0x1580   :  { %7022 = vrsqrt.f32 %v6165_v11  ;;  %v6163_v57 = vmul.f32 0.0078125, %v6161_v6 }
0x1582   :  { %v6166_v50 = vadd.f32 1e-12, %v6163_v57 }
0x1584   :  { %7024 = vrsqrt.f32 %v6166_v50 }
0x158d   :  { %v7023_v54 = vpop.eup %7022 }
0x158e   :  { %v6169_v51 = vmul.f32 %v7023_v54, %v6154_v34 }
0x1590   :  { %v6177_v10 = vmul.f32 %v6375_v37, %v6169_v51 }
0x1591   :  { %v7025_v3 = vpop.eup %7024 }
0x1592   :  { %v6170_v1 = vmul.f32 %v7025_v3, %v6155_v31  ;;  %v6186_v36 = vadd.f32 %v6376_v29, %v6177_v10 }
0x1594   :  { %v6178_v61 = vmul.f32 %v6375_v37, %v6170_v1  ;;  %6188 = vst [vmem:[#allocation20] sm:$0xff] %v6186_v36 }
0x1596   :  { %v6187_v53 = vadd.f32 %v6376_v29, %v6178_v61 }
0x1598   :  { %6189 = vst [vmem:[#allocation20 + $0x8] sm:$0xff] %v6187_v53 }
0x1599   :  { %7258 = shalt.err (!%p7255_p3)
}
0x159a   :  { %6201 = dma.vmem_to_hbm [thread:$0]  %s6196_s25, 256, %s8608_s24, [#allocation4], %s7286_s4, %s7286_s4, %s7287_s1  }
0x159b   :  { %7279 = dma.done.wait [#allocation4], 256  }
0x159c   :  { %7280 = vsyncadd [#allocation4], 4294967040 }
0x159d   :  { %6205 = vsyncpa [#allocation3], 1 }
0x159e   :  { %6206 = vsyncpa [#allocation6], 1 }
0x159f   :  { %6207 = vsyncpa [#allocation9], 1 }
0x15a0   :  { %6208 = vsyncpa [#allocation12], 1 }
0x15a1   :  { %6209 = vsyncpa [#allocation15], 1 }
0x15a2   :  { %6210 = vsyncpa [#allocation18], 1 }
0x15a3   :  { %6211 = vsyncpa [#allocation4], 1 }

</bundles_post_ra>
